<compile_context>
chip_gen: v5e
topology: v5e:2x2
jax: 0.10.0
libtpu: 0.0.40
codegen_flags: <defaults>
</compile_context>

<pallas_src>
import functools

import jax
import jax.numpy as jnp
from jax import lax
from jax.experimental import pallas as pl
from jax.experimental.pallas import tpu as pltpu


def _dot_f32acc(a, b):
    """MXU dot with f32 accumulation; full-precision passes for f32 operands."""
    prec = (lax.Precision.HIGHEST if a.dtype == jnp.float32
            else lax.Precision.DEFAULT)
    return jnp.dot(a, b, preferred_element_type=jnp.float32, precision=prec)


def _epcor_kernel(src_ref, tgt_emb_ref, yy_ref, pts_ref, out_ref,
                  m_scr, acc_scr, *, tm, exp_dtype):
    """One (batch, N-tile) grid step: full online-softmax sweep over M.

    src_ref     : (TN, C)  2*src_emb rows (matmul dtype, pre-scaled/cast)
    tgt_emb_ref : (C, M)   tgt embeddings (matmul dtype), VMEM-resident
    yy_ref      : (1, M)   ||tgt_emb_j||^2, f32, VMEM-resident
    pts_ref     : (M, 4)   [tgt_x, tgt_y, tgt_z, 1], exp dtype, VMEM-resident
    out_ref     : (TN, 3)  normalized correspondence points
    m_scr       : (TN, 1)  online-softmax running max (f32)
    acc_scr     : (TN, 4)  running [sum_j p*tgt_j | sum_j p] (f32)
    """
    m_scr[...] = jnp.full_like(m_scr, -jnp.inf)
    acc_scr[...] = jnp.zeros_like(acc_scr)

    num_chunks = tgt_emb_ref.shape[-1] // tm

    @pl.loop(0, num_chunks)
    def _(j):
        off = pl.multiple_of(j * tm, tm)
        # pd_ij = 2<s_i, t_j> - ||t_j||^2   (||s_i||^2 cancels in the softmax;
        # the 2x is already folded into src_ref by the wrapper).
        inner = _dot_f32acc(src_ref[...],
                            tgt_emb_ref[:, pl.ds(off, tm)])        # (TN, tm)
        pd = inner - yy_ref[:, pl.ds(off, tm)]                      # (TN, tm) f32

        # Online softmax over the M (tgt) axis.
        m_prev = m_scr[...]
        m_new = jnp.maximum(m_prev, jnp.max(pd, axis=1, keepdims=True))
        alpha = jnp.exp(m_prev - m_new)                             # (TN, 1) f32
        p = jnp.exp((pd - m_new).astype(exp_dtype))                 # (TN, tm)
        # One MXU pass yields both the weighted point sum (cols 0..2) and the
        # softmax denominator (col 3, via the appended ones column).
        acc_scr[...] = alpha * acc_scr[...] + _dot_f32acc(p, pts_ref[pl.ds(off, tm), :])
        m_scr[...] = m_new

    # Exact divide: runs once per N-tile on a tiny (TN, 4) slab.
    out_ref[...] = (acc_scr[:, 0:3] / acc_scr[:, 3:4]).astype(out_ref.dtype)


def _pick_tile(dim, target, align):
    """Largest divisor of `dim` that is <= target and a multiple of `align`,
    falling back to the full dim (block == full array dim is always legal)."""
    if dim <= target:
        return dim
    t = (target // align) * align
    while t >= align:
        if dim % t == 0:
            return t
        t -= align
    return dim


def _default_exp_dtype():
    """bf16 exp / p path on chips with a bf16 VPU/EUP (v6e, v7x); f32 on
    v5e and older where bf16 elementwise would only insert casts."""
    try:
        kind = jax.devices()[0].device_kind.lower()
    except Exception:
        return jnp.float32
    if any(v in kind for v in ("v2", "v3", "v4", "v5")):
        return jnp.float32
    return jnp.bfloat16


def epcor_forward(src_emb, tgt_emb, src, tgt, *, block_n=1024, block_m=512,
                  matmul_dtype=jnp.bfloat16, exp_dtype=None):
    """Training-mode EPCOR forward (getCopairALL).

    Args:
      src_emb: (B, C, N) float32
      tgt_emb: (B, C, M) float32
      src:     (B, 3, N) float32   (unused by this branch, kept for parity)
      tgt:     (B, 3, M) float32
      block_n: src-point tile (src tile is tiny in VMEM, so keep this large).
      block_m: in-kernel chunk of the resident tgt side.
      matmul_dtype: MXU operand dtype for the score contraction (default bf16;
        pass jnp.float32 for full precision).
      exp_dtype: dtype of the exp / p path (None = auto: bf16 on v6e/v7x,
        f32 on v5e and older).
    Returns:
      src_corr (B, 3, N), src_weight (B, N),
      outlier_src_mask (B, N, 1) bool, mask_tgt (B, N, 1) bool
    """
    B, C, N = src_emb.shape
    _, _, M = tgt_emb.shape
    del src  # not used in getCopairALL
    f32 = jnp.float32
    if matmul_dtype is None:
        matmul_dtype = src_emb.dtype
    if exp_dtype is None:
        exp_dtype = _default_exp_dtype()

    tn = _pick_tile(N, block_n, 16)      # 16-aligned for bf16 sublane packing
    # v7x megacore: keep at least 2 parallel grid blocks when possible.
    if B * (N // tn) < 2:
        half = tn // 2
        if half >= 16 and half % 16 == 0 and N % half == 0:
            tn = half
    tm = _pick_tile(M, block_m, 128)
    assert N % tn == 0 and M % tm == 0

    # Wrapper-side prep (all O(B*(N+M)*C); the kernel is O(B*N*M*C)):
    #  * 2x score scale folded into the src operand (exact, power of two).
    #  * operands cast to matmul_dtype ONCE here, not per tile in the kernel.
    #  * yy computed in f32 from the unquantized embeddings.
    #  * target points augmented with a ones column -> one MXU pass gives both
    #    the weighted sum and the softmax denominator.
    src_prep = (2.0 * jnp.transpose(src_emb, (0, 2, 1)).astype(f32)
                ).astype(matmul_dtype)                              # (B, N, C)
    tgt_prep = tgt_emb.astype(matmul_dtype)                         # (B, C, M)
    yy = jnp.sum(tgt_emb.astype(f32) ** 2, axis=1, keepdims=True)   # (B, 1, M)
    pts_aug = jnp.concatenate(
        [jnp.transpose(tgt, (0, 2, 1)).astype(f32),
         jnp.ones((B, M, 1), dtype=f32)], axis=-1).astype(exp_dtype)  # (B, M, 4)

    mm_bytes = jnp.dtype(matmul_dtype).itemsize
    p_bytes = jnp.dtype(exp_dtype).itemsize
    kernel = functools.partial(_epcor_kernel, tm=tm, exp_dtype=exp_dtype)

    corr_n3 = pl.pallas_call(
        kernel,
        out_shape=jax.ShapeDtypeStruct((B, N, 3), f32),
        grid_spec=pltpu.PrefetchScalarGridSpec(
            num_scalar_prefetch=0,
            grid=(B, N // tn),
            in_specs=[
                pl.BlockSpec((None, tn, C), lambda b, n: (b, n, 0)),
                # Full-M tgt-side blocks whose index ignores n: Pallas skips
                # the DMA when the block index is unchanged, so these are
                # fetched once per batch and stay VMEM-resident.
                pl.BlockSpec((None, C, M), lambda b, n: (b, 0, 0)),
                pl.BlockSpec((None, 1, M), lambda b, n: (b, 0, 0)),
                pl.BlockSpec((None, M, 4), lambda b, n: (b, 0, 0)),
            ],
            out_specs=pl.BlockSpec((None, tn, 3), lambda b, n: (b, n, 0)),
            scratch_shapes=[
                pltpu.VMEM((tn, 1), f32),   # running max
                pltpu.VMEM((tn, 4), f32),   # running [weighted sum | denom]
            ],
        ),
        compiler_params=pltpu.CompilerParams(
            dimension_semantics=("parallel", "parallel"),
            vmem_limit_bytes=32 * 1024 * 1024,   # comfortably under v7x 64 MiB
        ),
        cost_estimate=pl.CostEstimate(
            flops=2 * B * N * M * (C + 4),
            transcendentals=B * N * M,
            bytes_accessed=B * (N * C * mm_bytes + C * M * mm_bytes
                                + M * 4 + M * 4 * p_bytes + N * 3 * 4),
        ),
    )(src_prep, tgt_prep, yy, pts_aug)

    src_corr = jnp.transpose(corr_n3, (0, 2, 1))                    # (B, 3, N)

    # Trivial constant outputs of the training branch (pure glue, no compute).
    src_weight = jnp.ones((B, N), dtype=f32) / N
    outlier_src_mask = jnp.zeros((B, N, 1), dtype=jnp.bool_)
    mask_tgt = jnp.zeros((B, N, 1), dtype=jnp.bool_)
    return src_corr, src_weight, outlier_src_mask, mask_tgt


def _reference(src_emb, tgt_emb, tgt):
    """Pure-JAX (full f32) reference of getCopairALL."""
    inner = -2.0 * jnp.einsum("bcn,bcm->bnm", src_emb, tgt_emb,
                              precision=lax.Precision.HIGHEST)
    xx = jnp.sum(src_emb ** 2, axis=1)[:, :, None]      # (B, N, 1)
    yy = jnp.sum(tgt_emb ** 2, axis=1)[:, None, :]      # (B, 1, M)
    pd = -xx - inner - yy
    scores = jax.nn.softmax(pd, axis=2)                  # (B, N, M)
    src_corr = jnp.einsum("bdm,bnm->bdn", tgt, scores,
                          precision=lax.Precision.HIGHEST)   # (B, 3, N)
    return src_corr


if __name__ == "__main__":
    # Small shapes consistent with the module: B=2, C_emb=32, N=256, M=384.
    B, C, N, M = 2, 32, 256, 384
    key = jax.random.PRNGKey(0)
    k1, k2, k3, k4 = jax.random.split(key, 4)
    src_emb = jax.random.normal(k1, (B, C, N), dtype=jnp.float32)
    tgt_emb = jax.random.normal(k2, (B, C, M), dtype=jnp.float32)
    src = jax.random.normal(k3, (B, 3, N), dtype=jnp.float32)
    tgt = jax.random.normal(k4, (B, 3, M), dtype=jnp.float32)

    ref_corr = _reference(src_emb, tgt_emb, tgt)

    # 1) Default (performance) path: bf16 MXU operands, bf16 exp on v6e/v7x.
    #    bf16 logits can shift near-tied softmax weights, so the comparison
    #    against the exact f32 reference is necessarily loose.
    src_corr, src_weight, outlier_src_mask, mask_tgt = jax.block_until_ready(
        epcor_forward(src_emb, tgt_emb, src, tgt))
    assert src_corr.shape == (B, 3, N)
    assert src_weight.shape == (B, N)
    assert outlier_src_mask.shape == (B, N, 1) and outlier_src_mask.dtype == jnp.bool_
    assert mask_tgt.shape == (B, N, 1) and mask_tgt.dtype == jnp.bool_
    err = jnp.abs(src_corr - ref_corr)
    assert float(jnp.max(err)) < 0.3 and float(jnp.mean(err)) < 0.03, (
        float(jnp.max(err)), float(jnp.mean(err)))

    # 2) Full-precision path (also exercises multi-N-tile grid + the in-kernel
    #    multi-chunk M loop): validates the kernel mechanics tightly — the
    #    dropped xx term and the online softmax are exact rewrites.
    src_corr32, _, _, _ = jax.block_until_ready(
        epcor_forward(src_emb, tgt_emb, src, tgt, block_n=128, block_m=128,
                      matmul_dtype=jnp.float32, exp_dtype=jnp.float32))
    assert jnp.allclose(src_corr32, ref_corr, atol=1e-4, rtol=1e-4), (
        float(jnp.max(jnp.abs(src_corr32 - ref_corr))))

    print("KERNEL_OK")
</pallas_src>

<mosaic_0001>
module attributes {stable_mosaic.version = 11 : i64} {
  func.func @_epcor_kernel(%arg0: i32, %arg1: i32, %arg2: memref<1x256x32xbf16, #tpu.memory_space<vmem>>, %arg3: memref<1x32x384xbf16, #tpu.memory_space<vmem>>, %arg4: memref<1x1x384xf32, #tpu.memory_space<vmem>>, %arg5: memref<1x384x4xbf16, #tpu.memory_space<vmem>>, %arg6: memref<1x256x3xf32, #tpu.memory_space<vmem>>, %arg7: memref<256x1xf32, #tpu.memory_space<vmem>>, %arg8: memref<256x4xf32, #tpu.memory_space<vmem>>) attributes {dimension_semantics = [#tpu.dimension_semantics<parallel>, #tpu.dimension_semantics<parallel>], iteration_bounds = array<i64: 2, 1>, scalar_prefetch = 0 : i64, scratch_operands = 2 : i64, tpu.core_type = #tpu.core_type<tc>, window_params = [{transform_indices = @transform_0, window_bounds = array<i64: 1, 256, 32>}, {transform_indices = @transform_1, window_bounds = array<i64: 1, 32, 384>}, {transform_indices = @transform_2, window_bounds = array<i64: 1, 1, 384>}, {transform_indices = @transform_3, window_bounds = array<i64: 1, 384, 4>}, {transform_indices = @transform_4, window_bounds = array<i64: 1, 256, 3>}]} {
    %cst = arith.constant 0xFF800000 : f32
    %0 = vector.broadcast %cst : f32 to vector<256x1xf32>
    %c0 = arith.constant 0 : index
    %c0_0 = arith.constant 0 : index
    %1 = vector.load %arg7[%c0, %c0_0] : memref<256x1xf32, #tpu.memory_space<vmem>>, vector<256x1xf32>
    tpu.vector_store %arg7[%c0, %c0_0], %0 {strides = array<i32>} : memref<256x1xf32, #tpu.memory_space<vmem>>, vector<256x1xf32>,
    %cst_1 = arith.constant 0.000000e+00 : f32
    %2 = vector.broadcast %cst_1 : f32 to vector<256x4xf32>
    %c0_2 = arith.constant 0 : index
    %c0_3 = arith.constant 0 : index
    %3 = vector.load %arg8[%c0_2, %c0_3] : memref<256x4xf32, #tpu.memory_space<vmem>>, vector<256x4xf32>
    tpu.vector_store %arg8[%c0_2, %c0_3], %2 {strides = array<i32>} : memref<256x4xf32, #tpu.memory_space<vmem>>, vector<256x4xf32>,
    %c0_i32 = arith.constant 0 : i32
    %c1_i32 = arith.constant 1 : i32
    %4 = arith.muli %c0_i32, %c1_i32 : i32
    %c0_i32_4 = arith.constant 0 : i32
    %5 = arith.addi %c0_i32_4, %4 : i32
    %c384_i32 = arith.constant 384 : i32
    %6 = arith.muli %5, %c384_i32 : i32
    %7 = tpu.assume_multiple %6, 384 : i32
    %c0_5 = arith.constant 0 : index
    %c0_6 = arith.constant 0 : index
    %c0_7 = arith.constant 0 : index
    %8 = vector.load %arg2[%c0_5, %c0_6, %c0_7] : memref<1x256x32xbf16, #tpu.memory_space<vmem>>, vector<1x256x32xbf16>
    %9 = vector.shape_cast %8 : vector<1x256x32xbf16> to vector<256x32xbf16>
    %c0_8 = arith.constant 0 : index
    %c0_9 = arith.constant 0 : index
    %10 = arith.index_cast %7 : i32 to index
    %11 = vector.load %arg3[%c0_8, %c0_9, %10] : memref<1x32x384xbf16, #tpu.memory_space<vmem>>, vector<1x32x384xbf16>
    %12 = vector.shape_cast %11 : vector<1x32x384xbf16> to vector<32x384xbf16>
    %cst_10 = arith.constant dense<0.000000e+00> : vector<256x384xf32>
    %13 = tpu.matmul %9, %12, %cst_10 {dimension_numbers = #tpu.dot_dimension_numbers<[1], [0], [0], [1], [0, 0, 1, 1], [], []>} : vector<256x32xbf16>, vector<32x384xbf16>, vector<256x384xf32> -> vector<256x384xf32>
    %c0_11 = arith.constant 0 : index
    %c0_12 = arith.constant 0 : index
    %14 = arith.index_cast %7 : i32 to index
    %15 = vector.load %arg4[%c0_11, %c0_12, %14] : memref<1x1x384xf32, #tpu.memory_space<vmem>>, vector<1x1x384xf32>
    %16 = vector.shape_cast %15 : vector<1x1x384xf32> to vector<1x384xf32>
    %17 = vector.broadcast %16 : vector<1x384xf32> to vector<256x384xf32>
    %18 = arith.subf %13, %17 : vector<256x384xf32>
    %c0_13 = arith.constant 0 : index
    %c0_14 = arith.constant 0 : index
    %19 = vector.load %arg7[%c0_13, %c0_14] : memref<256x1xf32, #tpu.memory_space<vmem>>, vector<256x1xf32>
    %cst_15 = arith.constant dense<0xFF800000> : vector<256xf32>
    %20 = vector.multi_reduction <maximumf>, %18, %cst_15 [1] : vector<256x384xf32> to vector<256xf32>
    %21 = vector.shape_cast %20 : vector<256xf32> to vector<256x1xf32>
    %22 = arith.maximumf %19, %21 : vector<256x1xf32>
    %23 = arith.subf %19, %22 : vector<256x1xf32>
    %24 = math.exp %23 : vector<256x1xf32>
    %25 = vector.broadcast %22 : vector<256x1xf32> to vector<256x384xf32>
    %26 = arith.subf %18, %25 : vector<256x384xf32>
    %27 = arith.truncf %26 : vector<256x384xf32> to vector<256x384xbf16>
    %28 = math.exp %27 : vector<256x384xbf16>
    %c0_16 = arith.constant 0 : index
    %c0_17 = arith.constant 0 : index
    %29 = vector.load %arg8[%c0_16, %c0_17] : memref<256x4xf32, #tpu.memory_space<vmem>>, vector<256x4xf32>
    %30 = vector.broadcast %24 : vector<256x1xf32> to vector<256x4xf32>
    %31 = arith.mulf %30, %29 : vector<256x4xf32>
    %c0_18 = arith.constant 0 : index
    %32 = arith.index_cast %7 : i32 to index
    %c0_19 = arith.constant 0 : index
    %33 = vector.load %arg5[%c0_18, %32, %c0_19] : memref<1x384x4xbf16, #tpu.memory_space<vmem>>, vector<1x384x4xbf16>
    %34 = vector.shape_cast %33 : vector<1x384x4xbf16> to vector<384x4xbf16>
    %cst_20 = arith.constant dense<0.000000e+00> : vector<256x4xf32>
    %35 = tpu.matmul %28, %34, %cst_20 {dimension_numbers = #tpu.dot_dimension_numbers<[1], [0], [0], [1], [0, 0, 1, 1], [], []>} : vector<256x384xbf16>, vector<384x4xbf16>, vector<256x4xf32> -> vector<256x4xf32>
    %36 = arith.addf %31, %35 : vector<256x4xf32>
    %c0_21 = arith.constant 0 : index
    %c0_22 = arith.constant 0 : index
    %37 = vector.load %arg8[%c0_21, %c0_22] : memref<256x4xf32, #tpu.memory_space<vmem>>, vector<256x4xf32>
    tpu.vector_store %arg8[%c0_21, %c0_22], %36 {strides = array<i32>} : memref<256x4xf32, #tpu.memory_space<vmem>>, vector<256x4xf32>,
    %c0_23 = arith.constant 0 : index
    %c0_24 = arith.constant 0 : index
    %38 = vector.load %arg7[%c0_23, %c0_24] : memref<256x1xf32, #tpu.memory_space<vmem>>, vector<256x1xf32>
    tpu.vector_store %arg7[%c0_23, %c0_24], %22 {strides = array<i32>} : memref<256x1xf32, #tpu.memory_space<vmem>>, vector<256x1xf32>,
    %c1_i32_25 = arith.constant 1 : i32
    %c0_26 = arith.constant 0 : index
    %c0_27 = arith.constant 0 : index
    %39 = vector.load %arg8[%c0_26, %c0_27] : memref<256x4xf32, #tpu.memory_space<vmem>>, vector<256x3xf32>
    %c0_28 = arith.constant 0 : index
    %c3 = arith.constant 3 : index
    %40 = vector.load %arg8[%c0_28, %c3] : memref<256x4xf32, #tpu.memory_space<vmem>>, vector<256x1xf32>
    %41 = vector.broadcast %40 : vector<256x1xf32> to vector<256x3xf32>
    %42 = arith.divf %39, %41 : vector<256x3xf32>
    %c0_29 = arith.constant 0 : index
    %c0_30 = arith.constant 0 : index
    %c0_31 = arith.constant 0 : index
    %43 = vector.load %arg6[%c0_29, %c0_30, %c0_31] : memref<1x256x3xf32, #tpu.memory_space<vmem>>, vector<1x256x3xf32>
    %44 = vector.shape_cast %43 : vector<1x256x3xf32> to vector<256x3xf32>
    %45 = vector.shape_cast %42 : vector<256x3xf32> to vector<1x256x3xf32>
    tpu.vector_store %arg6[%c0_29, %c0_30, %c0_31], %45 {strides = array<i32>} : memref<1x256x3xf32, #tpu.memory_space<vmem>>, vector<1x256x3xf32>,
    return
  }
  func.func @transform_0(%arg0: i32, %arg1: i32) -> (i32, i32, i32) {
    %c0_i32 = arith.constant 0 : i32
    %c0_i32_0 = arith.constant 0 : i32
    return %arg0, %arg1, %c0_i32 : i32, i32, i32
  }
  func.func @transform_1(%arg0: i32, %arg1: i32) -> (i32, i32, i32) {
    %c0_i32 = arith.constant 0 : i32
    %c0_i32_0 = arith.constant 0 : i32
    %c0_i32_1 = arith.constant 0 : i32
    return %arg0, %c0_i32, %c0_i32_0 : i32, i32, i32
  }
  func.func @transform_2(%arg0: i32, %arg1: i32) -> (i32, i32, i32) {
    %c0_i32 = arith.constant 0 : i32
    %c0_i32_0 = arith.constant 0 : i32
    %c0_i32_1 = arith.constant 0 : i32
    return %arg0, %c0_i32, %c0_i32_0 : i32, i32, i32
  }
  func.func @transform_3(%arg0: i32, %arg1: i32) -> (i32, i32, i32) {
    %c0_i32 = arith.constant 0 : i32
    %c0_i32_0 = arith.constant 0 : i32
    %c0_i32_1 = arith.constant 0 : i32
    return %arg0, %c0_i32, %c0_i32_0 : i32, i32, i32
  }
  func.func @transform_4(%arg0: i32, %arg1: i32) -> (i32, i32, i32) {
    %c0_i32 = arith.constant 0 : i32
    %c0_i32_0 = arith.constant 0 : i32
    return %arg0, %arg1, %c0_i32 : i32, i32, i32
  }
}

</mosaic_0001>

<bundles_post_ra>
// kernel: tpu_custom_call.1
= control target key start
LH: loop header
LB: loop body
LE: loop exit
PB: predicated region body
PF: predicated region fallthrough
CT: control target
= control target key end

     0   :  { %s4175_s15 = smov 0   ;;  %s4177_s16 = smov 0   ;;  %s6033_s0 = inlined_call_operand.vmem [shape: bf16[2,256,32], index: 0, kind: input, shape index: {}]   ;;  %s6034_s1 = inlined_call_operand.vmem [shape: bf16[2,32,384], index: 1, kind: input, shape index: {}]   ;;  %s6035_s2 = inlined_call_operand.vmem [shape: f32[2,1,384], index: 2, kind: input, shape index: {}]   ;;  %s6036_s3 = inlined_call_operand.vmem [shape: bf16[2,384,4], index: 3, kind: input, shape index: {}]   ;;  %s6037_s4 = inlined_call_operand.vmem [shape: f32[2,256,3], index: 4, kind: output, shape index: {}]  }
   0x1   :  { %s4179_s17 = smov 0  }
   0x2 LB: > { %s26_s18 = sadd.s32 1, %s4140_s16  ;;  %p3472_p0 = scmp.ge.s32.totalorder %s4144_s17, 1  ;;  %s4144_s17 = sphi %s4179_s17, %s14_s17   ;;  %s4140_s16 = sphi %s4177_s16, %s6396_s16   ;;  %s4136_s15 = sphi %s4175_s15, %s6395_s15  }
   0x3   : > { %p28_p1 = scmp.ge.s32.totalorder %s26_s18, 2  ;;  %p212_p2 = scmp.lt.s32.totalorder %s4144_s17, 3 }
   0x5   : > { %s6398_s18 = smov (%p28_p1, %s26_s18), 0  ;;  %p213_p3 = pnand %p3472_p0, %p212_p2 }
   0x7   : > { %216 = sbr.rel (%p213_p3) target bundleno = 1306 (0x51a), region = 36 }
   0xc   : > { %p261_p4 = scmp.lt.s32.totalorder %s4136_s15, 1  ;;  %vm513_vm0 = vcmask 261120   ;;  %vm295_vm1 = vcmask 7168   ;;  %vm328_vm2 = vcmask 31744   ;;  %vm3312_vm7 = vcmask 23552  }
   0xe   : > { %s6400_s15 = smov (!%p261_p4, %s4136_s15), 1 }
   0xf   : > { %s3765_s19 = smul.u32 48, %s6400_s15  ;;  %s3713_s23 = sshll.u32 %s6400_s15, 7 }
  0x10   : > { %s4210_s26 = scalar_lea.vmem %s6033_s0, %s3713_s23  ;;  %s3766_s27 = smul.u32 3, %s6400_s15 }
  0x11   : > { %s4199_s22 = scalar_lea.vmem %s6034_s1, %s3765_s19  ;;  %v4218_v15 = vld [vmem:[%s4210_s26 + $0x40] sm:$0xff]  ;;  %v4225_v16 = vld [vmem:[%s4210_s26 + $0x48] sm:$0xff]  ;;  %v4232_v17 = vld [vmem:[%s4210_s26 + $0x50] sm:$0xff]  ;;  %s3767_s5 = smul.u32 192, %s6400_s15 }
  0x12   : > { %v3557_v0 = vld [vmem:[%s4199_s22 + $0x18] sm:$0xf]  ;;  %v3735_v1 = vld [vmem:[%s4199_s22 + $0x20] sm:$0xf0]  ;;  %v3734_v3 = vld [vmem:[%s4199_s22 + $0x1c] sm:$0xf]  ;;  %s278_s30 = scalar_lea.vmem %s6035_s2, %s3766_s27 }
  0x13   : > { %v3558_v2 = vor.u32 %v3735_v1, %v3557_v0  ;;  %v3559_v4 = vld [vmem:[%s4199_s22 + $0x24] sm:$0xf0]  ;;  %v3545_v6 = vld [vmem:[%s4199_s22] sm:$0xf]  ;;  %v3732_v7 = vld [vmem:[%s4199_s22 + $0x8] sm:$0xf0]  ;;  %s4796_s8 = scalar_lea.vmem %s6036_s3, %s3767_s5 }
  0x14   : > { %v3562_v5 = vor.u32 %v3734_v3, %v3559_v4  ;;  %v3731_v8 = vld [vmem:[%s4199_s22 + $0x4] sm:$0xf]  ;;  %v3547_v9 = vld [vmem:[%s4199_s22 + $0xc] sm:$0xf0]  ;;  %v3546_v10 = vor.u32 %v3732_v7, %v3545_v6  ;;  %v3565_v12 = vld [vmem:[%s4199_s22 + $0x20] sm:$0xf] }
  0x15   : > { %3761 = vmatpush.bf16.msra.mxu2 %v3558_v2  ;;  %568 = vmatpush.bf16.msra.mxu0 %v3558_v2  ;;  %v3550_v11 = vor.u32 %v3731_v8, %v3547_v9  ;;  %v3736_v13 = vld [vmem:[%s4199_s22 + $0x28] sm:$0xf0]  ;;  %v3553_v18 = vld [vmem:[%s4199_s22 + $0x8] sm:$0xf]  ;;  %v3733_v19 = vld [vmem:[%s4199_s22 + $0x10] sm:$0xf0] }
  0x16   : > { %3763 = vmatpush.bf16.msra.mxu3 %v3562_v5  ;;  %657 = vmatpush.bf16.msra.mxu1 %v3562_v5  ;;  %v3566_v14 = vor.u32 %v3736_v13, %v3565_v12  ;;  %v3554_v20 = vor.u32 %v3733_v19, %v3553_v18  ;;  %v4241_v21 = vld [vmem:[%s4210_s26 + $0x58] sm:$0xff]  ;;  %v4248_v22 = vld [vmem:[%s4210_s26 + $0x60] sm:$0xff]  ;;  %v4255_v23 = vld [vmem:[%s4210_s26 + $0x68] sm:$0xff]  ;;  %s3714_s9 = sshll.u32 %s6400_s15, 8 }
  0x17   : > { %v3715_v24 = vld [vmem:[%s4210_s26] sm:$0xff]  ;;  %v4265_v25 = vld [vmem:[%s4210_s26 + $0x70] sm:$0xff]  ;;  %v4272_v26 = vld [vmem:[%s4210_s26 + $0x78] sm:$0xff]  ;;  %s5640_s12 = scalar_lea.vmem %s6037_s4, %s3714_s9 }
  0x18   : > { %v3716_v27 = vld [vmem:[%s4210_s26 + $0x8] sm:$0xff]  ;;  %v3717_v28 = vld [vmem:[%s4210_s26 + $0x10] sm:$0xff]  ;;  %v3718_v31 = vld [vmem:[%s4210_s26 + $0x18] sm:$0xff] }
  0x19   : > { %3762 = vmatpush.bf16.msra.mxu2 %v3546_v10  ;;  %569 = vmatpush.bf16.msra.mxu0 %v3546_v10  ;;  %v3719_v34 = vld [vmem:[%s4210_s26 + $0x20] sm:$0xff]  ;;  %v3720_v37 = vld [vmem:[%s4210_s26 + $0x28] sm:$0xff]  ;;  %v3721_v40 = vld [vmem:[%s4210_s26 + $0x30] sm:$0xff] }
  0x1a   : > { %3764 = vmatpush.bf16.msra.mxu3 %v3550_v11  ;;  %658 = vmatpush.bf16.msra.mxu1 %v3550_v11  ;;  %v3722_v43 = vld [vmem:[%s4210_s26 + $0x38] sm:$0xff]  ;;  %v829_v55 = vld [vmem:[%s278_s30] sm:$0x7] }
  0x1b   : > { %v4343_v59 = vperm.slane %v829_v55, 0  ;;  %v4345_v60 = vperm.slane %v829_v55, 1  ;;  %v4353_v63 = vperm.slane %v829_v55, 2 }
  0x1c   : > { %3575 = vmatmul.msk.bf16.vlgmr.msra.gmra.mxu2 %vm513_vm0, %v4218_v15  ;;  %3567 = vmatmul.msk.bf16.vlgmr.msra.gmra.mxu0 %vm513_vm0, %v3715_v24 }
  0x1d   : > { %746 = vmatpush.bf16.msrb.mxu2 %v3566_v14  ;;  %3591 = vmatmul.msk.bf16.vlgmr.msra.gmra.mxu3 %vm513_vm0, %v4218_v15 }
  0x1e   : > { %3583 = vmatmul.msk.bf16.vlgmr.msra.gmra.mxu1 %vm513_vm0, %v3715_v24 }
  0x21   : > { %747 = vmatpush.bf16.msrb.mxu2 %v3554_v20 }
  0x2c   : > { %3576 = vmatmul.msk.bf16.gmra.mxu2 %vm513_vm0, %v4225_v16  ;;  %3568 = vmatmul.msk.bf16.gmra.mxu0 %vm513_vm0, %v3716_v27 }
  0x2d   : > { %3592 = vmatmul.msk.bf16.gmra.mxu3 %vm513_vm0, %v4225_v16 }
  0x2e   : > { %3584 = vmatmul.msk.bf16.gmra.mxu1 %vm513_vm0, %v3716_v27 }
  0x3c   : > { %3577 = vmatmul.msk.bf16.gmra.mxu2 %vm513_vm0, %v4232_v17  ;;  %3569 = vmatmul.msk.bf16.gmra.mxu0 %vm513_vm0, %v3717_v28 }
  0x3d   : > { %3593 = vmatmul.msk.bf16.gmra.mxu3 %vm513_vm0, %v4232_v17 }
  0x3e   : > { %3585 = vmatmul.msk.bf16.gmra.mxu1 %vm513_vm0, %v3717_v28 }
  0x4c   : > { %3578 = vmatmul.msk.bf16.gmra.mxu2 %vm513_vm0, %v4241_v21  ;;  %3570 = vmatmul.msk.bf16.gmra.mxu0 %vm513_vm0, %v3718_v31 }
  0x4d   : > { %3594 = vmatmul.msk.bf16.gmra.mxu3 %vm513_vm0, %v4241_v21 }
  0x4e   : > { %3586 = vmatmul.msk.bf16.gmra.mxu1 %vm513_vm0, %v3718_v31 }
  0x5c   : > { %3579 = vmatmul.msk.bf16.gmra.mxu2 %vm513_vm0, %v4248_v22  ;;  %3571 = vmatmul.msk.bf16.gmra.mxu0 %vm513_vm0, %v3719_v34 }
  0x5d   : > { %3595 = vmatmul.msk.bf16.gmra.mxu3 %vm513_vm0, %v4248_v22 }
  0x5e   : > { %3587 = vmatmul.msk.bf16.gmra.mxu1 %vm513_vm0, %v3719_v34 }
  0x6c   : > { %3580 = vmatmul.msk.bf16.gmra.mxu2 %vm513_vm0, %v4255_v23  ;;  %3572 = vmatmul.msk.bf16.gmra.mxu0 %vm513_vm0, %v3720_v37 }
  0x6d   : > { %3596 = vmatmul.msk.bf16.gmra.mxu3 %vm513_vm0, %v4255_v23 }
  0x6e   : > { %3588 = vmatmul.msk.bf16.gmra.mxu1 %vm513_vm0, %v3720_v37 }
  0x7c   : > { %3581 = vmatmul.msk.bf16.gmra.mxu2 %vm513_vm0, %v4265_v25  ;;  %3573 = vmatmul.msk.bf16.gmra.mxu0 %vm513_vm0, %v3721_v40 }
  0x7d   : > { %3597 = vmatmul.msk.bf16.gmra.mxu3 %vm513_vm0, %v4265_v25 }
  0x7e   : > { %3589 = vmatmul.msk.bf16.gmra.mxu1 %vm513_vm0, %v3721_v40 }
  0x8c   : > { %3582 = vmatmul.msk.bf16.gmra.mxu2 %vm513_vm0, %v4272_v26  ;;  %3574 = vmatmul.msk.bf16.gmra.mxu0 %vm513_vm0, %v3722_v43 }
  0x8d   : > { %3598 = vmatmul.msk.bf16.gmra.mxu3 %vm513_vm0, %v4272_v26 }
  0x8e   : > { %3590 = vmatmul.msk.bf16.gmra.mxu1 %vm513_vm0, %v3722_v43 }
  0x99   : > { %v571_v46 = vpop.f32.mrf.mxu0 }
  0x9a   : > { %v4348_v61 = vsub.f32 %v571_v46, %v4343_v59 }
  0x9b   : > { %v660_v47 = vpop.f32.mrf.mxu1 }
  0x9c   : > { %3599 = vmatmul.msk.bf16.vlgmr.msrb.gmra.mxu2 %vm513_vm0, %v3715_v24  ;;  %v4351_v62 = vsub.f32 %v660_v47, %v4345_v60 }
  0x9e   : > { %v965_v0 = vmax.f32 %v4348_v61, %v4351_v62 }
  0x9f   : > { %v4285_v29 = vpop.f32.mrf.mxu2 }
  0xa1   : > { %v573_v49 = vpop.f32.mrf.mxu0 }
  0xa2   : > { %v4364_v6 = vsub.f32 %v573_v49, %v4343_v59 }
  0xa3   : > { %v662_v50 = vpop.f32.mrf.mxu1 }
  0xa4   : > { %v4367_v7 = vsub.f32 %v662_v50, %v4345_v60 }
  0xa6   : > { %v969_v8 = vmax.f32 %v4364_v6, %v4367_v7 }
  0xa7   : > { %v4287_v30 = vpop.f32.mrf.mxu2 }
  0xa9   : > { %v576_v52 = vpop.f32.mrf.mxu0 }
  0xaa   : > { %v4376_v12 = vsub.f32 %v576_v52, %v4343_v59 }
  0xab   : > { %v665_v53 = vpop.f32.mrf.mxu1 }
  0xac   : > { %3600 = vmatmul.msk.bf16.gmra.mxu2 %vm513_vm0, %v3716_v27  ;;  %v4379_v13 = vsub.f32 %v665_v53, %v4345_v60 }
  0xae   : > { %v973_v18 = vmax.f32 %v4376_v12, %v4379_v13 }
  0xaf   : > { %v4293_v32 = vpop.f32.mrf.mxu2 }
  0xb1   : > { %v578_v56 = vpop.f32.mrf.mxu0 }
  0xb2   : > { %v4390_v27 = vsub.f32 %v578_v56, %v4343_v59 }
  0xb3   : > { %v667_v58 = vpop.f32.mrf.mxu1 }
  0xb7   : > { %v4295_v33 = vpop.f32.mrf.mxu2 }
  0xb9   : > { %v581_v3 = vpop.f32.mrf.mxu0 }
  0xba   : > { %v4402_v46 = vsub.f32 %v581_v3, %v4343_v59 }
  0xbb   : > { %v670_v4 = vpop.f32.mrf.mxu1 }
  0xbc   : > { %3601 = vmatmul.msk.bf16.gmra.mxu2 %vm513_vm0, %v3717_v28  ;;  %v4393_v28 = vsub.f32 %v667_v58, %v4345_v60  ;;  %v4405_v47 = vsub.f32 %v670_v4, %v4345_v60 }
  0xbe   : > { %v981_v49 = vmax.f32 %v4402_v46, %v4405_v47 }
  0xbf   : > { %v4301_v35 = vpop.f32.mrf.mxu2 }
  0xc1   : > { %v583_v14 = vpop.f32.mrf.mxu0 }
  0xc2   : > { %v4416_v58 = vsub.f32 %v583_v14, %v4343_v59 }
  0xc7   : > { %v4303_v36 = vpop.f32.mrf.mxu2 }
  0xcc   : > { %3602 = vmatmul.msk.bf16.gmra.mxu2 %vm513_vm0, %v3718_v31  ;;  %v586_v31 = vpop.f32.mrf.mxu0 }
  0xcf   : > { %v4309_v38 = vpop.f32.mrf.mxu2 }
  0xd4   : > { %v588_v50 = vpop.f32.mrf.mxu0 }
  0xd7   : > { %v4311_v39 = vpop.f32.mrf.mxu2 }
  0xdc   : > { %3603 = vmatmul.msk.bf16.gmra.mxu2 %vm513_vm0, %v3719_v34  ;;  %v591_v4 = vpop.f32.mrf.mxu0 }
  0xdf   : > { %v4317_v41 = vpop.f32.mrf.mxu2 }
  0xe7   : > { %v4319_v42 = vpop.f32.mrf.mxu2 }
  0xec   : > { %3604 = vmatmul.msk.bf16.gmra.mxu2 %vm513_vm0, %v3720_v37 }
  0xef   : > { %v4325_v44 = vpop.f32.mrf.mxu2 }
  0xf7   : > { %v4327_v45 = vpop.f32.mrf.mxu2 }
  0xfc   : > { %3605 = vmatmul.msk.bf16.gmra.mxu2 %vm513_vm0, %v3721_v40 }
  0xff   : > { %v4330_v48 = vpop.f32.mrf.mxu2 }
 0x107   : > { %v4332_v51 = vpop.f32.mrf.mxu2 }
 0x108   : > { %6139 = vst [vmem:[#allocation4_spill] sm:$0xff] %v4332_v51 }
 0x10c   : > { %3606 = vmatmul.msk.bf16.gmra.mxu2 %vm513_vm0, %v3722_v43 }
 0x10f   : > { %v4336_v54 = vpop.f32.mrf.mxu2 }
 0x117   : > { %v4341_v57 = vpop.f32.mrf.mxu2 }
 0x118   : > { %6140 = vst [vmem:[#allocation5_spill] sm:$0xff] %v4341_v57  ;;  %v4146_v57 = vmov -inf  }
 0x119   : > { %296 = vst.msk [vmem:[#allocation2] sm:$0xff] %vm295_vm1, %v4146_v57 }
 0x11a   : > { %297 = vst.msk [vmem:[#allocation2 + $0x8] sm:$0xff] %vm295_vm1, %v4146_v57 }
 0x11b   : > { %298 = vst.msk [vmem:[#allocation2 + $0x10] sm:$0xff] %vm295_vm1, %v4146_v57 }
 0x11c   : > { %3607 = vmatmul.msk.bf16.gmra.mxu2 %vm513_vm0, %v4218_v15  ;;  %v672_v15 = vpop.f32.mrf.mxu1  ;;  %299 = vst.msk [vmem:[#allocation2 + $0x18] sm:$0xff] %vm295_vm1, %v4146_v57 }
 0x11d   : > { %300 = vst.msk [vmem:[#allocation2 + $0x20] sm:$0xff] %vm295_vm1, %v4146_v57 }
 0x11e   : > { %301 = vst.msk [vmem:[#allocation2 + $0x28] sm:$0xff] %vm295_vm1, %v4146_v57 }
 0x11f   : > { %v749_v1 = vpop.f32.mrf.mxu2  ;;  %302 = vst.msk [vmem:[#allocation2 + $0x30] sm:$0xff] %vm295_vm1, %v4146_v57 }
 0x120   : > { %v4360_v2 = vsub.f32 %v749_v1, %v4353_v63  ;;  %303 = vst.msk [vmem:[#allocation2 + $0x38] sm:$0xff] %vm295_vm1, %v4146_v57 }
 0x121   : > { %304 = vst.msk [vmem:[#allocation2 + $0x40] sm:$0xff] %vm295_vm1, %v4146_v57 }
 0x122   : > { %v966_v5 = vmax.f32 %v965_v0, %v4360_v2  ;;  %v4419_v0 = vsub.f32 %v672_v15, %v4345_v60  ;;  %305 = vst.msk [vmem:[#allocation2 + $0x48] sm:$0xff] %vm295_vm1, %v4146_v57 }
 0x123   : > { %306 = vst.msk [vmem:[#allocation2 + $0x50] sm:$0xff] %vm295_vm1, %v4146_v57 }
 0x124   : > { %967 = vmax.xlane.f32.xlu0 %v966_v5  ;;  %v675_v34 = vpop.f32.mrf.mxu1  ;;  %307 = vst.msk [vmem:[#allocation2 + $0x58] sm:$0xff] %vm295_vm1, %v4146_v57 }
 0x125   : > { %308 = vst.msk [vmem:[#allocation2 + $0x60] sm:$0xff] %vm295_vm1, %v4146_v57 }
 0x126   : > { %309 = vst.msk [vmem:[#allocation2 + $0x68] sm:$0xff] %vm295_vm1, %v4146_v57 }
 0x127   : > { %v751_v9 = vpop.f32.mrf.mxu2  ;;  %310 = vst.msk [vmem:[#allocation2 + $0x70] sm:$0xff] %vm295_vm1, %v4146_v57 }
 0x128   : > { %v4372_v10 = vsub.f32 %v751_v9, %v4353_v63  ;;  %v4428_v9 = vsub.f32 %v586_v31, %v4343_v59  ;;  %311 = vst.msk [vmem:[#allocation2 + $0x78] sm:$0xff] %vm295_vm1, %v4146_v57 }
 0x129   : > { %312 = vst.msk [vmem:[#allocation2 + $0x80] sm:$0xff] %vm295_vm1, %v4146_v57 }
 0x12a   : > { %v970_v11 = vmax.f32 %v969_v8, %v4372_v10  ;;  %313 = vst.msk [vmem:[#allocation2 + $0x88] sm:$0xff] %vm295_vm1, %v4146_v57 }
 0x12b   : > { %314 = vst.msk [vmem:[#allocation2 + $0x90] sm:$0xff] %vm295_vm1, %v4146_v57 }
 0x12c   : > { %3608 = vmatmul.msk.bf16.gmra.mxu2 %vm513_vm0, %v4225_v16  ;;  %971 = vmax.xlane.f32.xlu0 %v970_v11  ;;  %v977_v16 = vmax.f32 %v4390_v27, %v4393_v28  ;;  %v677_v53 = vpop.f32.mrf.mxu1  ;;  %v4431_v11 = vsub.f32 %v675_v34, %v4345_v60  ;;  %v593_v34 = vpop.f32.mrf.mxu0  ;;  %315 = vst.msk [vmem:[#allocation2 + $0x98] sm:$0xff] %vm295_vm1, %v4146_v57 }
 0x12d   : > { %v4445_v31 = vsub.f32 %v677_v53, %v4345_v60  ;;  %316 = vst.msk [vmem:[#allocation2 + $0xa0] sm:$0xff] %vm295_vm1, %v4146_v57 }
 0x12e   : > { %v989_v14 = vmax.f32 %v4428_v9, %v4431_v11  ;;  %317 = vst.msk [vmem:[#allocation2 + $0xa8] sm:$0xff] %vm295_vm1, %v4146_v57 }
 0x12f   : > { %v754_v19 = vpop.f32.mrf.mxu2  ;;  %318 = vst.msk [vmem:[#allocation2 + $0xb0] sm:$0xff] %vm295_vm1, %v4146_v57 }
 0x130   : > { %v4386_v20 = vsub.f32 %v754_v19, %v4353_v63  ;;  %319 = vst.msk [vmem:[#allocation2 + $0xb8] sm:$0xff] %vm295_vm1, %v4146_v57 }
 0x131   : > { %320 = vst.msk [vmem:[#allocation2 + $0xc0] sm:$0xff] %vm295_vm1, %v4146_v57 }
 0x132   : > { %v974_v24 = vmax.f32 %v973_v18, %v4386_v20  ;;  %321 = vst.msk [vmem:[#allocation2 + $0xc8] sm:$0xff] %vm295_vm1, %v4146_v57 }
 0x133   : > { %322 = vst.msk [vmem:[#allocation2 + $0xd0] sm:$0xff] %vm295_vm1, %v4146_v57 }
 0x134   : > { %975 = vmax.xlane.f32.xlu1 %v974_v24  ;;  %v680_v5 = vpop.f32.mrf.mxu1  ;;  %v4442_v24 = vsub.f32 %v588_v50, %v4343_v59  ;;  %v596_v53 = vpop.f32.mrf.mxu0  ;;  %323 = vst.msk [vmem:[#allocation2 + $0xd8] sm:$0xff] %vm295_vm1, %v4146_v57 }
 0x135   : > { %v4457_v50 = vsub.f32 %v680_v5, %v4345_v60  ;;  %324 = vst.msk [vmem:[#allocation2 + $0xe0] sm:$0xff] %vm295_vm1, %v4146_v57 }
 0x136   : > { %325 = vst.msk [vmem:[#allocation2 + $0xe8] sm:$0xff] %vm295_vm1, %v4146_v57 }
 0x137   : > { %v756_v37 = vpop.f32.mrf.mxu2  ;;  %6142 = vst [vmem:[#allocation7_spill] sm:$0xff] %v4457_v50 }
 0x138   : > { %v4398_v40 = vsub.f32 %v756_v37, %v4353_v63  ;;  %326 = vst.msk [vmem:[#allocation2 + $0xf0] sm:$0xff] %vm295_vm1, %v4146_v57 }
 0x139   : > { %327 = vst.msk [vmem:[#allocation2 + $0xf8] sm:$0xff] %vm295_vm1, %v4146_v57 }
 0x13a   : > { %v978_v43 = vmax.f32 %v977_v16, %v4398_v40 }
 0x13c   : > { %3609 = vmatmul.msk.bf16.gmra.mxu2 %vm513_vm0, %v4232_v17  ;;  %979 = vmax.xlane.f32.xlu1 %v978_v43  ;;  %v985_v17 = vmax.f32 %v4416_v58, %v4419_v0  ;;  %v682_v16 = vpop.f32.mrf.mxu1 }
 0x13d   : > { %v4471_v5 = vsub.f32 %v682_v16, %v4345_v60 }
 0x13f   : > { %v759_v52 = vpop.f32.mrf.mxu2  ;;  %6145 = vst [vmem:[#allocation10_spill] sm:$0xff] %v4471_v5 }
 0x140   : > { %v4412_v55 = vsub.f32 %v759_v52, %v4353_v63  ;;  %v4454_v52 = vsub.f32 %v591_v4, %v4343_v59  ;;  %v4468_v4 = vsub.f32 %v593_v34, %v4343_v59 }
 0x142   : > { %v982_v56 = vmax.f32 %v981_v49, %v4412_v55  ;;  %6141 = vst [vmem:[#allocation6_spill] sm:$0xff] %v4454_v52 }
 0x143   : > { %6144 = vst [vmem:[#allocation9_spill] sm:$0xff] %v4468_v4 }
 0x144   : > { %983 = vmax.xlane.f32.xlu2 %v982_v56  ;;  %v685_v56 = vpop.f32.mrf.mxu1 }
 0x145   : > { %v4483_v34 = vsub.f32 %v685_v56, %v4345_v60 }
 0x147   : > { %v761_v1 = vpop.f32.mrf.mxu2  ;;  %6148 = vst [vmem:[#allocation13_spill] sm:$0xff] %v4483_v34 }
 0x148   : > { %v4424_v3 = vsub.f32 %v761_v1, %v4353_v63 }
 0x14a   : > { %v986_v8 = vmax.f32 %v985_v17, %v4424_v3  ;;  %v997_v17 = vmax.f32 %v4454_v52, %v4457_v50 }
 0x14c   : > { %3610 = vmatmul.msk.bf16.gmra.mxu2 %vm513_vm0, %v4241_v21  ;;  %987 = vmax.xlane.f32.xlu2 %v986_v8  ;;  %v993_v21 = vmax.f32 %v4442_v24, %v4445_v31 }
 0x14f   : > { %v764_v15 = vpop.f32.mrf.mxu2 }
 0x150   : > { %v4438_v18 = vsub.f32 %v764_v15, %v4353_v63  ;;  %v598_v15 = vpop.f32.mrf.mxu0 }
 0x151   : > { %v4496_v56 = vsub.f32 %v598_v15, %v4343_v59 }
 0x152   : > { %v990_v19 = vmax.f32 %v989_v14, %v4438_v18 }
 0x153   : > { %6150 = vst [vmem:[#allocation15_spill] sm:$0xff] %v4496_v56 }
 0x154   : > { %991 = vmax.xlane.f32.xlu0 %v990_v19 }
 0x157   : > { %v766_v37 = vpop.f32.mrf.mxu2 }
 0x158   : > { %v4450_v43 = vsub.f32 %v766_v37, %v4353_v63 }
 0x15a   : > { %v994_v49 = vmax.f32 %v993_v21, %v4450_v43  ;;  %v687_v21 = vpop.f32.mrf.mxu1 }
 0x15c   : > { %3611 = vmatmul.msk.bf16.gmra.mxu2 %vm513_vm0, %v4248_v22  ;;  %995 = vmax.xlane.f32.xlu1 %v994_v49  ;;  %v1001_v22 = vmax.f32 %v4468_v4, %v4471_v5 }
 0x15f   : > { %v769_v1 = vpop.f32.mrf.mxu2 }
 0x160   : > { %v4464_v8 = vsub.f32 %v769_v1, %v4353_v63 }
 0x162   : > { %6143 = vst [vmem:[#allocation8_spill] sm:$0xff] %v4464_v8  ;;  %v998_v14 = vmax.f32 %v997_v17, %v4464_v8  ;;  %v4480_v17 = vsub.f32 %v596_v53, %v4343_v59 }
 0x164   : > { %999 = vmax.xlane.f32.xlu2 %v998_v14  ;;  %6147 = vst [vmem:[#allocation12_spill] sm:$0xff] %v4480_v17  ;;  %v1005_v16 = vmax.f32 %v4480_v17, %v4483_v34 }
 0x167   : > { %v771_v19 = vpop.f32.mrf.mxu2 }
 0x168   : > { %v4476_v37 = vsub.f32 %v771_v19, %v4353_v63  ;;  %v601_v19 = vpop.f32.mrf.mxu0 }
 0x16a   : > { %6146 = vst [vmem:[#allocation11_spill] sm:$0xff] %v4476_v37  ;;  %v1002_v49 = vmax.f32 %v1001_v22, %v4476_v37  ;;  %v690_v22 = vpop.f32.mrf.mxu1 }
 0x16c   : > { %3612 = vmatmul.msk.bf16.gmra.mxu2 %vm513_vm0, %v4255_v23  ;;  %1003 = vmax.xlane.f32.xlu0 %v1002_v49  ;;  %v4499_v23 = vsub.f32 %v687_v21, %v4345_v60 }
 0x16e   : > { %6151 = vst [vmem:[#allocation16_spill] sm:$0xff] %v4499_v23  ;;  %v1009_v15 = vmax.f32 %v4496_v56, %v4499_v23 }
 0x16f   : > { %v774_v1 = vpop.f32.mrf.mxu2 }
 0x170   : > { %v4490_v14 = vsub.f32 %v774_v1, %v4353_v63  ;;  %v4524_v1 = vsub.f32 %v601_v19, %v4343_v59  ;;  %v603_v23 = vpop.f32.mrf.mxu0 }
 0x172   : > { %6149 = vst [vmem:[#allocation14_spill] sm:$0xff] %v4490_v14  ;;  %v1006_v53 = vmax.f32 %v1005_v16, %v4490_v14 }
 0x173   : > { %6153 = vst [vmem:[#allocation18_spill] sm:$0xff] %v4524_v1 }
 0x174   : > { %1007 = vmax.xlane.f32.xlu1 %v1006_v53  ;;  %v4527_v53 = vsub.f32 %v690_v22, %v4345_v60 }
 0x176   : > { %6154 = vst [vmem:[#allocation19_spill] sm:$0xff] %v4527_v53  ;;  %v1013_v19 = vmax.f32 %v4524_v1, %v4527_v53 }
 0x177   : > { %v776_v21 = vpop.f32.mrf.mxu2 }
 0x178   : > { %v4516_v49 = vsub.f32 %v776_v21, %v4353_v63  ;;  %v692_v21 = vpop.f32.mrf.mxu1 }
 0x179   : > { %v4557_v53 = vsub.f32 %v692_v21, %v4345_v60 }
 0x17a   : > { %6152 = vst [vmem:[#allocation17_spill] sm:$0xff] %v4516_v49  ;;  %v1010_v16 = vmax.f32 %v1009_v15, %v4516_v49 }
 0x17b   : > { %6157 = vst [vmem:[#allocation22_spill] sm:$0xff] %v4557_v53 }
 0x17c   : > { %3613 = vmatmul.msk.bf16.gmra.mxu2 %vm513_vm0, %v4265_v25  ;;  %1011 = vmax.xlane.f32.xlu2 %v1010_v16  ;;  %v4554_v16 = vsub.f32 %v603_v23, %v4343_v59 }
 0x17e   : > { %6156 = vst [vmem:[#allocation21_spill] sm:$0xff] %v4554_v16  ;;  %v1017_v23 = vmax.f32 %v4554_v16, %v4557_v53 }
 0x17f   : > { %v779_v22 = vpop.f32.mrf.mxu2 }
 0x180   : > { %v4546_v15 = vsub.f32 %v779_v22, %v4353_v63  ;;  %v606_v22 = vpop.f32.mrf.mxu0  ;;  %v695_v1 = vpop.f32.mrf.mxu1 }
 0x181   : > { %v4585_v53 = vsub.f32 %v695_v1, %v4345_v60 }
 0x182   : > { %6155 = vst [vmem:[#allocation20_spill] sm:$0xff] %v4546_v15  ;;  %v1014_v25 = vmax.f32 %v1013_v19, %v4546_v15  ;;  %v4582_v15 = vsub.f32 %v606_v22, %v4343_v59  ;;  %v4147_v22 = vmov 0  }
 0x183   : > { %6160 = vst [vmem:[#allocation25_spill] sm:$0xff] %v4585_v53  ;;  %3796 = vset.pattern.permute.xlu2 %v4147_v22  ;;  %3797 = vset.pattern.permute.xlu0 %v4147_v22 }
 0x184   : > { %1015 = vmax.xlane.f32.xlu0 %v1014_v25  ;;  %6159 = vst [vmem:[#allocation24_spill] sm:$0xff] %v4582_v15  ;;  %v1021_v1 = vmax.f32 %v4582_v15, %v4585_v53  ;;  %3798 = vset.pattern.permute.xlu1 %v4147_v22  ;;  %v4615_v22 = vld [vmem:[#allocation2] sm:$0xff] }
 0x185   : > { %6164 = vst [vmem:[#allocation29_spill] sm:$0xff] %v4615_v22 }
 0x187   : > { %v781_v21 = vpop.f32.mrf.mxu2 }
 0x188   : > { %v4574_v19 = vsub.f32 %v781_v21, %v4353_v63 }
 0x18a   : > { %6158 = vst [vmem:[#allocation23_spill] sm:$0xff] %v4574_v19  ;;  %v1018_v25 = vmax.f32 %v1017_v23, %v4574_v19  ;;  %v608_v23 = vpop.f32.mrf.mxu0 }
 0x18b   : > { %v4610_v53 = vsub.f32 %v608_v23, %v4343_v59 }
 0x18c   : > { %3614 = vmatmul.msk.bf16.gmra.mxu2 %vm513_vm0, %v4272_v26  ;;  %1019 = vmax.xlane.f32.xlu1 %v1018_v25  ;;  %v697_v26 = vpop.f32.mrf.mxu1 }
 0x18d   : > { %6162 = vst [vmem:[#allocation27_spill] sm:$0xff] %v4610_v53  ;;  %v4613_v15 = vsub.f32 %v697_v26, %v4345_v60  ;;  %v4632_v26 = vsub.f32 %v4285_v29, %v4343_v59 }
 0x18f   : > { %v784_v21 = vpop.f32.mrf.mxu2  ;;  %6163 = vst [vmem:[#allocation28_spill] sm:$0xff] %v4613_v15  ;;  %v1025_v16 = vmax.f32 %v4610_v53, %v4613_v15 }
 0x190   : > { %v4604_v25 = vsub.f32 %v784_v21, %v4353_v63  ;;  %6167 = vst [vmem:[#allocation32_spill] sm:$0xff] %v4632_v26 }
 0x192   : > { %6161 = vst [vmem:[#allocation26_spill] sm:$0xff] %v4604_v25  ;;  %v1022_v19 = vmax.f32 %v1021_v1, %v4604_v25  ;;  %v700_v1 = vpop.f32.mrf.mxu3 }
 0x193   : > { %v4635_v15 = vsub.f32 %v700_v1, %v4345_v60 }
 0x194   : > { %1023 = vmax.xlane.f32.xlu2 %v1022_v19 }
 0x195   : > { %6168 = vst [vmem:[#allocation33_spill] sm:$0xff] %v4635_v15  ;;  %v1029_v23 = vmax.f32 %v4632_v26, %v4635_v15 }
 0x197   : > { %v786_v49 = vpop.f32.mrf.mxu2  ;;  %v968_v21 = vpop.xlane.xlu0 %967 }
 0x198   : > { %v4620_v14 = vsub.f32 %v786_v49, %v4353_v63  ;;  %v4623_v57 = vmax.f32 %v4615_v22, %v968_v21  ;;  %v4637_v49 = vld [vmem:[#allocation2 + $0x8] sm:$0xff] }
 0x199   : > { %6169 = vst [vmem:[#allocation34_spill] sm:$0xff] %v4637_v49 }
 0x19a   : > { %6165 = vst [vmem:[#allocation30_spill] sm:$0xff] %v4620_v14  ;;  %v1026_v19 = vmax.f32 %v1025_v16, %v4620_v14  ;;  %v702_v29 = vpop.f32.mrf.mxu3 }
 0x19b   : > { %6166 = vst [vmem:[#allocation31_spill] sm:$0xff] %v4623_v57 }
 0x19c   : > { %2608 = vst.msk [vmem:[#allocation2] sm:$0xff] %vm295_vm1, %v4623_v57  ;;  %1027 = vmax.xlane.f32.xlu0 %v1026_v19  ;;  %v4652_v19 = vld [vmem:[#allocation2 + $0x10] sm:$0xff] }
 0x19d   : > { %6172 = vst [vmem:[#allocation37_spill] sm:$0xff] %v4652_v19 }
 0x19f   : > { %v789_v21 = vpop.f32.mrf.mxu2  ;;  %v972_v53 = vpop.xlane.xlu0 %971 }
 0x1a0   : > { %v4642_v25 = vsub.f32 %v789_v21, %v4353_v63  ;;  %v4645_v16 = vmax.f32 %v4637_v49, %v972_v53  ;;  %v4662_v53 = vld [vmem:[#allocation2 + $0x18] sm:$0xff]  ;;  %v4672_v21 = vld [vmem:[#allocation2 + $0x20] sm:$0xff] }
 0x1a1   : > { %6174 = vst [vmem:[#allocation39_spill] sm:$0xff] %v4662_v53 }
 0x1a2   : > { %6170 = vst [vmem:[#allocation35_spill] sm:$0xff] %v4642_v25  ;;  %v1030_v1 = vmax.f32 %v1029_v23, %v4642_v25 }
 0x1a3   : > { %6171 = vst [vmem:[#allocation36_spill] sm:$0xff] %v4645_v16 }
 0x1a4   : > { %2609 = vst.msk [vmem:[#allocation2 + $0x8] sm:$0xff] %vm295_vm1, %v4645_v16  ;;  %1031 = vmax.xlane.f32.xlu1 %v1030_v1 }
 0x1a5   : > { %6176 = vst [vmem:[#allocation41_spill] sm:$0xff] %v4672_v21 }
 0x1a7   : > { %v976_v14 = vpop.xlane.xlu1 %975  ;;  %v791_v1 = vpop.f32.mrf.mxu2 }
 0x1a8   : > { %v4655_v15 = vmax.f32 %v4652_v19, %v976_v14  ;;  %v4682_v14 = vld [vmem:[#allocation2 + $0x28] sm:$0xff]  ;;  %v4710_v17 = vsub.f32 %v791_v1, %v4353_v63 }
 0x1a9   : > { %6178 = vst [vmem:[#allocation43_spill] sm:$0xff] %v4682_v14 }
 0x1aa   : > { %6173 = vst [vmem:[#allocation38_spill] sm:$0xff] %v4655_v15 }
 0x1ab   : > { %2610 = vst.msk [vmem:[#allocation2 + $0x10] sm:$0xff] %vm295_vm1, %v4655_v15 }
 0x1ac   : > { %1223 = vperm.xlu2 %3796, %v4623_v57   ;;  %v705_v57 = vpop.f32.mrf.mxu3  ;;  %6184 = vst [vmem:[#allocation49_spill] sm:$0xff] %v4710_v17 }
 0x1ad   : > { %v4724_v5 = vsub.f32 %v705_v57, %v4345_v60 }
 0x1af   : > { %v980_v26 = vpop.xlane.xlu1 %979  ;;  %v794_v22 = vpop.f32.mrf.mxu2  ;;  %6187 = vst [vmem:[#allocation52_spill] sm:$0xff] %v4724_v5 }
 0x1b0   : > { %v4665_v23 = vmax.f32 %v4662_v53, %v980_v26  ;;  %1228 = vperm.xlu0 %3797, %v4645_v16  }
 0x1b2   : > { %6175 = vst [vmem:[#allocation40_spill] sm:$0xff] %v4665_v23 }
 0x1b3   : > { %2611 = vst.msk [vmem:[#allocation2 + $0x18] sm:$0xff] %vm295_vm1, %v4665_v23 }
 0x1b4   : > { %v707_v49 = vpop.f32.mrf.mxu3 }
 0x1b7   : > { %v984_v19 = vpop.xlane.xlu2 %983  ;;  %v796_v26 = vpop.f32.mrf.mxu2 }
 0x1b8   : > { %v4675_v25 = vmax.f32 %v4672_v21, %v984_v19  ;;  %v4691_v21 = vld [vmem:[#allocation2 + $0x30] sm:$0xff]  ;;  %v4703_v19 = vsub.f32 %v702_v29, %v4345_v60  ;;  %v4721_v29 = vsub.f32 %v4293_v32, %v4343_v59 }
 0x1b9   : > { %6180 = vst [vmem:[#allocation45_spill] sm:$0xff] %v4691_v21 }
 0x1ba   : > { %6177 = vst [vmem:[#allocation42_spill] sm:$0xff] %v4675_v25  ;;  %v1037_v32 = vmax.f32 %v4721_v29, %v4724_v5  ;;  %v4756_v5 = vld [vmem:[#allocation2 + $0x48] sm:$0xff] }
 0x1bb   : > { %2612 = vst.msk [vmem:[#allocation2 + $0x20] sm:$0xff] %vm295_vm1, %v4675_v25 }
 0x1bc   : > { %6182 = vst [vmem:[#allocation47_spill] sm:$0xff] %v4703_v19 }
 0x1bd   : > { %1233 = vperm.xlu1 %3798, %v4655_v15   ;;  %v4707_v15 = vld [vmem:[#allocation2 + $0x38] sm:$0xff]  ;;  %6186 = vst [vmem:[#allocation51_spill] sm:$0xff] %v4721_v29  ;;  %v3759_v29 = vld [vmem:[%s4796_s8 + $0xb0] sm:$0xff] }
 0x1be   : > { %6183 = vst [vmem:[#allocation48_spill] sm:$0xff] %v4707_v15 }
 0x1bf   : > { %v988_v53 = vpop.xlane.xlu2 %987  ;;  %v4712_v37 = vpop.f32.mrf.mxu2  ;;  %6194 = vst [vmem:[#allocation59_spill] sm:$0xff] %v4756_v5 }
 0x1c0   : > { %v4685_v16 = vmax.f32 %v4682_v14, %v988_v53  ;;  %v4700_v53 = vsub.f32 %v4287_v30, %v4343_v59  ;;  %v4705_v14 = vpop.f32.mrf.mxu3 }
 0x1c2   : > { %6179 = vst [vmem:[#allocation44_spill] sm:$0xff] %v4685_v16  ;;  %v1033_v30 = vmax.f32 %v4700_v53, %v4703_v19  ;;  %v4734_v19 = vld [vmem:[#allocation2 + $0x40] sm:$0xff] }
 0x1c3   : > { %2613 = vst.msk [vmem:[#allocation2 + $0x28] sm:$0xff] %vm295_vm1, %v4685_v16 }
 0x1c4   : > { %6181 = vst [vmem:[#allocation46_spill] sm:$0xff] %v4700_v53  ;;  %v1034_v4 = vmax.f32 %v1033_v30, %v4710_v17  ;;  %v4744_v30 = vsub.f32 %v4303_v36, %v4343_v59  ;;  %v4762_v36 = vsub.f32 %v4295_v33, %v4343_v59  ;;  %v3756_v17 = vld [vmem:[%s4796_s8 + $0x98] sm:$0xff] }
 0x1c5   : > { %6189 = vst [vmem:[#allocation54_spill] sm:$0xff] %v4734_v19 }
 0x1c6   : > { %6191 = vst [vmem:[#allocation56_spill] sm:$0xff] %v4744_v30 }
 0x1c7   : > { %v992_v56 = vpop.xlane.xlu0 %991  ;;  %6195 = vst [vmem:[#allocation60_spill] sm:$0xff] %v4762_v36 }
 0x1c8   : > { %v4694_v34 = vmax.f32 %v4691_v21, %v992_v56  ;;  %v712_v53 = vpop.f32.mrf.mxu3 }
 0x1ca   : > { %2614 = vst.msk [vmem:[#allocation2 + $0x30] sm:$0xff] %vm295_vm1, %v4694_v34 }
 0x1cf   : > { %v996_v56 = vpop.xlane.xlu1 %995 }
 0x1d0   : > { %v4715_v21 = vmax.f32 %v4707_v15, %v996_v56  ;;  %v4732_v56 = vsub.f32 %v794_v22, %v4353_v63  ;;  %v801_v15 = vpop.f32.mrf.mxu2  ;;  %v4747_v22 = vsub.f32 %v712_v53, %v4345_v60  ;;  %v4765_v53 = vsub.f32 %v707_v49, %v4345_v60 }
 0x1d2   : > { %6185 = vst [vmem:[#allocation50_spill] sm:$0xff] %v4715_v21  ;;  %v1038_v1 = vmax.f32 %v1037_v32, %v4732_v56  ;;  %v1049_v32 = vmax.f32 %v4744_v30, %v4747_v22  ;;  %v1041_v33 = vmax.f32 %v4762_v36, %v4765_v53  ;;  %v3751_v36 = vld [vmem:[%s4796_s8 + $0x70] sm:$0xff] }
 0x1d3   : > { %2615 = vst.msk [vmem:[#allocation2 + $0x38] sm:$0xff] %vm295_vm1, %v4715_v21 }
 0x1d4   : > { %6188 = vst [vmem:[#allocation53_spill] sm:$0xff] %v4732_v56 }
 0x1d5   : > { %1035 = vmax.xlane.f32.xlu2 %v1034_v4  ;;  %6192 = vst [vmem:[#allocation57_spill] sm:$0xff] %v4747_v22  ;;  %v4778_v22 = vld [vmem:[#allocation2 + $0x50] sm:$0xff] }
 0x1d6   : > { %6196 = vst [vmem:[#allocation61_spill] sm:$0xff] %v4765_v53  ;;  %v3743_v53 = vld [vmem:[%s4796_s8 + $0x30] sm:$0xff] }
 0x1d7   : > { %v1000_v57 = vpop.xlane.xlu2 %999  ;;  %6198 = vst [vmem:[#allocation63_spill] sm:$0xff] %v4778_v22 }
 0x1d8   : > { %v4739_v8 = vmax.f32 %v4734_v19, %v1000_v57  ;;  %v4754_v57 = vsub.f32 %v801_v15, %v4353_v63  ;;  %v4827_v19 = vpop.f32.mrf.mxu3 }
 0x1da   : > { %6190 = vst [vmem:[#allocation55_spill] sm:$0xff] %v4739_v8  ;;  %1039 = vmax.xlane.f32.xlu0 %v1038_v1  ;;  %v1050_v15 = vmax.f32 %v1049_v32, %v4754_v57  ;;  %v4772_v1 = vsub.f32 %v796_v26, %v4353_v63  ;;  %v4788_v26 = vld [vmem:[#allocation2 + $0x58] sm:$0xff] }
 0x1db   : > { %2616 = vst.msk [vmem:[#allocation2 + $0x40] sm:$0xff] %vm295_vm1, %v4739_v8 }
 0x1dc   : > { %6193 = vst [vmem:[#allocation58_spill] sm:$0xff] %v4754_v57  ;;  %v1042_v49 = vmax.f32 %v1041_v33, %v4772_v1  ;;  %v3752_v33 = vld [vmem:[%s4796_s8 + $0x78] sm:$0xff] }
 0x1dd   : > { %6197 = vst [vmem:[#allocation62_spill] sm:$0xff] %v4772_v1  ;;  %2366 = vmatpush.bf16.msrb.mxu0 %v3752_v33  ;;  %v4818_v33 = vld [vmem:[#allocation2 + $0x68] sm:$0xff] }
 0x1de   : > { %6199 = vst [vmem:[#allocation64_spill] sm:$0xff] %v4788_v26 }
 0x1df   : > { %v1004_v4 = vpop.xlane.xlu0 %1003  ;;  %6201 = vst [vmem:[#allocation66_spill] sm:$0xff] %v4818_v33 }
 0x1e0   : > { %v4768_v56 = vmax.f32 %v4756_v5, %v1004_v4  ;;  %v4851_v5 = vld [vmem:[#allocation2 + $0x78] sm:$0xff] }
 0x1e1   : > { %2367 = vmatpush.bf16.msrb.mxu0 %v3751_v36  ;;  %v3749_v36 = vld [vmem:[%s4796_s8 + $0x60] sm:$0xff]  ;;  %6203 = vst [vmem:[#allocation68_spill] sm:$0xff] %v4851_v5 }
 0x1e2   : > { %2617 = vst.msk [vmem:[#allocation2 + $0x48] sm:$0xff] %vm295_vm1, %v4768_v56  ;;  %1051 = vmax.xlane.f32.xlu0 %v1050_v15 }
 0x1e7   : > { %v1008_v30 = vpop.xlane.xlu1 %1007  ;;  %1043 = vmax.xlane.f32.xlu1 %v1042_v49  ;;  %v3760_v49 = vld [vmem:[%s4796_s8 + $0xb8] sm:$0xff] }
 0x1e8   : > { %v4782_v4 = vmax.f32 %v4778_v22, %v1008_v30  ;;  %v3744_v30 = vld [vmem:[%s4796_s8 + $0x38] sm:$0xff]  ;;  %2455 = vmatpush.bf16.msrb.mxu1 %v3760_v49 }
 0x1e9   : > { %2277 = vmatpush.bf16.msrb.mxu3 %v3744_v30  ;;  %v3750_v30 = vld [vmem:[%s4796_s8 + $0x68] sm:$0xff] }
 0x1ea   : > { %2618 = vst.msk [vmem:[#allocation2 + $0x50] sm:$0xff] %vm295_vm1, %v4782_v4  ;;  %2368 = vmatpush.bf16.msrb.mxu0 %v3750_v30 }
 0x1ec   : > { %2456 = vmatpush.bf16.msrb.mxu1 %v3759_v29  ;;  %v3757_v29 = vld [vmem:[%s4796_s8 + $0xa0] sm:$0xff] }
 0x1ed   : > { %1238 = vperm.xlu2 %3796, %v4665_v23   ;;  %2278 = vmatpush.bf16.msrb.mxu3 %v3743_v53  ;;  %v3741_v53 = vld [vmem:[%s4796_s8 + $0x20] sm:$0xff] }
 0x1ee   : > { %2369 = vmatpush.bf16.msrb.mxu0 %v3749_v36  ;;  %v3739_v36 = vld [vmem:[%s4796_s8 + $0x10] sm:$0xff] }
 0x1ef   : > { %v1012_v32 = vpop.xlane.xlu2 %1011 }
 0x1f0   : > { %v4791_v15 = vmax.f32 %v4788_v26, %v1012_v32  ;;  %v4804_v32 = vld [vmem:[#allocation2 + $0x60] sm:$0xff]  ;;  %v3742_v26 = vld [vmem:[%s4796_s8 + $0x28] sm:$0xff] }
 0x1f1   : > { %6200 = vst [vmem:[#allocation65_spill] sm:$0xff] %v4804_v32  ;;  %2279 = vmatpush.bf16.msrb.mxu3 %v3742_v26  ;;  %v4831_v26 = vpop.f32.mrf.mxu2 }
 0x1f2   : > { %2619 = vst.msk [vmem:[#allocation2 + $0x58] sm:$0xff] %vm295_vm1, %v4791_v15 }
 0x1f5   : > { %1243 = vperm.xlu2 %3796, %v4675_v25   ;;  %2280 = vmatpush.bf16.msrb.mxu3 %v3741_v53  ;;  %v4844_v53 = vpop.f32.mrf.mxu3  ;;  %v3753_v25 = vld [vmem:[%s4796_s8 + $0x80] sm:$0xff] }
 0x1f6   : > { %1263 = vperm.xlu0 %3797, %v4739_v8   ;;  %v3758_v8 = vld [vmem:[%s4796_s8 + $0xa8] sm:$0xff] }
 0x1f7   : > { %v1016_v57 = vpop.xlane.xlu0 %1015  ;;  %2457 = vmatpush.bf16.msrb.mxu1 %v3758_v8  ;;  %v4833_v8 = vld [vmem:[#allocation2 + $0x70] sm:$0xff] }
 0x1f8   : > { %v4808_v1 = vmax.f32 %v4804_v32, %v1016_v57  ;;  %6202 = vst [vmem:[#allocation67_spill] sm:$0xff] %v4833_v8  ;;  %v3748_v32 = vld [vmem:[%s4796_s8 + $0x58] sm:$0xff] }
 0x1f9   : > { %2370 = vmatpush.bf16.msrb.mxu0 %v3748_v32  ;;  %v3754_v32 = vld [vmem:[%s4796_s8 + $0x88] sm:$0xff] }
 0x1fa   : > { %2620 = vst.msk [vmem:[#allocation2 + $0x60] sm:$0xff] %vm295_vm1, %v4808_v1 }
 0x1fb   : > { %2458 = vmatpush.bf16.msrb.mxu1 %v3757_v29  ;;  %v3747_v29 = vld [vmem:[%s4796_s8 + $0x50] sm:$0xff] }
 0x1fd   : > { %2371 = vmatpush.bf16.msrb.mxu0 %v3747_v29  ;;  %v720_v50 = vpop.f32.mrf.mxu3  ;;  %v4868_v29 = vsub.f32 %v4301_v35, %v4343_v59  ;;  %v4883_v35 = vsub.f32 %v4712_v37, %v4353_v63 }
 0x1ff   : > { %v1020_v57 = vpop.xlane.xlu1 %1019  ;;  %2459 = vmatpush.bf16.msrb.mxu1 %v3756_v17  ;;  %v3737_v17 = vld [vmem:[%s4796_s8] sm:$0xff]  ;;  %6206 = vst [vmem:[#allocation71_spill] sm:$0xff] %v4868_v29 }
 0x200   : > { %v4821_v49 = vmax.f32 %v4818_v33, %v1020_v57  ;;  %1248 = vperm.xlu1 %3798, %v4685_v16   ;;  %v3740_v16 = vld [vmem:[%s4796_s8 + $0x18] sm:$0xff]  ;;  %v3738_v33 = vld [vmem:[%s4796_s8 + $0x8] sm:$0xff]  ;;  %6210 = vst [vmem:[#allocation75_spill] sm:$0xff] %v4883_v35 }
 0x201   : > { %2281 = vmatpush.bf16.msrb.mxu3 %v3740_v16  ;;  %v3746_v16 = vld [vmem:[%s4796_s8 + $0x48] sm:$0xff] }
 0x202   : > { %2621 = vst.msk [vmem:[#allocation2 + $0x68] sm:$0xff] %vm295_vm1, %v4821_v49  ;;  %2372 = vmatpush.bf16.msrb.mxu0 %v3746_v16  ;;  %v4876_v16 = vsub.f32 %v4317_v41, %v4343_v59 }
 0x204   : > { %6208 = vst [vmem:[#allocation73_spill] sm:$0xff] %v4876_v16 }
 0x205   : > { %2282 = vmatpush.bf16.msrb.mxu3 %v3739_v36  ;;  %v4864_v36 = vld [vmem:[#allocation2 + $0x80] sm:$0xff] }
 0x206   : > { %6205 = vst [vmem:[#allocation70_spill] sm:$0xff] %v4864_v36 }
 0x207   : > { %v1024_v30 = vpop.xlane.xlu2 %1023 }
 0x208   : > { %v4836_v57 = vmax.f32 %v4833_v8, %v1024_v30  ;;  %1258 = vperm.xlu1 %3798, %v4715_v21   ;;  %v3755_v30 = vld [vmem:[%s4796_s8 + $0x90] sm:$0xff]  ;;  %v4849_v8 = vpop.f32.mrf.mxu2  ;;  %v3745_v21 = vld [vmem:[%s4796_s8 + $0x40] sm:$0xff] }
 0x209   : > { %2460 = vmatpush.bf16.msrb.mxu1 %v3755_v30  ;;  %2283 = vmatpush.bf16.msrb.mxu3 %v3738_v33 }
 0x20a   : > { %2622 = vst.msk [vmem:[#allocation2 + $0x70] sm:$0xff] %vm295_vm1, %v4836_v57  ;;  %2373 = vmatpush.bf16.msrb.mxu0 %v3745_v21 }
 0x20d   : > { %2461 = vmatpush.bf16.msrb.mxu1 %v3754_v32  ;;  %2284 = vmatpush.bf16.msrb.mxu3 %v3737_v17  ;;  %v4879_v32 = vsub.f32 %v720_v50, %v4345_v60 }
 0x20f   : > { %v1028_v23 = vpop.xlane.xlu0 %1027  ;;  %6209 = vst [vmem:[#allocation74_spill] sm:$0xff] %v4879_v32  ;;  %v1061_v41 = vmax.f32 %v4876_v16, %v4879_v32 }
 0x210   : > { %v4857_v22 = vmax.f32 %v4851_v5, %v1028_v23  ;;  %v4872_v23 = vsub.f32 %v4705_v14, %v4345_v60  ;;  %v809_v33 = vpop.f32.mrf.mxu2 }
 0x211   : > { %2462 = vmatpush.bf16.msrb.mxu1 %v3753_v25  ;;  %v4891_v14 = vsub.f32 %v809_v33, %v4353_v63  ;;  %v1224_v25 = vpop.permute.xlu2 %1223 }
 0x212   : > { %6204 = vst [vmem:[#allocation69_spill] sm:$0xff] %v4857_v22  ;;  %v1045_v21 = vmax.f32 %v4868_v29, %v4872_v23  ;;  %v1381_v17 = vsub.f32 %v4348_v61, %v1224_v25  ;;  %v1383_v33 = vsub.f32 %v4360_v2, %v1224_v25  ;;  %v4907_v2 = vsub.f32 %v4309_v38, %v4343_v59 }
 0x213   : > { %2623 = vst.msk [vmem:[#allocation2 + $0x78] sm:$0xff] %vm295_vm1, %v4857_v22  ;;  %v1062_v37 = vmax.f32 %v1061_v41, %v4891_v14 }
 0x214   : > { %6207 = vst [vmem:[#allocation72_spill] sm:$0xff] %v4872_v23  ;;  %v1046_v50 = vmax.f32 %v1045_v21, %v4883_v35 }
 0x215   : > { %6211 = vst [vmem:[#allocation76_spill] sm:$0xff] %v4891_v14 }
 0x217   : > { %v1032_v30 = vpop.xlane.xlu1 %1031 }
 0x218   : > { %v4886_v5 = vmax.f32 %v4864_v36, %v1032_v30  ;;  %v1382_v30 = vsub.f32 %v4351_v62, %v1224_v25  ;;  %v4922_v25 = vpop.f32.mrf.mxu3 }
 0x21a   : > { %2624 = vst.msk [vmem:[#allocation2 + $0x80] sm:$0xff] %vm295_vm1, %v4886_v5 }
 0x21e   : > { %1047 = vmax.xlane.f32.xlu2 %v1046_v50 }
 0x220   : > { %1063 = vmax.xlane.f32.xlu0 %v1062_v37 }
 0x222   : > { %v1229_v23 = vpop.permute.xlu0 %1228 }
 0x223   : > { %v1384_v29 = vsub.f32 %v4364_v6, %v1229_v23  ;;  %v1385_v36 = vsub.f32 %v4367_v7, %v1229_v23  ;;  %v1386_v32 = vsub.f32 %v4372_v10, %v1229_v23  ;;  %v4911_v6 = vsub.f32 %v4827_v19, %v4345_v60 }
 0x225   : > { %v1477_v16 = vpack.c.bf16 %v1384_v29, %v1381_v17  ;;  %v1478_v21 = vpack.c.bf16 %v1385_v36, %v1382_v30  ;;  %v1479_v50 = vpack.c.bf16 %v1386_v32, %v1383_v33  ;;  %v4915_v36 = vsub.f32 %v4831_v26, %v4353_v63  ;;  %v4924_v17 = vpop.f32.mrf.mxu2  ;;  %v4926_v30 = vld [vmem:[#allocation2 + $0x88] sm:$0xff] }
 0x226   : > { %v1053_v23 = vmax.f32 %v4907_v2, %v4911_v6 }
 0x227   : > { %v1525_v35 = vunpack.c.l.bf16 %v1477_v16  ;;  %v1526_v41 = vunpack.c.l.bf16 %v1478_v21  ;;  %v1527_v14 = vunpack.c.l.bf16 %v1479_v50  ;;  %v1528_v37 = vunpack.c.h.bf16 %v1477_v16 }
 0x228   : > { %v1529_v22 = vunpack.c.h.bf16 %v1478_v21  ;;  %v1530_v61 = vunpack.c.h.bf16 %v1479_v50  ;;  %v1054_v38 = vmax.f32 %v1053_v23, %v4915_v36  ;;  %v4928_v21 = vpop.f32.mrf.mxu3 }
 0x229   : > { %v1621_v52 = vmul.f32 1.442695, %v1525_v35  ;;  %v1623_v62 = vmul.f32 1.442695, %v1526_v41  ;;  %v1625_v51 = vmul.f32 1.442695, %v1527_v14 }
 0x22a   : > { %v1627_v7 = vmul.f32 1.442695, %v1528_v37  ;;  %v1629_v10 = vmul.f32 1.442695, %v1529_v22  ;;  %v1631_v29 = vmul.f32 1.442695, %v1530_v61 }
 0x22b   : > { %3802 = vpow2.f32 %v1621_v52  ;;  %v4938_v37 = vld [vmem:[#allocation2 + $0x90] sm:$0xff] }
 0x22c   : > { %3804 = vpow2.f32 %v1623_v62 }
 0x22d   : > { %3806 = vpow2.f32 %v1625_v51  ;;  %v4933_v41 = vpop.f32.mrf.mxu2 }
 0x22e   : > { %3808 = vpow2.f32 %v1627_v7 }
 0x22f   : > { %3810 = vpow2.f32 %v1629_v10  ;;  %v1234_v61 = vpop.permute.xlu1 %1233 }
 0x230   : > { %3812 = vpow2.f32 %v1631_v29  ;;  %v1387_v10 = vsub.f32 %v4376_v12, %v1234_v61  ;;  %v1388_v29 = vsub.f32 %v4379_v13, %v1234_v61  ;;  %v4955_v12 = vsub.f32 %v4311_v39, %v4343_v59 }
 0x231   : > { %v3803_v19 = vpop.eup %3802  ;;  %v4959_v13 = vsub.f32 %v4327_v45, %v4343_v59  ;;  %v4969_v39 = vsub.f32 %v4844_v53, %v4345_v60 }
 0x232   : > { %v3805_v16 = vpop.eup %3804  ;;  %1055 = vmax.xlane.f32.xlu1 %v1054_v38  ;;  %v1389_v38 = vsub.f32 %v4386_v20, %v1234_v61 }
 0x233   : > { %v3807_v52 = vpop.eup %3806  ;;  %6212 = vst [vmem:[#allocation77_spill] sm:$0xff] %v4959_v13 }
 0x234   : > { %v3809_v22 = vpop.eup %3808  ;;  %1278 = vperm.xlu0 %3797, %v4791_v15  }
 0x235   : > { %v3811_v26 = vpop.eup %3810  ;;  %v1813_v32 = vpack.c.bf16 %v3809_v22, %v3803_v19  ;;  %v727_v22 = vpop.f32.mrf.mxu3 }
 0x236   : > { %v3813_v35 = vpop.eup %3812  ;;  %v1814_v14 = vpack.c.bf16 %v3811_v26, %v3805_v16  ;;  %1253 = vperm.xlu2 %3796, %v4694_v34   ;;  %v816_v20 = vpop.f32.mrf.mxu2 }
 0x237   : > { %2285 = vmatmul.bf16.vlgmr.msrb.gmra.mxu3 %v1813_v32  ;;  %v1815_v51 = vpack.c.bf16 %v3813_v35, %v3807_v52 }
 0x238   : > { %2374 = vmatmul.bf16.vlgmr.msrb.gmra.mxu0 %v1814_v14  ;;  %v4951_v14 = vld [vmem:[#allocation2 + $0xa8] sm:$0xff] }
 0x239   : > { %2463 = vmatmul.bf16.vlgmr.msrb.gmra.mxu1 %v1815_v51 }
 0x248   : > { %v1036_v33 = vpop.xlane.xlu2 %1035 }
 0x249   : > { %v4931_v50 = vmax.f32 %v4926_v30, %v1036_v33 }
 0x24b   : > { %2625 = vst.msk [vmem:[#allocation2 + $0x88] sm:$0xff] %vm295_vm1, %v4931_v50  ;;  %1273 = vperm.xlu1 %3798, %v4782_v4  }
 0x24d   : > { %v1040_v62 = vpop.xlane.xlu0 %1039 }
 0x24e   : > { %v4941_v7 = vmax.f32 %v4938_v37, %v1040_v62 }
 0x250   : > { %2626 = vst.msk [vmem:[#allocation2 + $0x90] sm:$0xff] %vm295_vm1, %v4941_v7  ;;  %v1239_v23 = vpop.permute.xlu2 %1238 }
 0x251   : > { %v1390_v19 = vsub.f32 %v4390_v27, %v1239_v23  ;;  %v1391_v16 = vsub.f32 %v4393_v28, %v1239_v23  ;;  %v1392_v52 = vsub.f32 %v4398_v40, %v1239_v23  ;;  %v4962_v40 = vsub.f32 %v727_v22, %v4345_v60 }
 0x253   : > { %v1480_v26 = vpack.c.bf16 %v1390_v19, %v1387_v10  ;;  %v1481_v32 = vpack.c.bf16 %v1391_v16, %v1388_v29  ;;  %v1482_v35 = vpack.c.bf16 %v1392_v52, %v1389_v38  ;;  %6213 = vst [vmem:[#allocation78_spill] sm:$0xff] %v4962_v40  ;;  %v4972_v38 = vsub.f32 %v816_v20, %v4353_v63  ;;  %v4974_v16 = vld [vmem:[#allocation2 + $0x98] sm:$0xff] }
 0x254   : > { %v4978_v52 = vsub.f32 %v4849_v8, %v4353_v63 }
 0x255   : > { %v1531_v27 = vunpack.c.l.bf16 %v1480_v26  ;;  %v1532_v51 = vunpack.c.l.bf16 %v1481_v32  ;;  %v1534_v28 = vunpack.c.h.bf16 %v1480_v26  ;;  %v1052_v33 = vpop.xlane.xlu0 %1051  ;;  %v1533_v61 = vunpack.c.l.bf16 %v1482_v35  ;;  %6214 = vst [vmem:[#allocation79_spill] sm:$0xff] %v4972_v38 }
 0x256   : > { %v1535_v62 = vunpack.c.h.bf16 %v1481_v32  ;;  %v4965_v10 = vmax.f32 %v4951_v14, %v1052_v33  ;;  %v1536_v29 = vunpack.c.h.bf16 %v1482_v35  ;;  %v1073_v32 = vmax.f32 %v4959_v13, %v4962_v40 }
 0x257   : > { %v1633_v45 = vmul.f32 1.442695, %v1531_v27  ;;  %v1635_v23 = vmul.f32 1.442695, %v1532_v51  ;;  %v1639_v19 = vmul.f32 1.442695, %v1534_v28  ;;  %v1057_v27 = vmax.f32 %v4955_v12, %v4969_v39 }
 0x258   : > { %v1641_v22 = vmul.f32 1.442695, %v1535_v62  ;;  %2629 = vst.msk [vmem:[#allocation2 + $0xa8] sm:$0xff] %vm295_vm1, %v4965_v10  ;;  %v1637_v53 = vmul.f32 1.442695, %v1533_v61  ;;  %v1074_v8 = vmax.f32 %v1073_v32, %v4972_v38  ;;  %v4995_v32 = vsub.f32 %v4319_v42, %v4343_v59 }
 0x259   : > { %3814 = vpow2.f32 %v1633_v45  ;;  %v1643_v35 = vmul.f32 1.442695, %v1536_v29  ;;  %v1058_v51 = vmax.f32 %v1057_v27, %v4978_v52 }
 0x25a   : > { %v1044_v26 = vpop.xlane.xlu1 %1043  ;;  %3816 = vpow2.f32 %v1639_v19  ;;  %6215 = vst [vmem:[#allocation80_spill] sm:$0xff] %v4995_v32 }
 0x25b   : > { %v4985_v20 = vmax.f32 %v4974_v16, %v1044_v26  ;;  %3818 = vpow2.f32 %v1635_v23 }
 0x25c   : > { %3820 = vpow2.f32 %v1641_v22  ;;  %v4999_v22 = vsub.f32 %v4922_v25, %v4345_v60 }
 0x25d   : > { %2627 = vst.msk [vmem:[#allocation2 + $0x98] sm:$0xff] %vm295_vm1, %v4985_v20  ;;  %3822 = vpow2.f32 %v1637_v53  ;;  %v5003_v53 = vsub.f32 %v4924_v17, %v4353_v63 }
 0x25e   : > { %1075 = vmax.xlane.f32.xlu0 %v1074_v8  ;;  %3824 = vpow2.f32 %v1643_v35  ;;  %6216 = vst [vmem:[#allocation81_spill] sm:$0xff] %v4999_v22  ;;  %v1244_v35 = vpop.permute.xlu2 %1243  ;;  %v1065_v27 = vmax.f32 %v4995_v32, %v4999_v22 }
 0x25f   : > { %v3815_v28 = vpop.eup %3814  ;;  %1059 = vmax.xlane.f32.xlu2 %v1058_v51  ;;  %6217 = vst [vmem:[#allocation82_spill] sm:$0xff] %v5003_v53  ;;  %v1393_v8 = vsub.f32 %v4402_v46, %v1244_v35  ;;  %v1394_v51 = vsub.f32 %v4405_v47, %v1244_v35  ;;  %v1395_v25 = vsub.f32 %v4412_v55, %v1244_v35 }
 0x260   : > { %v3817_v33 = vpop.eup %3816  ;;  %v1066_v42 = vmax.f32 %v1065_v27, %v5003_v53  ;;  %v6240_v53 = vld [vmem:[#allocation12_spill] sm:$0xff] }
 0x261   : > { %v3819_v61 = vpop.eup %3818  ;;  %v1816_v62 = vpack.c.bf16 %v3817_v33, %v3815_v28 }
 0x262   : > { %v3821_v29 = vpop.eup %3820 }
 0x263   : > { %2290 = vmatmul.bf16.gmra.mxu3 %v1816_v62  ;;  %v3823_v45 = vpop.eup %3822  ;;  %v1817_v23 = vpack.c.bf16 %v3821_v29, %v3819_v61 }
 0x264   : > { %v3825_v19 = vpop.eup %3824 }
 0x265   : > { %2379 = vmatmul.bf16.gmra.mxu0 %v1817_v23  ;;  %v1818_v26 = vpack.c.bf16 %v3825_v19, %v3823_v45 }
 0x267   : > { %2468 = vmatmul.bf16.gmra.mxu1 %v1818_v26 }
 0x272   : > { %v1249_v28 = vpop.permute.xlu1 %1248  ;;  %1293 = vperm.xlu0 %3797, %v4836_v57  }
 0x273   : > { %v1396_v33 = vsub.f32 %v4416_v58, %v1249_v28  ;;  %v1397_v17 = vsub.f32 %v4419_v0, %v1249_v28  ;;  %v1398_v61 = vsub.f32 %v4424_v3, %v1249_v28  ;;  %v5016_v0 = vpop.f32.mrf.mxu3 }
 0x275   : > { %v1483_v62 = vpack.c.bf16 %v1396_v33, %v1393_v8  ;;  %v1484_v29 = vpack.c.bf16 %v1397_v17, %v1394_v51  ;;  %v1485_v45 = vpack.c.bf16 %v1398_v61, %v1395_v25  ;;  %1067 = vmax.xlane.f32.xlu1 %v1066_v42  ;;  %v5018_v8 = vpop.f32.mrf.mxu2 }
 0x277   : > { %v1537_v46 = vunpack.c.l.bf16 %v1483_v62  ;;  %v1538_v23 = vunpack.c.l.bf16 %v1484_v29  ;;  %v1539_v47 = vunpack.c.l.bf16 %v1485_v45  ;;  %v1540_v19 = vunpack.c.h.bf16 %v1483_v62  ;;  %1268 = vperm.xlu2 %3796, %v4768_v56  }
 0x278   : > { %v1541_v26 = vunpack.c.h.bf16 %v1484_v29  ;;  %v1542_v27 = vunpack.c.h.bf16 %v1485_v45 }
 0x279   : > { %v1645_v38 = vmul.f32 1.442695, %v1537_v46  ;;  %v1647_v55 = vmul.f32 1.442695, %v1538_v23  ;;  %v1651_v35 = vmul.f32 1.442695, %v1540_v19  ;;  %v5024_v46 = vpop.permute.xlu0 %1263 }
 0x27a   : > { %v1653_v58 = vmul.f32 1.442695, %v1541_v26  ;;  %v1649_v40 = vmul.f32 1.442695, %v1539_v47  ;;  %v1655_v3 = vmul.f32 1.442695, %v1542_v27 }
 0x27b   : > { %3826 = vpow2.f32 %v1645_v38  ;;  %v5020_v38 = vpop.f32.mrf.mxu3  ;;  %v5029_v19 = vld [vmem:[#allocation2 + $0xc0] sm:$0xff] }
 0x27c   : > { %3828 = vpow2.f32 %v1651_v35 }
 0x27d   : > { %3830 = vpow2.f32 %v1647_v55  ;;  %v5022_v45 = vpop.f32.mrf.mxu2  ;;  %v5036_v55 = vsub.f32 %v4336_v54, %v4343_v59  ;;  %v5055_v54 = vsub.f32 %v4325_v44, %v4343_v59 }
 0x27e   : > { %3832 = vpow2.f32 %v1653_v58 }
 0x27f   : > { %3834 = vpow2.f32 %v1649_v40  ;;  %v5027_v40 = vld [vmem:[#allocation2 + $0xa0] sm:$0xff]  ;;  %6218 = vst [vmem:[#allocation83_spill] sm:$0xff] %v5036_v55 }
 0x280   : > { %3836 = vpow2.f32 %v1655_v3  ;;  %6221 = vst [vmem:[#allocation86_spill] sm:$0xff] %v5055_v54 }
 0x281   : > { %v3827_v51 = vpop.eup %3826 }
 0x282   : > { %v3829_v28 = vpop.eup %3828 }
 0x283   : > { %v3831_v42 = vpop.eup %3830  ;;  %v1819_v25 = vpack.c.bf16 %v3829_v28, %v3827_v51  ;;  %v735_v23 = vpop.f32.mrf.mxu3 }
 0x284   : > { %v3833_v33 = vpop.eup %3832  ;;  %v5039_v35 = vsub.f32 %v735_v23, %v4345_v60 }
 0x285   : > { %v3835_v17 = vpop.eup %3834  ;;  %2295 = vmatmul.bf16.gmra.mxu3 %v1819_v25  ;;  %v1820_v61 = vpack.c.bf16 %v3833_v33, %v3831_v42  ;;  %v824_v26 = vpop.f32.mrf.mxu2  ;;  %v5059_v25 = vsub.f32 %v4928_v21, %v4345_v60 }
 0x286   : > { %v3837_v62 = vpop.eup %3836  ;;  %6219 = vst [vmem:[#allocation84_spill] sm:$0xff] %v5039_v35  ;;  %v5049_v28 = vsub.f32 %v824_v26, %v4353_v63  ;;  %v1259_v42 = vpop.permute.xlu1 %1258  ;;  %v1085_v33 = vmax.f32 %v5036_v55, %v5039_v35 }
 0x287   : > { %2384 = vmatmul.bf16.gmra.mxu0 %v1820_v61  ;;  %v1821_v29 = vpack.c.bf16 %v3837_v62, %v3835_v17  ;;  %6222 = vst [vmem:[#allocation87_spill] sm:$0xff] %v5059_v25  ;;  %v5065_v17 = vsub.f32 %v4933_v41, %v4353_v63  ;;  %v1402_v61 = vsub.f32 %v4442_v24, %v1259_v42 }
 0x288   : > { %6220 = vst [vmem:[#allocation85_spill] sm:$0xff] %v5049_v28  ;;  %v1403_v62 = vsub.f32 %v4445_v31, %v1259_v42  ;;  %v1086_v23 = vmax.f32 %v1085_v33, %v5049_v28  ;;  %v1404_v44 = vsub.f32 %v4450_v43, %v1259_v42 }
 0x289   : > { %2473 = vmatmul.bf16.gmra.mxu1 %v1821_v29  ;;  %6223 = vst [vmem:[#allocation88_spill] sm:$0xff] %v5065_v17 }
 0x28e   : > { %1288 = vperm.xlu1 %3798, %v4821_v49  }
 0x291   : > { %v1048_v47 = vpop.xlane.xlu2 %1047 }
 0x292   : > { %v5032_v27 = vmax.f32 %v5027_v40, %v1048_v47 }
 0x293   : > { %v1064_v58 = vpop.xlane.xlu0 %1063 }
 0x294   : > { %2628 = vst.msk [vmem:[#allocation2 + $0xa0] sm:$0xff] %vm295_vm1, %v5032_v27  ;;  %v5046_v51 = vmax.f32 %v5029_v19, %v1064_v58  ;;  %v1069_v58 = vmax.f32 %v5055_v54, %v5059_v25 }
 0x296   : > { %2632 = vst.msk [vmem:[#allocation2 + $0xc0] sm:$0xff] %vm295_vm1, %v5046_v51  ;;  %v1070_v24 = vmax.f32 %v1069_v58, %v5065_v17  ;;  %v5086_v58 = vsub.f32 %v4330_v48, %v4343_v59 }
 0x298   : > { %6224 = vst [vmem:[#allocation89_spill] sm:$0xff] %v5086_v58 }
 0x299   : > { %v1254_v29 = vpop.permute.xlu2 %1253 }
 0x29a   : > { %v1399_v47 = vsub.f32 %v4428_v9, %v1254_v29  ;;  %v1400_v21 = vsub.f32 %v4431_v11, %v1254_v29  ;;  %v1401_v26 = vsub.f32 %v4438_v18, %v1254_v29 }
 0x29c   : > { %v1486_v41 = vpack.c.bf16 %v1402_v61, %v1399_v47  ;;  %v1487_v3 = vpack.c.bf16 %v1403_v62, %v1400_v21  ;;  %v1488_v35 = vpack.c.bf16 %v1404_v44, %v1401_v26  ;;  %1087 = vmax.xlane.f32.xlu0 %v1086_v23  ;;  %v5077_v61 = vld [vmem:[#allocation2 + $0xb0] sm:$0xff] }
 0x29e   : > { %v1543_v31 = vunpack.c.l.bf16 %v1486_v41  ;;  %v1544_v55 = vunpack.c.l.bf16 %v1487_v3  ;;  %v1545_v33 = vunpack.c.l.bf16 %v1488_v35  ;;  %v1546_v28 = vunpack.c.h.bf16 %v1486_v41  ;;  %v5093_v41 = vpop.f32.mrf.mxu3 }
 0x29f   : > { %v1547_v43 = vunpack.c.h.bf16 %v1487_v3  ;;  %v1548_v42 = vunpack.c.h.bf16 %v1488_v35 }
 0x2a0   : > { %v1657_v9 = vmul.f32 1.442695, %v1543_v31  ;;  %v1659_v13 = vmul.f32 1.442695, %v1544_v55  ;;  %1071 = vmax.xlane.f32.xlu2 %v1070_v24  ;;  %v1663_v11 = vmul.f32 1.442695, %v1546_v28  ;;  %v5097_v24 = vsub.f32 %v5018_v8, %v4353_v63 }
 0x2a1   : > { %v1665_v18 = vmul.f32 1.442695, %v1547_v43  ;;  %v1661_v29 = vmul.f32 1.442695, %v1545_v33  ;;  %v1667_v25 = vmul.f32 1.442695, %v1548_v42 }
 0x2a2   : > { %3838 = vpow2.f32 %v1657_v9  ;;  %6226 = vst [vmem:[#allocation91_spill] sm:$0xff] %v5097_v24  ;;  %v5108_v8 = vld [vmem:[#allocation2 + $0xb8] sm:$0xff] }
 0x2a3   : > { %3840 = vpow2.f32 %v1663_v11  ;;  %6228 = vst [vmem:[#allocation93_spill] sm:$0xff] %v5108_v8 }
 0x2a4   : > { %3842 = vpow2.f32 %v1659_v13 }
 0x2a5   : > { %v1056_v62 = vpop.xlane.xlu1 %1055  ;;  %3844 = vpow2.f32 %v1665_v18  ;;  %v5106_v18 = vld [vmem:[#allocation2 + $0xd8] sm:$0xff] }
 0x2a6   : > { %v5080_v23 = vmax.f32 %v5077_v61, %v1056_v62  ;;  %3846 = vpow2.f32 %v1661_v29  ;;  %v1279_v11 = vpop.permute.xlu0 %1278 }
 0x2a7   : > { %3848 = vpow2.f32 %v1667_v25  ;;  %v5090_v25 = vsub.f32 %v5016_v0, %v4345_v60 }
 0x2a8   : > { %v3839_v35 = vpop.eup %3838  ;;  %2630 = vst.msk [vmem:[#allocation2 + $0xb0] sm:$0xff] %vm295_vm1, %v5080_v23 }
 0x2a9   : > { %v3841_v55 = vpop.eup %3840  ;;  %6225 = vst [vmem:[#allocation90_spill] sm:$0xff] %v5090_v25  ;;  %v1077_v31 = vmax.f32 %v5086_v58, %v5090_v25 }
 0x2aa   : > { %v3843_v3 = vpop.eup %3842  ;;  %v1822_v28 = vpack.c.bf16 %v3841_v55, %v3839_v35 }
 0x2ab   : > { %v3845_v44 = vpop.eup %3844  ;;  %v1078_v33 = vmax.f32 %v1077_v31, %v5097_v24  ;;  %v6235_v31 = vld [vmem:[#allocation7_spill] sm:$0xff] }
 0x2ac   : > { %v3847_v47 = vpop.eup %3846  ;;  %2300 = vmatmul.bf16.gmra.mxu3 %v1822_v28  ;;  %v1823_v21 = vpack.c.bf16 %v3845_v44, %v3843_v3  ;;  %v6230_v28 = vld [vmem:[#allocation4_spill] sm:$0xff] }
 0x2ad   : > { %v3849_v26 = vpop.eup %3848  ;;  %v5126_v44 = vsub.f32 %v6230_v28, %v4343_v59 }
 0x2ae   : > { %2389 = vmatmul.bf16.gmra.mxu0 %v1823_v21  ;;  %v1824_v13 = vpack.c.bf16 %v3849_v26, %v3847_v47  ;;  %v5130_v47 = vsub.f32 %v5020_v38, %v4345_v60  ;;  %v5134_v21 = vsub.f32 %v5022_v45, %v4353_v63  ;;  %v6234_v26 = vld [vmem:[#allocation6_spill] sm:$0xff]  ;;  %v6239_v38 = vld [vmem:[#allocation11_spill] sm:$0xff] }
 0x2af   : > { %6231 = vst [vmem:[#allocation4_spill] sm:$0xff] %v5126_v44 }
 0x2b0   : > { %2478 = vmatmul.bf16.gmra.mxu1 %v1824_v13  ;;  %1308 = vperm.xlu0 %3797, %v4931_v50   ;;  %6232 = vst [vmem:[#allocation95_spill] sm:$0xff] %v5130_v47  ;;  %v1405_v13 = vsub.f32 %v6234_v26, %v5024_v46  ;;  %v1081_v45 = vmax.f32 %v5126_v44, %v5130_v47 }
 0x2b1   : > { %6233 = vst [vmem:[#allocation96_spill] sm:$0xff] %v5134_v21 }
 0x2b2   : > { %v1082_v17 = vmax.f32 %v1081_v45, %v5134_v21  ;;  %v6243_v45 = vld [vmem:[#allocation14_spill] sm:$0xff] }
 0x2b5   : > { %v2375_v48 = vpop.f32.mrf.mxu0 }
 0x2b6   : > { %v2464_v42 = vpop.f32.mrf.mxu1 }
 0x2b8   : > { %1079 = vmax.xlane.f32.xlu1 %v1078_v33  ;;  %1283 = vperm.xlu2 %3796, %v4808_v1   ;;  %v1406_v33 = vsub.f32 %v6235_v31, %v5024_v46 }
 0x2b9   : > { %1323 = vperm.xlu0 %3797, %v5032_v27  }
 0x2ba   : > { %v2286_v0 = vpop.f32.mrf.mxu3 }
 0x2bb   : > { %v2376_v43 = vadd.f32 %v2375_v48, %v2286_v0  ;;  %v6236_v0 = vld [vmem:[#allocation8_spill] sm:$0xff] }
 0x2bd   : > { %v5104_v9 = vadd.f32 %v2464_v42, %v2376_v43  ;;  %v1407_v43 = vsub.f32 %v6236_v0, %v5024_v46  ;;  %v6237_v42 = vld [vmem:[#allocation9_spill] sm:$0xff]  ;;  %v1274_v58 = vpop.permute.xlu1 %1273 }
 0x2be   : > { %v1411_v47 = vsub.f32 %v6240_v53, %v1274_v58  ;;  %v1413_v21 = vsub.f32 %v6243_v45, %v1274_v58 }
 0x2bf   : > { %6227 = vst [vmem:[#allocation92_spill] sm:$0xff] %v5104_v9  ;;  %v5147_v9 = vpop.f32.mrf.mxu0 }
 0x2c2   : > { %v5149_v31 = vpop.f32.mrf.mxu3 }
 0x2d1   : > { %1303 = vperm.xlu1 %3798, %v4886_v5   ;;  %v1076_v29 = vpop.xlane.xlu0 %1075 }
 0x2d2   : > { %v5112_v62 = vmax.f32 %v5106_v18, %v1076_v29  ;;  %v1060_v35 = vpop.xlane.xlu2 %1059 }
 0x2d3   : > { %v5115_v55 = vmax.f32 %v5108_v8, %v1060_v35  ;;  %v6238_v35 = vld [vmem:[#allocation10_spill] sm:$0xff] }
 0x2d4   : > { %2635 = vst.msk [vmem:[#allocation2 + $0xd8] sm:$0xff] %vm295_vm1, %v5112_v62 }
 0x2d5   : > { %6229 = vst [vmem:[#allocation94_spill] sm:$0xff] %v5115_v55  ;;  %1338 = vperm.xlu0 %3797, %v5115_v55  }
 0x2d6   : > { %2631 = vst.msk [vmem:[#allocation2 + $0xb8] sm:$0xff] %vm295_vm1, %v5115_v55 }
 0x2da   : > { %v1269_v48 = vpop.permute.xlu2 %1268 }
 0x2db   : > { %v1408_v29 = vsub.f32 %v6237_v42, %v1269_v48  ;;  %v1409_v28 = vsub.f32 %v6238_v35, %v1269_v48  ;;  %v1410_v3 = vsub.f32 %v6239_v38, %v1269_v48  ;;  %v5152_v35 = vpop.f32.mrf.mxu1 }
 0x2dd   : > { %v1489_v24 = vpack.c.bf16 %v1408_v29, %v1405_v13  ;;  %v1490_v26 = vpack.c.bf16 %v1409_v28, %v1406_v33  ;;  %v1491_v25 = vpack.c.bf16 %v1410_v3, %v1407_v43  ;;  %v6241_v3 = vld [vmem:[#allocation13_spill] sm:$0xff]  ;;  %v6242_v29 = vld [vmem:[#allocation15_spill] sm:$0xff] }
 0x2de   : > { %v1412_v33 = vsub.f32 %v6241_v3, %v1274_v58  ;;  %v1414_v28 = vsub.f32 %v6242_v29, %v1279_v11 }
 0x2df   : > { %v1549_v46 = vunpack.c.l.bf16 %v1489_v24  ;;  %v1550_v0 = vunpack.c.l.bf16 %v1490_v26  ;;  %v1551_v42 = vunpack.c.l.bf16 %v1491_v25  ;;  %v1552_v54 = vunpack.c.h.bf16 %v1489_v24  ;;  %v6244_v24 = vld [vmem:[#allocation16_spill] sm:$0xff] }
 0x2e0   : > { %v1553_v48 = vunpack.c.h.bf16 %v1490_v26  ;;  %v1554_v38 = vunpack.c.h.bf16 %v1491_v25  ;;  %v1415_v55 = vsub.f32 %v6244_v24, %v1279_v11  ;;  %v6245_v25 = vld [vmem:[#allocation17_spill] sm:$0xff]  ;;  %v1492_v53 = vpack.c.bf16 %v1414_v28, %v1411_v47 }
 0x2e1   : > { %v1669_v44 = vmul.f32 1.442695, %v1549_v46  ;;  %v1671_v22 = vmul.f32 1.442695, %v1550_v0  ;;  %v1673_v13 = vmul.f32 1.442695, %v1551_v42  ;;  %1083 = vmax.xlane.f32.xlu2 %v1082_v17  ;;  %v1416_v8 = vsub.f32 %v6245_v25, %v1279_v11 }
 0x2e2   : > { %v1675_v43 = vmul.f32 1.442695, %v1552_v54  ;;  %v1677_v32 = vmul.f32 1.442695, %v1553_v48  ;;  %v1679_v26 = vmul.f32 1.442695, %v1554_v38  ;;  %v1493_v46 = vpack.c.bf16 %v1415_v55, %v1412_v33  ;;  %v2380_v17 = vpop.f32.mrf.mxu0  ;;  %v826_v33 = vpop.f32.mrf.mxu2 }
 0x2e3   : > { %3850 = vpow2.f32 %v1669_v44  ;;  %v5160_v42 = vld [vmem:[#allocation2 + $0xc8] sm:$0xff]  ;;  %v1494_v54 = vpack.c.bf16 %v1416_v8, %v1413_v21  ;;  %v1555_v29 = vunpack.c.l.bf16 %v1492_v53  ;;  %v1558_v8 = vunpack.c.h.bf16 %v1492_v53 }
 0x2e4   : > { %3852 = vpow2.f32 %v1671_v22  ;;  %v2469_v58 = vpop.f32.mrf.mxu1  ;;  %v1556_v55 = vunpack.c.l.bf16 %v1493_v46  ;;  %v6247_v53 = vld [vmem:[#allocation5_spill] sm:$0xff] }
 0x2e5   : > { %3854 = vpow2.f32 %v1673_v13  ;;  %v1557_v13 = vunpack.c.l.bf16 %v1494_v54  ;;  %v1681_v28 = vmul.f32 1.442695, %v1555_v29 }
 0x2e6   : > { %3856 = vpow2.f32 %v1675_v43  ;;  %v2291_v0 = vpop.f32.mrf.mxu3  ;;  %v1559_v43 = vunpack.c.h.bf16 %v1493_v46  ;;  %v1683_v25 = vmul.f32 1.442695, %v1556_v55  ;;  %v5173_v46 = vsub.f32 %v6247_v53, %v4343_v59  ;;  %v6259_v53 = vld [vmem:[#allocation21_spill] sm:$0xff] }
 0x2e7   : > { %3858 = vpow2.f32 %v1677_v32  ;;  %v2381_v3 = vadd.f32 %v2380_v17, %v2291_v0  ;;  %v1685_v0 = vmul.f32 1.442695, %v1557_v13  ;;  %v6251_v13 = vld [vmem:[#allocation69_spill] sm:$0xff] }
 0x2e8   : > { %3860 = vpow2.f32 %v1679_v26  ;;  %v1068_v44 = vpop.xlane.xlu1 %1067  ;;  %v1560_v26 = vunpack.c.h.bf16 %v1494_v54  ;;  %6248 = vst [vmem:[#allocation7_spill] sm:$0xff] %v5173_v46  ;;  %v5177_v54 = vsub.f32 %v5093_v41, %v4345_v60 }
 0x2e9   : > { %v3851_v48 = vpop.eup %3850  ;;  %v5162_v22 = vadd.f32 %v2469_v58, %v2381_v3  ;;  %v5165_v11 = vmax.f32 %v5160_v42, %v1068_v44  ;;  %v1687_v58 = vmul.f32 1.442695, %v1558_v8  ;;  %3862 = vpow2.f32 %v1681_v28 }
 0x2ea   : > { %v3853_v47 = vpop.eup %3852  ;;  %v1689_v44 = vmul.f32 1.442695, %v1559_v43  ;;  %3864 = vpow2.f32 %v1683_v25  ;;  %6249 = vst [vmem:[#allocation8_spill] sm:$0xff] %v5177_v54 }
 0x2eb   : > { %6246 = vst [vmem:[#allocation6_spill] sm:$0xff] %v5162_v22  ;;  %v3855_v38 = vpop.eup %3854  ;;  %v1691_v22 = vmul.f32 1.442695, %v1560_v26  ;;  %3866 = vpow2.f32 %v1685_v0 }
 0x2ec   : > { %2633 = vst.msk [vmem:[#allocation2 + $0xc8] sm:$0xff] %vm295_vm1, %v5165_v11  ;;  %v3857_v32 = vpop.eup %3856  ;;  %3868 = vpow2.f32 %v1687_v58  ;;  %v5215_v58 = vpop.f32.mrf.mxu1 }
 0x2ed   : > { %v3859_v21 = vpop.eup %3858  ;;  %v1825_v45 = vpack.c.bf16 %v3857_v32, %v3851_v48  ;;  %v5180_v48 = vsub.f32 %v826_v33, %v4353_v63  ;;  %3870 = vpow2.f32 %v1689_v44  ;;  %v5190_v33 = vld [vmem:[#allocation2 + $0xf0] sm:$0xff]  ;;  %6258 = vst [vmem:[#allocation16_spill] sm:$0xff] %v5215_v58 }
 0x2ee   : > { %v3861_v24 = vpop.eup %3860  ;;  %v1826_v17 = vpack.c.bf16 %v3859_v21, %v3853_v47  ;;  %3872 = vpow2.f32 %v1691_v22  ;;  %v1089_v47 = vmax.f32 %v5173_v46, %v5177_v54  ;;  %v5187_v22 = vpop.permute.xlu0 %1293  ;;  %6252 = vst [vmem:[#allocation10_spill] sm:$0xff] %v5190_v33 }
 0x2ef   : > { %2305 = vmatmul.bf16.gmra.mxu3 %v1825_v45  ;;  %v1827_v3 = vpack.c.bf16 %v3861_v24, %v3855_v38  ;;  %6250 = vst [vmem:[#allocation9_spill] sm:$0xff] %v5180_v48  ;;  %v3863_v29 = vpop.eup %3862  ;;  %v5196_v45 = vld [vmem:[#allocation2 + $0xd0] sm:$0xff]  ;;  %v5208_v0 = vpop.f32.mrf.mxu3 }
 0x2f0   : > { %2394 = vmatmul.bf16.gmra.mxu0 %v1826_v17  ;;  %v3865_v55 = vpop.eup %3864  ;;  %v1090_v59 = vmax.f32 %v1089_v47, %v5180_v48  ;;  %6254 = vst [vmem:[#allocation12_spill] sm:$0xff] %v5196_v45  ;;  %v5206_v17 = vpop.f32.mrf.mxu0  ;;  %v6260_v47 = vld [vmem:[#allocation22_spill] sm:$0xff]  ;;  %v6266_v48 = vld [vmem:[#allocation36_spill] sm:$0xff] }
 0x2f1   : > { %2483 = vmatmul.bf16.gmra.mxu1 %v1827_v3  ;;  %v3867_v38 = vpop.eup %3866  ;;  %6256 = vst [vmem:[#allocation15_spill] sm:$0xff] %v5206_v17  ;;  %v6265_v24 = vld [vmem:[#allocation34_spill] sm:$0xff] }
 0x2f2   : > { %v3869_v32 = vpop.eup %3868  ;;  %6257 = vst [vmem:[#allocation14_spill] sm:$0xff] %v5208_v0 }
 0x2f3   : > { %v3871_v60 = vpop.eup %3870  ;;  %v1828_v8 = vpack.c.bf16 %v3869_v32, %v3863_v29 }
 0x2f4   : > { %v3873_v41 = vpop.eup %3872  ;;  %v1829_v21 = vpack.c.bf16 %v3871_v60, %v3865_v55  ;;  %v6262_v60 = vld [vmem:[#allocation18_spill] sm:$0xff] }
 0x2f5   : > { %v1830_v63 = vpack.c.bf16 %v3873_v41, %v3867_v38 }
 0x2f9   : > { %1298 = vperm.xlu2 %3796, %v6251_v13  }
 0x2fb   : > { %1091 = vmax.xlane.f32.xlu1 %v1090_v59  ;;  %v6261_v59 = vld [vmem:[#allocation23_spill] sm:$0xff] }
 0x2ff   : > { %2310 = vmatmul.bf16.gmra.mxu3 %v1828_v8  ;;  %v6263_v8 = vld [vmem:[#allocation19_spill] sm:$0xff] }
 0x300   : > { %2399 = vmatmul.bf16.gmra.mxu0 %v1829_v21  ;;  %v1289_v44 = vpop.permute.xlu1 %1288 }
 0x301   : > { %2488 = vmatmul.bf16.gmra.mxu1 %v1830_v63  ;;  %1313 = vperm.xlu2 %3796, %v4941_v7   ;;  %v1420_v29 = vsub.f32 %v6259_v53, %v1289_v44  ;;  %v1421_v55 = vsub.f32 %v6260_v47, %v1289_v44  ;;  %v1422_v32 = vsub.f32 %v6261_v59, %v1289_v44  ;;  %v6264_v63 = vld [vmem:[#allocation20_spill] sm:$0xff] }
 0x302   : > { %v6267_v53 = vsub.f32 %v6265_v24, %v6266_v48 }
 0x304   : > { %v1159_v54 = vmul.f32 1.442695, %v6267_v53 }
 0x306   : > { %v5232_v44 = vpop.f32.mrf.mxu1  ;;  %3874 = vpow2.f32 %v1159_v54 }
 0x308   : > { %v5227_v3 = vpop.f32.mrf.mxu3 }
 0x309   : > { %1328 = vperm.xlu2 %3796, %v4965_v10  }
 0x30c   : > { %v3875_v54 = vpop.eup %3874 }
 0x30f   : > { %v1088_v43 = vpop.xlane.xlu0 %1087 }
 0x310   : > { %v5193_v28 = vmax.f32 %v5190_v33, %v1088_v43 }
 0x311   : > { %1343 = vperm.xlu2 %3796, %v5046_v51  }
 0x312   : > { %6253 = vst [vmem:[#allocation11_spill] sm:$0xff] %v5193_v28 }
 0x313   : > { %2638 = vst.msk [vmem:[#allocation2 + $0xf0] sm:$0xff] %vm295_vm1, %v5193_v28  ;;  %v1072_v26 = vpop.xlane.xlu2 %1071 }
 0x314   : > { %v5203_v25 = vmax.f32 %v5196_v45, %v1072_v26  ;;  %1318 = vperm.xlu1 %3798, %v4985_v20   ;;  %v5225_v26 = vpop.f32.mrf.mxu0 }
 0x316   : > { %6255 = vst [vmem:[#allocation13_spill] sm:$0xff] %v5203_v25  ;;  %1353 = vperm.xlu0 %3797, %v5203_v25  }
 0x317   : > { %2634 = vst.msk [vmem:[#allocation2 + $0xd0] sm:$0xff] %vm295_vm1, %v5203_v25 }
 0x319   : > { %1358 = vperm.xlu2 %3796, %v5112_v62  }
 0x31b   : > { %v1284_v38 = vpop.permute.xlu2 %1283 }
 0x31c   : > { %v1417_v41 = vsub.f32 %v6262_v60, %v1284_v38  ;;  %v1418_v21 = vsub.f32 %v6263_v8, %v1284_v38  ;;  %v1419_v43 = vsub.f32 %v6264_v63, %v1284_v38  ;;  %1333 = vperm.xlu1 %3798, %v5080_v23  }
 0x31e   : > { %v1495_v47 = vpack.c.bf16 %v1420_v29, %v1417_v41  ;;  %v1496_v46 = vpack.c.bf16 %v1421_v55, %v1418_v21  ;;  %v1497_v58 = vpack.c.bf16 %v1422_v32, %v1419_v43  ;;  %v6268_v29 = vld [vmem:[#allocation41_spill] sm:$0xff]  ;;  %v6269_v55 = vld [vmem:[#allocation42_spill] sm:$0xff]  ;;  %v5243_v21 = vpop.f32.mrf.mxu1 }
 0x31f   : > { %v6270_v32 = vsub.f32 %v6268_v29, %v6269_v55  ;;  %6273 = vst [vmem:[#allocation69_spill] sm:$0xff] %v5243_v21 }
 0x320   : > { %v1561_v59 = vunpack.c.l.bf16 %v1495_v47  ;;  %v1562_v60 = vunpack.c.l.bf16 %v1496_v46  ;;  %v1563_v8 = vunpack.c.l.bf16 %v1497_v58  ;;  %v1564_v17 = vunpack.c.h.bf16 %v1495_v47 }
 0x321   : > { %v1565_v38 = vunpack.c.h.bf16 %v1496_v46  ;;  %v1566_v63 = vunpack.c.h.bf16 %v1497_v58  ;;  %1373 = vperm.xlu2 %3796, %v5193_v28   ;;  %v1165_v41 = vmul.f32 1.442695, %v6270_v32  ;;  %v5239_v46 = vpop.f32.mrf.mxu0  ;;  %v5241_v58 = vpop.f32.mrf.mxu3  ;;  %v4148_v28 = vmov 0.0  }
 0x322   : > { %v1693_v0 = vmul.f32 1.442695, %v1561_v59  ;;  %v1695_v25 = vmul.f32 1.442695, %v1562_v60  ;;  %v1697_v45 = vmul.f32 1.442695, %v1563_v8 }
 0x323   : > { %v1699_v33 = vmul.f32 1.442695, %v1564_v17  ;;  %v1701_v48 = vmul.f32 1.442695, %v1565_v38  ;;  %v1703_v24 = vmul.f32 1.442695, %v1566_v63 }
 0x324   : > { %3876 = vpow2.f32 %v1693_v0  ;;  %1348 = vperm.xlu1 %3798, %v5165_v11   ;;  %6271 = vst [vmem:[#allocation17_spill] sm:$0xff] %v5239_v46  ;;  %v6274_v60 = vld [vmem:[#allocation48_spill] sm:$0xff] }
 0x325   : > { %3878 = vpow2.f32 %v1695_v25  ;;  %6272 = vst [vmem:[#allocation5_spill] sm:$0xff] %v5241_v58  ;;  %v5245_v25 = vld [vmem:[#allocation2 + $0xe0] sm:$0xff] }
 0x326   : > { %3880 = vpow2.f32 %v1697_v45  ;;  %330 = vst.msk [vmem:[#allocation3 + $0x8] sm:$0xff] %vm328_vm2, %v4148_v28 }
 0x327   : > { %3882 = vpow2.f32 %v1699_v33  ;;  %v6275_v33 = vld [vmem:[#allocation50_spill] sm:$0xff]  ;;  %329 = vst.msk [vmem:[#allocation3] sm:$0xff] %vm328_vm2, %v4148_v28 }
 0x328   : > { %3884 = vpow2.f32 %v1701_v48  ;;  %v6276_v8 = vsub.f32 %v6274_v60, %v6275_v33  ;;  %v6277_v60 = vld [vmem:[#allocation63_spill] sm:$0xff]  ;;  %331 = vst.msk [vmem:[#allocation3 + $0x10] sm:$0xff] %vm328_vm2, %v4148_v28 }
 0x329   : > { %3886 = vpow2.f32 %v1703_v24  ;;  %1900 = vperm.xlu2 %3796, %v3875_v54   ;;  %332 = vst.msk [vmem:[#allocation3 + $0x18] sm:$0xff] %vm328_vm2, %v4148_v28 }
 0x32a   : > { %v3877_v17 = vpop.eup %3876  ;;  %3888 = vpow2.f32 %v1165_v41  ;;  %v1171_v38 = vmul.f32 1.442695, %v6276_v8  ;;  %333 = vst.msk [vmem:[#allocation3 + $0x20] sm:$0xff] %vm328_vm2, %v4148_v28 }
 0x32b   : > { %v3879_v0 = vpop.eup %3878  ;;  %v1080_v53 = vpop.xlane.xlu1 %1079  ;;  %334 = vst.msk [vmem:[#allocation3 + $0x28] sm:$0xff] %vm328_vm2, %v4148_v28 }
 0x32c   : > { %v3881_v43 = vpop.eup %3880  ;;  %v5248_v45 = vmax.f32 %v5245_v25, %v1080_v53  ;;  %v2390_v24 = vpop.f32.mrf.mxu0  ;;  %3890 = vpow2.f32 %v1171_v38  ;;  %335 = vst.msk [vmem:[#allocation3 + $0x30] sm:$0xff] %vm328_vm2, %v4148_v28 }
 0x32d   : > { %v3883_v47 = vpop.eup %3882  ;;  %v2479_v53 = vpop.f32.mrf.mxu1  ;;  %336 = vst.msk [vmem:[#allocation3 + $0x38] sm:$0xff] %vm328_vm2, %v4148_v28 }
 0x32e   : > { %v3885_v59 = vpop.eup %3884  ;;  %v1831_v63 = vpack.c.bf16 %v3883_v47, %v3877_v17  ;;  %2636 = vst.msk [vmem:[#allocation2 + $0xe0] sm:$0xff] %vm295_vm1, %v5248_v45  ;;  %1363 = vperm.xlu1 %3798, %v5248_v45   ;;  %v1135_v17 = vsub.f32 %v6277_v60, %v4782_v4  ;;  %v1144_v4 = vsub.f32 %v4974_v16, %v4985_v20 }
 0x32f   : > { %v3887_v48 = vpop.eup %3886  ;;  %v1832_v29 = vpack.c.bf16 %v3885_v59, %v3879_v0  ;;  %v2301_v55 = vpop.f32.mrf.mxu3  ;;  %v6279_v0 = vld [vmem:[#allocation66_spill] sm:$0xff]  ;;  %337 = vst.msk [vmem:[#allocation3 + $0x40] sm:$0xff] %vm328_vm2, %v4148_v28 }
 0x330   : > { %v3889_v32 = vpop.eup %3888  ;;  %2315 = vmatmul.bf16.gmra.mxu3 %v1831_v63  ;;  %v1833_v41 = vpack.c.bf16 %v3887_v48, %v3881_v43  ;;  %v2391_v54 = vadd.f32 %v2390_v24, %v2301_v55  ;;  %v1177_v33 = vmul.f32 1.442695, %v1135_v17  ;;  %v1138_v59 = vsub.f32 %v6279_v0, %v4821_v49  ;;  %v6280_v48 = vld [vmem:[#allocation70_spill] sm:$0xff]  ;;  %v6287_v0 = vld [vmem:[#allocation39_spill] sm:$0xff]  ;;  %338 = vst.msk [vmem:[#allocation3 + $0x48] sm:$0xff] %vm328_vm2, %v4148_v28 }
 0x331   : > { %2404 = vmatmul.bf16.gmra.mxu0 %v1832_v29  ;;  %1915 = vperm.xlu2 %3796, %v3889_v32   ;;  %v1141_v38 = vsub.f32 %v6280_v48, %v4886_v5  ;;  %v1195_v55 = vmul.f32 1.442695, %v1144_v4  ;;  %v1147_v49 = vsub.f32 %v5077_v61, %v5080_v23  ;;  %v6286_v61 = vld [vmem:[#allocation45_spill] sm:$0xff]  ;;  %v6290_v48 = vld [vmem:[#allocation24_spill] sm:$0xff]  ;;  %v1153_v4 = vsub.f32 %v5245_v25, %v5248_v45 }
 0x332   : > { %2493 = vmatmul.bf16.gmra.mxu1 %v1833_v41  ;;  %v5258_v47 = vadd.f32 %v2479_v53, %v2391_v54  ;;  %v3891_v8 = vpop.eup %3890  ;;  %3892 = vpow2.f32 %v1177_v33  ;;  %v1183_v63 = vmul.f32 1.442695, %v1138_v59  ;;  %v5268_v41 = vld [vmem:[#allocation2 + $0xe8] sm:$0xff]  ;;  %v6283_v53 = vld [vmem:[#allocation31_spill] sm:$0xff]  ;;  %v1131_v23 = vsub.f32 %v6286_v61, %v4694_v34  ;;  %v6288_v59 = vld [vmem:[#allocation40_spill] sm:$0xff]  ;;  %339 = vst.msk [vmem:[#allocation3 + $0x50] sm:$0xff] %vm328_vm2, %v4148_v28 }
 0x333   : > { %v1189_v24 = vmul.f32 1.442695, %v1141_v38  ;;  %6281 = vst [vmem:[#allocation22_spill] sm:$0xff] %v5268_v41  ;;  %v6282_v54 = vld [vmem:[#allocation29_spill] sm:$0xff]  ;;  %v1423_v38 = vsub.f32 %v6290_v48, %v5187_v22  ;;  %v6294_v34 = vld [vmem:[#allocation28_spill] sm:$0xff] }
 0x334   : > { %6278 = vst [vmem:[#allocation21_spill] sm:$0xff] %v5258_v47  ;;  %3894 = vpow2.f32 %v1183_v63  ;;  %v6284_v60 = vsub.f32 %v6282_v54, %v6283_v53  ;;  %v6289_v63 = vsub.f32 %v6287_v0, %v6288_v59  ;;  %v6293_v54 = vld [vmem:[#allocation27_spill] sm:$0xff]  ;;  %v1169_v0 = vmul.f32 1.442695, %v1131_v23 }
 0x335   : > { %3896 = vpow2.f32 %v1189_v24  ;;  %v6291_v24 = vld [vmem:[#allocation25_spill] sm:$0xff]  ;;  %v1213_v45 = vmul.f32 1.442695, %v1153_v4  ;;  %v5303_v4 = vpop.f32.mrf.mxu0  ;;  %340 = vst.msk [vmem:[#allocation3 + $0x58] sm:$0xff] %vm328_vm2, %v4148_v28 }
 0x336   : > { %3898 = vpow2.f32 %v1195_v55  ;;  %v1157_v5 = vmul.f32 1.442695, %v6284_v60  ;;  %341 = vst.msk [vmem:[#allocation3 + $0x60] sm:$0xff] %vm328_vm2, %v4148_v28 }
 0x337   : > { %342 = vst.msk [vmem:[#allocation3 + $0x68] sm:$0xff] %vm328_vm2, %v4148_v28 }
 0x338   : > { %v3893_v43 = vpop.eup %3892  ;;  %3900 = vpow2.f32 %v1157_v5  ;;  %v6295_v5 = vld [vmem:[#allocation30_spill] sm:$0xff]  ;;  %343 = vst.msk [vmem:[#allocation3 + $0x70] sm:$0xff] %vm328_vm2, %v4148_v28 }
 0x339   : > { %1930 = vperm.xlu2 %3796, %v3891_v8   ;;  %v1201_v8 = vmul.f32 1.442695, %v1147_v49  ;;  %344 = vst.msk [vmem:[#allocation3 + $0x78] sm:$0xff] %vm328_vm2, %v4148_v28 }
 0x33a   : > { %v3895_v29 = vpop.eup %3894  ;;  %345 = vst.msk [vmem:[#allocation3 + $0x80] sm:$0xff] %vm328_vm2, %v4148_v28 }
 0x33b   : > { %v3897_v32 = vpop.eup %3896  ;;  %3902 = vpow2.f32 %v1201_v8  ;;  %346 = vst.msk [vmem:[#allocation3 + $0x88] sm:$0xff] %vm328_vm2, %v4148_v28 }
 0x33c   : > { %v3899_v20 = vpop.eup %3898  ;;  %347 = vst.msk [vmem:[#allocation3 + $0x90] sm:$0xff] %vm328_vm2, %v4148_v28 }
 0x33d   : > { %348 = vst.msk [vmem:[#allocation3 + $0x98] sm:$0xff] %vm328_vm2, %v4148_v28 }
 0x33e   : > { %v3901_v8 = vpop.eup %3900  ;;  %349 = vst.msk [vmem:[#allocation3 + $0xa0] sm:$0xff] %vm328_vm2, %v4148_v28 }
 0x33f   : > { %350 = vst.msk [vmem:[#allocation3 + $0xa8] sm:$0xff] %vm328_vm2, %v4148_v28 }
 0x340   : > { %351 = vst.msk [vmem:[#allocation3 + $0xb0] sm:$0xff] %vm328_vm2, %v4148_v28 }
 0x341   : > { %1945 = vperm.xlu2 %3796, %v3893_v43   ;;  %v1163_v43 = vmul.f32 1.442695, %v6289_v63  ;;  %v3903_v25 = vpop.eup %3902  ;;  %352 = vst.msk [vmem:[#allocation3 + $0xb8] sm:$0xff] %vm328_vm2, %v4148_v28 }
 0x342   : > { %353 = vst.msk [vmem:[#allocation3 + $0xc0] sm:$0xff] %vm328_vm2, %v4148_v28 }
 0x343   : > { %3904 = vpow2.f32 %v1163_v43  ;;  %354 = vst.msk [vmem:[#allocation3 + $0xc8] sm:$0xff] %vm328_vm2, %v4148_v28 }
 0x344   : > { %355 = vst.msk [vmem:[#allocation3 + $0xd0] sm:$0xff] %vm328_vm2, %v4148_v28 }
 0x345   : > { %356 = vst.msk [vmem:[#allocation3 + $0xd8] sm:$0xff] %vm328_vm2, %v4148_v28 }
 0x346   : > { %357 = vst.msk [vmem:[#allocation3 + $0xe0] sm:$0xff] %vm328_vm2, %v4148_v28 }
 0x347   : > { %358 = vst.msk [vmem:[#allocation3 + $0xe8] sm:$0xff] %vm328_vm2, %v4148_v28 }
 0x348   : > { %359 = vst.msk [vmem:[#allocation3 + $0xf0] sm:$0xff] %vm328_vm2, %v4148_v28 }
 0x349   : > { %1960 = vperm.xlu2 %3796, %v3895_v29   ;;  %v1424_v29 = vsub.f32 %v6291_v24, %v5187_v22  ;;  %360 = vst.msk [vmem:[#allocation3 + $0xf8] sm:$0xff] %vm328_vm2, %v4148_v28 }
 0x351   : > { %1975 = vperm.xlu2 %3796, %v3897_v32   ;;  %v6292_v32 = vld [vmem:[#allocation26_spill] sm:$0xff] }
 0x352   : > { %v1425_v49 = vsub.f32 %v6292_v32, %v5187_v22  ;;  %v1304_v22 = vpop.permute.xlu1 %1303 }
 0x354   : > { %v1084_v17 = vpop.xlane.xlu2 %1083 }
 0x355   : > { %v5274_v33 = vmax.f32 %v5268_v41, %v1084_v17 }
 0x357   : > { %6285 = vst [vmem:[#allocation23_spill] sm:$0xff] %v5274_v33  ;;  %1368 = vperm.xlu0 %3797, %v5274_v33  }
 0x358   : > { %2637 = vst.msk [vmem:[#allocation2 + $0xe8] sm:$0xff] %vm295_vm1, %v5274_v33 }
 0x359   : > { %1990 = vperm.xlu2 %3796, %v3899_v20   ;;  %v6296_v20 = vsub.f32 %v5160_v42, %v5165_v11  ;;  %v1309_v42 = vpop.permute.xlu0 %1308 }
 0x35b   : > { %v1207_v61 = vmul.f32 1.442695, %v6296_v20  ;;  %v3905_v20 = vpop.eup %3904 }
 0x35c   : > { %v1299_v55 = vpop.permute.xlu2 %1298 }
 0x35d   : > { %v1426_v53 = vsub.f32 %v6293_v54, %v1299_v55  ;;  %v1427_v60 = vsub.f32 %v6294_v34, %v1299_v55  ;;  %v1428_v17 = vsub.f32 %v6295_v5, %v1299_v55  ;;  %3906 = vpow2.f32 %v1207_v61  ;;  %v6299_v61 = vld [vmem:[#allocation46_spill] sm:$0xff] }
 0x35e   : > { %3908 = vpow2.f32 %v1169_v0  ;;  %v6300_v0 = vld [vmem:[#allocation35_spill] sm:$0xff] }
 0x35f   : > { %v1498_v59 = vpack.c.bf16 %v1426_v53, %v1423_v38  ;;  %v1499_v63 = vpack.c.bf16 %v1427_v60, %v1424_v29  ;;  %v1500_v48 = vpack.c.bf16 %v1428_v17, %v1425_v49  ;;  %1895 = vperm.xlu0 %3797, %v3901_v8   ;;  %3910 = vpow2.f32 %v1213_v45  ;;  %v6297_v29 = vld [vmem:[#allocation32_spill] sm:$0xff]  ;;  %v6298_v60 = vld [vmem:[#allocation33_spill] sm:$0xff] }
 0x360   : > { %v1429_v49 = vsub.f32 %v6297_v29, %v1304_v22  ;;  %v1430_v17 = vsub.f32 %v6298_v60, %v1304_v22  ;;  %v6303_v29 = vld [vmem:[#allocation49_spill] sm:$0xff] }
 0x361   : > { %v1567_v24 = vunpack.c.l.bf16 %v1498_v59  ;;  %v1568_v32 = vunpack.c.l.bf16 %v1499_v63  ;;  %v1569_v54 = vunpack.c.l.bf16 %v1500_v48  ;;  %v1570_v34 = vunpack.c.h.bf16 %v1498_v59  ;;  %2005 = vperm.xlu2 %3796, %v3903_v25   ;;  %v6301_v25 = vld [vmem:[#allocation59_spill] sm:$0xff] }
 0x362   : > { %v1571_v55 = vunpack.c.h.bf16 %v1499_v63  ;;  %v1572_v5 = vunpack.c.h.bf16 %v1500_v48  ;;  %v1432_v59 = vsub.f32 %v6299_v61, %v1309_v42  ;;  %v1431_v63 = vsub.f32 %v6300_v0, %v1304_v22 }
 0x363   : > { %v1705_v11 = vmul.f32 1.442695, %v1567_v24  ;;  %v1707_v23 = vmul.f32 1.442695, %v1568_v32  ;;  %v1709_v38 = vmul.f32 1.442695, %v1569_v54  ;;  %v1134_v45 = vsub.f32 %v6301_v25, %v4768_v56  ;;  %v5311_v54 = vpop.f32.mrf.mxu1 }
 0x364   : > { %v1711_v53 = vmul.f32 1.442695, %v1570_v34  ;;  %v5301_v43 = vpop.permute.xlu2 %1313  ;;  %v1713_v8 = vmul.f32 1.442695, %v1571_v55  ;;  %v1715_v48 = vmul.f32 1.442695, %v1572_v5  ;;  %v3907_v34 = vpop.eup %3906  ;;  %v1501_v55 = vpack.c.bf16 %v1432_v59, %v1429_v49 }
 0x365   : > { %3912 = vpow2.f32 %v1705_v11  ;;  %v6302_v24 = vld [vmem:[#allocation47_spill] sm:$0xff]  ;;  %v1434_v11 = vsub.f32 %v6303_v29, %v1309_v42  ;;  %v3909_v60 = vpop.eup %3908  ;;  %v5314_v5 = vpop.f32.mrf.mxu3  ;;  %v1175_v0 = vmul.f32 1.442695, %v1134_v45  ;;  %v6304_v25 = vld [vmem:[#allocation65_spill] sm:$0xff] }
 0x366   : > { %3914 = vpow2.f32 %v1707_v23  ;;  %v1433_v32 = vsub.f32 %v6302_v24, %v1309_v42  ;;  %v3911_v22 = vpop.eup %3910  ;;  %v1573_v24 = vunpack.c.l.bf16 %v1501_v55  ;;  %v964_v42 = vld [vmem:[#allocation2 + $0xf8] sm:$0xff]  ;;  %v6305_v59 = vld [vmem:[#allocation37_spill] sm:$0xff] }
 0x367   : > { %3916 = vpow2.f32 %v1709_v38  ;;  %1910 = vperm.xlu0 %3797, %v3905_v20   ;;  %v1503_v23 = vpack.c.bf16 %v1434_v11, %v1431_v63  ;;  %v1137_v38 = vsub.f32 %v6304_v25, %v4808_v1  ;;  %v1576_v1 = vunpack.c.h.bf16 %v1501_v55 }
 0x368   : > { %3918 = vpow2.f32 %v1711_v53  ;;  %v1502_v61 = vpack.c.bf16 %v1433_v32, %v1430_v17  ;;  %v6306_v32 = vld [vmem:[#allocation38_spill] sm:$0xff]  ;;  %v1717_v47 = vmul.f32 1.442695, %v1573_v24 }
 0x369   : > { %3920 = vpow2.f32 %v1713_v8  ;;  %2020 = vperm.xlu2 %3796, %v3907_v34   ;;  %v6307_v34 = vsub.f32 %v6305_v59, %v6306_v32  ;;  %v1181_v11 = vmul.f32 1.442695, %v1137_v38  ;;  %v1578_v59 = vunpack.c.h.bf16 %v1503_v23 }
 0x36a   : > { %3922 = vpow2.f32 %v1715_v48  ;;  %v1574_v53 = vunpack.c.l.bf16 %v1502_v61  ;;  %v1575_v48 = vunpack.c.l.bf16 %v1503_v23  ;;  %v1577_v58 = vunpack.c.h.bf16 %v1502_v61 }
 0x36b   : > { %v3913_v56 = vpop.eup %3912  ;;  %v1161_v63 = vmul.f32 1.442695, %v6307_v34  ;;  %3924 = vpow2.f32 %v1175_v0  ;;  %v1723_v61 = vmul.f32 1.442695, %v1576_v1 }
 0x36c   : > { %v3915_v20 = vpop.eup %3914  ;;  %v5318_v16 = vpop.permute.xlu2 %1328  ;;  %v1719_v32 = vmul.f32 1.442695, %v1574_v53  ;;  %v1721_v55 = vmul.f32 1.442695, %v1575_v48  ;;  %v1725_v23 = vmul.f32 1.442695, %v1577_v58 }
 0x36d   : > { %v3917_v49 = vpop.eup %3916  ;;  %v2395_v17 = vpop.f32.mrf.mxu0  ;;  %3926 = vpow2.f32 %v1161_v63 }
 0x36e   : > { %v3919_v8 = vpop.eup %3918  ;;  %v1092_v29 = vpop.xlane.xlu1 %1091  ;;  %3928 = vpow2.f32 %v1181_v11 }
 0x36f   : > { %v3921_v45 = vpop.eup %3920  ;;  %v2484_v25 = vpop.f32.mrf.mxu1  ;;  %v1124_v21 = vmax.f32 %v964_v42, %v1092_v29  ;;  %1925 = vperm.xlu0 %3797, %v3909_v60   ;;  %v1834_v33 = vpack.c.bf16 %v3919_v8, %v3913_v56  ;;  %3930 = vpow2.f32 %v1717_v47 }
 0x370   : > { %v3923_v46 = vpop.eup %3922  ;;  %v1835_v41 = vpack.c.bf16 %v3921_v45, %v3915_v20  ;;  %3932 = vpow2.f32 %v1719_v32 }
 0x371   : > { %2639 = vst.msk [vmem:[#allocation2 + $0xf8] sm:$0xff] %vm295_vm1, %v1124_v21  ;;  %1378 = vperm.xlu1 %3798, %v1124_v21   ;;  %2035 = vperm.xlu2 %3796, %v3911_v22   ;;  %v1836_v60 = vpack.c.bf16 %v3923_v46, %v3917_v49  ;;  %v1156_v56 = vsub.f32 %v964_v42, %v1124_v21  ;;  %v3925_v24 = vpop.eup %3924  ;;  %v1727_v22 = vmul.f32 1.442695, %v1578_v59  ;;  %v6308_v46 = vld [vmem:[#allocation43_spill] sm:$0xff]  ;;  %3934 = vpow2.f32 %v1721_v55  ;;  %v6311_v42 = vld [vmem:[#allocation68_spill] sm:$0xff]  ;;  %v6312_v55 = vld [vmem:[#allocation54_spill] sm:$0xff] }
 0x372   : > { %2320 = vmatmul.bf16.gmra.mxu3 %v1834_v33  ;;  %2409 = vmatmul.bf16.gmra.mxu0 %v1835_v41  ;;  %v2306_v0 = vpop.f32.mrf.mxu3  ;;  %v6309_v41 = vld [vmem:[#allocation44_spill] sm:$0xff]  ;;  %3936 = vpow2.f32 %v1723_v61 }
 0x373   : > { %v2396_v38 = vadd.f32 %v2395_v17, %v2306_v0  ;;  %2498 = vmatmul.bf16.gmra.mxu1 %v1836_v60  ;;  %v6310_v33 = vsub.f32 %v6308_v46, %v6309_v41  ;;  %v1219_v58 = vmul.f32 1.442695, %v1156_v56  ;;  %v3927_v47 = vpop.eup %3926  ;;  %v1140_v17 = vsub.f32 %v6311_v42, %v6251_v13  ;;  %v6313_v60 = vld [vmem:[#allocation55_spill] sm:$0xff]  ;;  %v6315_v46 = vld [vmem:[#allocation64_spill] sm:$0xff] }
 0x374   : > { %v5328_v20 = vpop.permute.xlu2 %1343  ;;  %3938 = vpow2.f32 %v1725_v23  ;;  %v3929_v8 = vpop.eup %3928  ;;  %v6314_v0 = vsub.f32 %v6312_v55, %v6313_v60  ;;  %v1143_v23 = vsub.f32 %v4938_v37, %v4941_v7  ;;  %v1136_v41 = vsub.f32 %v6315_v46, %v4791_v15  ;;  %v6316_v42 = vld [vmem:[#allocation67_spill] sm:$0xff]  ;;  %v6321_v55 = vld [vmem:[#allocation61_spill] sm:$0xff] }
 0x375   : > { %v5330_v53 = vadd.f32 %v2484_v25, %v2396_v38  ;;  %v1167_v49 = vmul.f32 1.442695, %v6310_v33  ;;  %v2397_v21 = vpop.f32.mrf.mxu0  ;;  %3940 = vpow2.f32 %v1727_v22  ;;  %v3931_v63 = vpop.eup %3930  ;;  %v1187_v11 = vmul.f32 1.442695, %v1140_v17 }
 0x376   : > { %v3933_v29 = vpop.eup %3932  ;;  %v1173_v61 = vmul.f32 1.442695, %v6314_v0  ;;  %v1193_v15 = vmul.f32 1.442695, %v1143_v23  ;;  %v1139_v17 = vsub.f32 %v6316_v42, %v4836_v57  ;;  %v6320_v57 = vld [vmem:[#allocation60_spill] sm:$0xff]  ;;  %v6322_v0 = vld [vmem:[#allocation62_spill] sm:$0xff] }
 0x377   : > { %1940 = vperm.xlu0 %3797, %v3925_v24   ;;  %v2486_v34 = vpop.f32.mrf.mxu1  ;;  %3942 = vpow2.f32 %v1167_v49  ;;  %v3935_v45 = vpop.eup %3934 }
 0x378   : > { %3944 = vpow2.f32 %v1219_v58  ;;  %v3937_v25 = vpop.eup %3936 }
 0x379   : > { %1905 = vperm.xlu1 %3798, %v3927_v47   ;;  %3946 = vpow2.f32 %v1187_v11  ;;  %v1837_v24 = vpack.c.bf16 %v3937_v25, %v3931_v63  ;;  %v1179_v47 = vmul.f32 1.442695, %v1136_v41  ;;  %v6317_v63 = vld [vmem:[#allocation51_spill] sm:$0xff] }
 0x37a   : > { %v2308_v48 = vpop.f32.mrf.mxu3  ;;  %v3939_v32 = vpop.eup %3938  ;;  %3948 = vpow2.f32 %v1173_v61 }
 0x37b   : > { %v2398_v13 = vadd.f32 %v2397_v21, %v2308_v48  ;;  %v3941_v56 = vpop.eup %3940  ;;  %v1838_v49 = vpack.c.bf16 %v3939_v32, %v3933_v29  ;;  %v1435_v48 = vsub.f32 %v6317_v63, %v5301_v43  ;;  %v6318_v29 = vld [vmem:[#allocation52_spill] sm:$0xff]  ;;  %3950 = vpow2.f32 %v1193_v15 }
 0x37c   : > { %v5351_v1 = vpop.permute.xlu2 %1358  ;;  %v1839_v58 = vpack.c.bf16 %v3941_v56, %v3935_v45  ;;  %v6319_v45 = vld [vmem:[#allocation53_spill] sm:$0xff]  ;;  %3952 = vpow2.f32 %v1179_v47 }
 0x37d   : > { %v5355_v59 = vadd.f32 %v2486_v34, %v2398_v13  ;;  %v3943_v38 = vpop.eup %3942  ;;  %v5372_v33 = vpop.f32.mrf.mxu0  ;;  %v1146_v34 = vsub.f32 %v4951_v14, %v4965_v10  ;;  %v1436_v13 = vsub.f32 %v6318_v29, %v5301_v43  ;;  %v1437_v11 = vsub.f32 %v6319_v45, %v5301_v43  ;;  %v1862_v47 = vld [vmem:[#allocation3 + $0x8] sm:$0xff] }
 0x37e   : > { %v3945_v22 = vpop.eup %3944  ;;  %v1185_v10 = vmul.f32 1.442695, %v1139_v17  ;;  %v1324_v45 = vpop.permute.xlu0 %1323 }
 0x37f   : > { %1955 = vperm.xlu0 %3797, %v3929_v8   ;;  %2050 = vperm.xlu2 %3796, %v3945_v22   ;;  %v5380_v7 = vpop.f32.mrf.mxu1  ;;  %v3947_v8 = vpop.eup %3946  ;;  %v1199_v23 = vmul.f32 1.442695, %v1146_v34 }
 0x380   : > { %v3949_v14 = vpop.eup %3948  ;;  %3954 = vpow2.f32 %v1185_v10  ;;  %v6325_v10 = vld [vmem:[#allocation71_spill] sm:$0xff] }
 0x381   : > { %1920 = vperm.xlu1 %3798, %v3943_v38   ;;  %v3951_v29 = vpop.eup %3950  ;;  %3956 = vpow2.f32 %v1199_v23  ;;  %v1142_v23 = vsub.f32 %v4926_v30, %v4931_v50 }
 0x382   : > { %2325 = vmatmul.bf16.gmra.mxu3 %v1837_v24  ;;  %v5376_v37 = vpop.f32.mrf.mxu3  ;;  %2414 = vmatmul.bf16.gmra.mxu0 %v1838_v49  ;;  %v2378_v24 = vadd.f32 %v5147_v9, %v5149_v31 }
 0x383   : > { %2503 = vmatmul.bf16.gmra.mxu1 %v1839_v58 }
 0x384   : > { %v5384_v21 = vpop.permute.xlu2 %1373 }
 0x385   : > { %v2402_v46 = vpop.f32.mrf.mxu0 }
 0x386   : > { %v1319_v25 = vpop.permute.xlu1 %1318 }
 0x387   : > { %v1438_v32 = vsub.f32 %v6320_v57, %v1319_v25  ;;  %v1439_v60 = vsub.f32 %v6321_v55, %v1319_v25  ;;  %v1440_v61 = vsub.f32 %v6322_v0, %v1319_v25  ;;  %1970 = vperm.xlu0 %3797, %v3947_v8   ;;  %v2491_v9 = vpop.f32.mrf.mxu1  ;;  %v2467_v57 = vadd.f32 %v5152_v35, %v2378_v24  ;;  %v3953_v0 = vpop.eup %3952  ;;  %v6327_v24 = vld [vmem:[#allocation72_spill] sm:$0xff] }
 0x388   : > { %v2386_v35 = vadd.f32 %v5225_v26, %v5227_v3 }
 0x389   : > { %v1504_v43 = vpack.c.bf16 %v1438_v32, %v1435_v48  ;;  %v1505_v56 = vpack.c.bf16 %v1439_v60, %v1436_v13  ;;  %v1506_v38 = vpack.c.bf16 %v1440_v61, %v1437_v11  ;;  %1935 = vperm.xlu1 %3798, %v3949_v14   ;;  %v1149_v13 = vsub.f32 %v5029_v19, %v5046_v51  ;;  %v6323_v32 = vld [vmem:[#allocation56_spill] sm:$0xff]  ;;  %v6324_v61 = vld [vmem:[#allocation57_spill] sm:$0xff] }
 0x38a   : > { %v2313_v22 = vpop.f32.mrf.mxu3  ;;  %v1444_v55 = vsub.f32 %v6323_v32, %v5318_v16  ;;  %v1445_v14 = vsub.f32 %v6324_v61, %v5318_v16 }
 0x38b   : > { %v1579_v41 = vunpack.c.l.bf16 %v1504_v43  ;;  %v1580_v49 = vunpack.c.l.bf16 %v1505_v56  ;;  %v1581_v58 = vunpack.c.l.bf16 %v1506_v38  ;;  %v1582_v15 = vunpack.c.h.bf16 %v1504_v43 }
 0x38c   : > { %v1583_v42 = vunpack.c.h.bf16 %v1505_v56  ;;  %v1584_v17 = vunpack.c.h.bf16 %v1506_v38  ;;  %v2403_v8 = vadd.f32 %v2402_v46, %v2313_v22  ;;  %v1901_v34 = vpop.permute.xlu2 %1900  ;;  %v1441_v43 = vsub.f32 %v6325_v10, %v1324_v45  ;;  %v6326_v56 = vld [vmem:[#allocation58_spill] sm:$0xff]  ;;  %v1865_v46 = vld [vmem:[#allocation3 + $0x20] sm:$0xff] }
 0x38d   : > { %v1729_v31 = vmul.f32 1.442695, %v1579_v41  ;;  %v1731_v63 = vmul.f32 1.442695, %v1580_v49  ;;  %v1733_v48 = vmul.f32 1.442695, %v1581_v58  ;;  %v2054_v51 = vmul.f32 %v1901_v34, %v1862_v47  ;;  %v3955_v41 = vpop.eup %3954 }
 0x38e   : > { %v1735_v11 = vmul.f32 1.442695, %v1582_v15  ;;  %v5419_v25 = vadd.f32 %v2491_v9, %v2403_v8  ;;  %v1737_v60 = vmul.f32 1.442695, %v1583_v42  ;;  %v1739_v19 = vmul.f32 1.442695, %v1584_v17 }
 0x38f   : > { %3958 = vpow2.f32 %v1729_v31  ;;  %1985 = vperm.xlu0 %3797, %v3951_v29   ;;  %v1446_v38 = vsub.f32 %v6326_v56, %v5318_v16  ;;  %v1442_v22 = vsub.f32 %v6327_v24, %v1324_v45  ;;  %v6328_v49 = vld [vmem:[#allocation75_spill] sm:$0xff]  ;;  %v1507_v26 = vpack.c.bf16 %v1444_v55, %v1441_v43  ;;  %v3957_v16 = vpop.eup %3956  ;;  %v1339_v43 = vpop.permute.xlu0 %1338 }
 0x390   : > { %3960 = vpow2.f32 %v1731_v63  ;;  %v1443_v3 = vsub.f32 %v6328_v49, %v1324_v45  ;;  %v2545_v58 = vadd.f32 %v2467_v57, %v2054_v51  ;;  %v1205_v42 = vmul.f32 1.442695, %v1149_v13 }
 0x391   : > { %3962 = vpow2.f32 %v1733_v48  ;;  %1950 = vperm.xlu1 %3798, %v3953_v0   ;;  %v1508_v15 = vpack.c.bf16 %v1445_v14, %v1442_v22  ;;  %v2475_v17 = vadd.f32 %v5232_v44, %v2386_v35  ;;  %v1191_v9 = vmul.f32 1.442695, %v1142_v23  ;;  %v1334_v14 = vpop.permute.xlu1 %1333  ;;  %v1868_v22 = vld [vmem:[#allocation3 + $0x38] sm:$0xff] }
 0x392   : > { %3964 = vpow2.f32 %v1735_v11  ;;  %v1509_v8 = vpack.c.bf16 %v1446_v38, %v1443_v3  ;;  %2577 = vst.msk [vmem:[#allocation3 + $0x8] sm:$0xff] %vm328_vm2, %v2545_v58  ;;  %v1152_v31 = vsub.f32 %v5106_v18, %v5112_v62  ;;  %v1585_v48 = vunpack.c.l.bf16 %v1507_v26 }
 0x393   : > { %3966 = vpow2.f32 %v1737_v60  ;;  %v1586_v13 = vunpack.c.l.bf16 %v1508_v15  ;;  %v6329_v11 = vsub.f32 %v5027_v40, %v5032_v27  ;;  %v1588_v55 = vunpack.c.h.bf16 %v1507_v26 }
 0x394   : > { %3968 = vpow2.f32 %v1739_v19  ;;  %v1916_v30 = vpop.permute.xlu2 %1915  ;;  %v1587_v32 = vunpack.c.l.bf16 %v1509_v8  ;;  %v1211_v62 = vmul.f32 1.442695, %v1152_v31  ;;  %v1589_v60 = vunpack.c.h.bf16 %v1508_v15  ;;  %v6333_v31 = vld [vmem:[#allocation93_spill] sm:$0xff] }
 0x395   : > { %v3959_v50 = vpop.eup %3958  ;;  %v2057_v47 = vmul.f32 %v1916_v30, %v1865_v46  ;;  %v1197_v57 = vmul.f32 1.442695, %v6329_v11  ;;  %3970 = vpow2.f32 %v1205_v42  ;;  %v1741_v28 = vmul.f32 1.442695, %v1585_v48 }
 0x396   : > { %v3961_v34 = vpop.eup %3960  ;;  %3972 = vpow2.f32 %v1191_v9  ;;  %v1590_v0 = vunpack.c.h.bf16 %v1509_v8  ;;  %v1743_v61 = vmul.f32 1.442695, %v1586_v13  ;;  %v1745_v35 = vmul.f32 1.442695, %v1587_v32 }
 0x397   : > { %v3963_v63 = vpop.eup %3962  ;;  %v2548_v29 = vadd.f32 %v2475_v17, %v2057_v47  ;;  %2000 = vperm.xlu0 %3797, %v3957_v16   ;;  %3974 = vpow2.f32 %v1197_v57  ;;  %v2393_v10 = vadd.f32 %v5303_v4, %v5314_v5  ;;  %v1747_v56 = vmul.f32 1.442695, %v1588_v55  ;;  %v1871_v16 = vld [vmem:[#allocation3 + $0x50] sm:$0xff]  ;;  %v6331_v17 = vld [vmem:[#allocation11_spill] sm:$0xff]  ;;  %v6337_v55 = vld [vmem:[#allocation13_spill] sm:$0xff] }
 0x398   : > { %v3965_v44 = vpop.eup %3964  ;;  %3976 = vpow2.f32 %v1211_v62  ;;  %v1749_v23 = vmul.f32 1.442695, %v1589_v60  ;;  %v1447_v24 = vsub.f32 %v4907_v2, %v1334_v14  ;;  %v1448_v49 = vsub.f32 %v4911_v6, %v1334_v14  ;;  %v6336_v62 = vld [vmem:[#allocation12_spill] sm:$0xff] }
 0x399   : > { %v3967_v45 = vpop.eup %3966  ;;  %2580 = vst.msk [vmem:[#allocation3 + $0x20] sm:$0xff] %vm328_vm2, %v2548_v29  ;;  %1965 = vperm.xlu1 %3798, %v3955_v41   ;;  %v1840_v19 = vpack.c.bf16 %v3965_v44, %v3959_v50  ;;  %3978 = vpow2.f32 %v1741_v28  ;;  %v1751_v41 = vmul.f32 1.442695, %v1590_v0  ;;  %v1450_v3 = vsub.f32 %v4955_v12, %v1339_v43 }
 0x39a   : > { %v3969_v18 = vpop.eup %3968  ;;  %v1841_v40 = vpack.c.bf16 %v3967_v45, %v3961_v34  ;;  %3980 = vpow2.f32 %v1743_v61  ;;  %v2401_v4 = vadd.f32 %v5372_v33, %v5376_v37  ;;  %v1449_v5 = vsub.f32 %v4915_v36, %v1334_v14 }
 0x39b   : > { %v1842_v27 = vpack.c.bf16 %v3969_v18, %v3963_v63  ;;  %2330 = vmatmul.bf16.gmra.mxu3 %v1840_v19  ;;  %v3971_v38 = vpop.eup %3970  ;;  %3982 = vpow2.f32 %v1745_v35  ;;  %v2482_v2 = vadd.f32 %v5311_v54, %v2393_v10  ;;  %v1451_v26 = vsub.f32 %v4969_v39, %v1339_v43  ;;  %v6330_v54 = vld [vmem:[#allocation10_spill] sm:$0xff]  ;;  %v1349_v35 = vpop.permute.xlu1 %1348 }
 0x39c   : > { %v1931_v51 = vpop.permute.xlu2 %1930  ;;  %2419 = vmatmul.bf16.gmra.mxu0 %v1841_v40  ;;  %v3973_v46 = vpop.eup %3972  ;;  %3984 = vpow2.f32 %v1747_v56  ;;  %v1452_v6 = vsub.f32 %v4978_v52, %v1339_v43  ;;  %v1510_v30 = vpack.c.bf16 %v1450_v3, %v1447_v24  ;;  %v4149_v37 = vmov 3   ;;  %v6334_v63 = vld [vmem:[#allocation94_spill] sm:$0xff]  ;;  %v6339_v24 = vld [vmem:[#allocation80_spill] sm:$0xff] }
 0x39d   : > { %2508 = vmatmul.bf16.gmra.mxu1 %v1842_v27  ;;  %v2060_v58 = vmul.f32 %v1931_v51, %v1868_v22  ;;  %v3975_v15 = vpop.eup %3974  ;;  %3986 = vpow2.f32 %v1749_v23  ;;  %v1511_v50 = vpack.c.bf16 %v1451_v26, %v1448_v49  ;;  %3801 = vset.pattern.permute.xlu2 %v4149_v37  ;;  %v6332_v39 = vsub.f32 %v6330_v54, %v6331_v17  ;;  %v6340_v49 = vld [vmem:[#allocation81_spill] sm:$0xff] }
 0x39e   : > { %v3977_v12 = vpop.eup %3976  ;;  %3988 = vpow2.f32 %v1751_v41  ;;  %v2490_v47 = vadd.f32 %v5380_v7, %v2401_v4  ;;  %v1512_v34 = vpack.c.bf16 %v1452_v6, %v1449_v5  ;;  %v6335_v48 = vsub.f32 %v6333_v31, %v6334_v63  ;;  %v6341_v4 = vld [vmem:[#allocation73_spill] sm:$0xff]  ;;  %v6344_v6 = vld [vmem:[#allocation76_spill] sm:$0xff] }
 0x39f   : > { %2015 = vperm.xlu0 %3797, %v3971_v38   ;;  %v2551_v42 = vadd.f32 %v2482_v2, %v2060_v58  ;;  %v3979_v36 = vpop.eup %3978  ;;  %v1217_v8 = vmul.f32 1.442695, %v6332_v39  ;;  %v1591_v13 = vunpack.c.l.bf16 %v1510_v30  ;;  %v1592_v57 = vunpack.c.l.bf16 %v1511_v50  ;;  %v6342_v2 = vld [vmem:[#allocation82_spill] sm:$0xff] }
 0x3a0   : > { %v3981_v52 = vpop.eup %3980  ;;  %v1203_v29 = vmul.f32 1.442695, %v6335_v48  ;;  %v1593_v18 = vunpack.c.l.bf16 %v1512_v34  ;;  %v6338_v60 = vsub.f32 %v6336_v62, %v6337_v55  ;;  %v1594_v0 = vunpack.c.h.bf16 %v1510_v30  ;;  %v5500_v48 = vld [vmem:[#allocation3 + $0x8] sm:$0xff]  ;;  %v1354_v55 = vpop.permute.xlu0 %1353 }
 0x3a1   : > { %1980 = vperm.xlu1 %3798, %v3973_v46   ;;  %2583 = vst.msk [vmem:[#allocation3 + $0x38] sm:$0xff] %vm328_vm2, %v2551_v42  ;;  %v3983_v44 = vpop.eup %3982  ;;  %3990 = vpow2.f32 %v1217_v8  ;;  %v1595_v61 = vunpack.c.h.bf16 %v1511_v50  ;;  %v1753_v14 = vmul.f32 1.442695, %v1591_v13  ;;  %v1596_v19 = vunpack.c.h.bf16 %v1512_v34  ;;  %v6345_v8 = vld [vmem:[#allocation22_spill] sm:$0xff] }
 0x3a2   : > { %v3985_v11 = vpop.eup %3984  ;;  %3992 = vpow2.f32 %v1203_v29  ;;  %v1209_v28 = vmul.f32 1.442695, %v6338_v60  ;;  %v1755_v51 = vmul.f32 1.442695, %v1592_v57  ;;  %v1757_v27 = vmul.f32 1.442695, %v1593_v18 }
 0x3a3   : > { %v3987_v32 = vpop.eup %3986  ;;  %v1843_v40 = vpack.c.bf16 %v3985_v11, %v3979_v36  ;;  %v1759_v56 = vmul.f32 1.442695, %v1594_v0  ;;  %v1761_v23 = vmul.f32 1.442695, %v1595_v61  ;;  %v1456_v22 = vsub.f32 %v6339_v24, %v1349_v35  ;;  %v1874_v18 = vld [vmem:[#allocation3 + $0x68] sm:$0xff]  ;;  %v6349_v24 = vld [vmem:[#allocation87_spill] sm:$0xff] }
 0x3a4   : > { %v1946_v33 = vpop.permute.xlu2 %1945  ;;  %v3989_v7 = vpop.eup %3988  ;;  %v1844_v10 = vpack.c.bf16 %v3987_v32, %v3981_v52  ;;  %3994 = vpow2.f32 %v1209_v28  ;;  %v1763_v41 = vmul.f32 1.442695, %v1596_v19  ;;  %v1457_v3 = vsub.f32 %v6340_v49, %v1349_v35  ;;  %v6350_v49 = vld [vmem:[#allocation77_spill] sm:$0xff] }
 0x3a5   : > { %v2063_v9 = vmul.f32 %v1946_v33, %v1871_v16  ;;  %v1845_v43 = vpack.c.bf16 %v3989_v7, %v3983_v44  ;;  %3996 = vpow2.f32 %v1753_v14  ;;  %v1453_v5 = vsub.f32 %v6341_v4, %v5328_v20  ;;  %v6343_v16 = vld [vmem:[#allocation74_spill] sm:$0xff]  ;;  %v6351_v4 = vld [vmem:[#allocation88_spill] sm:$0xff] }
 0x3a6   : > { %3998 = vpow2.f32 %v1755_v51  ;;  %v1458_v26 = vsub.f32 %v6342_v2, %v1349_v35  ;;  %v1455_v30 = vsub.f32 %v6344_v6, %v5328_v20  ;;  %v6352_v2 = vld [vmem:[#allocation78_spill] sm:$0xff] }
 0x3a7   : > { %v2554_v45 = vadd.f32 %v2490_v47, %v2063_v9  ;;  %2030 = vperm.xlu0 %3797, %v3977_v12   ;;  %v3991_v38 = vpop.eup %3990  ;;  %4000 = vpow2.f32 %v1757_v27  ;;  %v1513_v12 = vpack.c.bf16 %v1456_v22, %v1453_v5  ;;  %v6346_v47 = vld [vmem:[#allocation23_spill] sm:$0xff]  ;;  %v1460_v22 = vsub.f32 %v6349_v24, %v1354_v55  ;;  %v6360_v24 = vld [vmem:[#allocation92_spill] sm:$0xff] }
 0x3a8   : > { %v3993_v46 = vpop.eup %3992  ;;  %4002 = vpow2.f32 %v1759_v56  ;;  %v1515_v17 = vpack.c.bf16 %v1458_v26, %v1455_v30  ;;  %v6347_v34 = vsub.f32 %v6345_v8, %v6346_v47  ;;  %v1461_v5 = vsub.f32 %v6351_v4, %v1354_v55 }
 0x3a9   : > { %2586 = vst.msk [vmem:[#allocation3 + $0x50] sm:$0xff] %vm328_vm2, %v2554_v45  ;;  %1995 = vperm.xlu1 %3798, %v3975_v15   ;;  %v1454_v15 = vsub.f32 %v6343_v16, %v5328_v20  ;;  %4004 = vpow2.f32 %v1761_v23  ;;  %v1597_v31 = vunpack.c.l.bf16 %v1513_v12  ;;  %v1600_v45 = vunpack.c.h.bf16 %v1513_v12  ;;  %v6353_v16 = vld [vmem:[#allocation79_spill] sm:$0xff] }
 0x3aa   : > { %v3995_v33 = vpop.eup %3994  ;;  %4006 = vpow2.f32 %v1763_v41  ;;  %v1215_v9 = vmul.f32 1.442695, %v6347_v34  ;;  %v1599_v44 = vunpack.c.l.bf16 %v1515_v17  ;;  %v1602_v60 = vunpack.c.h.bf16 %v1515_v17 }
 0x3ab   : > { %2335 = vmatmul.bf16.gmra.mxu3 %v1843_v40  ;;  %v1514_v36 = vpack.c.bf16 %v1457_v3, %v1454_v15  ;;  %v3997_v54 = vpop.eup %3996  ;;  %v1765_v32 = vmul.f32 1.442695, %v1597_v31  ;;  %v1771_v40 = vmul.f32 1.442695, %v1600_v45  ;;  %v1462_v3 = vsub.f32 %v6350_v49, %v5351_v1  ;;  %v1364_v45 = vpop.permute.xlu1 %1363  ;;  %v6361_v49 = vld [vmem:[#allocation14_spill] sm:$0xff] }
 0x3ac   : > { %2424 = vmatmul.bf16.gmra.mxu0 %v1844_v10  ;;  %v3999_v39 = vpop.eup %3998  ;;  %4008 = vpow2.f32 %v1215_v9  ;;  %v1961_v11 = vpop.permute.xlu2 %1960  ;;  %v1769_v14 = vmul.f32 1.442695, %v1599_v44  ;;  %v1463_v26 = vsub.f32 %v6352_v2, %v5351_v1  ;;  %v1464_v15 = vsub.f32 %v6353_v16, %v5351_v1  ;;  %v1864_v16 = vld [vmem:[#allocation3 + $0x18] sm:$0xff] }
 0x3ad   : > { %2513 = vmatmul.bf16.gmra.mxu1 %v1845_v43  ;;  %v4001_v52 = vpop.eup %4000  ;;  %v1598_v20 = vunpack.c.l.bf16 %v1514_v36  ;;  %v1601_v57 = vunpack.c.h.bf16 %v1514_v36  ;;  %v2066_v27 = vmul.f32 %v1961_v11, %v1874_v18  ;;  %v6348_v43 = vld [vmem:[#allocation86_spill] sm:$0xff]  ;;  %4010 = vpow2.f32 %v1765_v32  ;;  %v6354_v18 = vld [vmem:[#allocation4_spill] sm:$0xff] }
 0x3ae   : > { %v5486_v58 = vpop.f32.mrf.mxu0  ;;  %v4003_v63 = vpop.eup %4002  ;;  %v1459_v56 = vsub.f32 %v6348_v43, %v1354_v55  ;;  %v1517_v30 = vpack.c.bf16 %v1463_v26, %v1460_v22 }
 0x3af   : > { %2045 = vperm.xlu0 %3797, %v3991_v38   ;;  %v5492_v50 = vpop.f32.mrf.mxu1  ;;  %v4005_v29 = vpop.eup %4004  ;;  %v1767_v28 = vmul.f32 1.442695, %v1598_v20  ;;  %v1846_v61 = vpack.c.bf16 %v4003_v63, %v3997_v54  ;;  %v1773_v38 = vmul.f32 1.442695, %v1601_v57 }
 0x3b0   : > { %v4007_v13 = vpop.eup %4006  ;;  %v1847_v51 = vpack.c.bf16 %v4005_v29, %v3999_v39  ;;  %v1516_v6 = vpack.c.bf16 %v1462_v3, %v1459_v56  ;;  %v1604_v8 = vunpack.c.l.bf16 %v1517_v30  ;;  %v1607_v63 = vunpack.c.h.bf16 %v1517_v30  ;;  %v6362_v3 = vld [vmem:[#allocation15_spill] sm:$0xff] }
 0x3b1   : > { %2010 = vperm.xlu1 %3798, %v3993_v46   ;;  %v1848_v35 = vpack.c.bf16 %v4007_v13, %v4001_v52  ;;  %4012 = vpow2.f32 %v1767_v28  ;;  %v1775_v46 = vmul.f32 1.442695, %v1602_v60  ;;  %v1861_v60 = vld [vmem:[#allocation3] sm:$0xff]  ;;  %v2383_v4 = vadd.f32 %v6362_v3, %v6361_v49 }
 0x3b2   : > { %v4009_v23 = vpop.eup %4008  ;;  %4014 = vpow2.f32 %v1769_v14  ;;  %v1603_v17 = vunpack.c.l.bf16 %v1516_v6  ;;  %v1606_v31 = vunpack.c.h.bf16 %v1516_v6  ;;  %v1779_v29 = vmul.f32 1.442695, %v1604_v8  ;;  %v6357_v14 = vld [vmem:[#allocation96_spill] sm:$0xff] }
 0x3b3   : > { %v5494_v42 = vpop.f32.mrf.mxu3  ;;  %4016 = vpow2.f32 %v1771_v40  ;;  %v4011_v12 = vpop.eup %4010 }
 0x3b4   : > { %4018 = vpow2.f32 %v1773_v38  ;;  %v1777_v1 = vmul.f32 1.442695, %v1603_v17  ;;  %v1783_v32 = vmul.f32 1.442695, %v1606_v31 }
 0x3b5   : > { %4020 = vpow2.f32 %v1775_v46 }
 0x3b6   : > { %v2407_v7 = vpop.f32.mrf.mxu0  ;;  %4022 = vpow2.f32 %v1777_v1 }
 0x3b7   : > { %3800 = vset.pattern.permute.xlu0 %v4149_v37  ;;  %v2496_v19 = vpop.f32.mrf.mxu1  ;;  %v4013_v36 = vpop.eup %4012  ;;  %4024 = vpow2.f32 %v1779_v29 }
 0x3b8   : > { %2679 = vperm.xlu0 %3800, %v5500_v48   ;;  %v4015_v54 = vpop.eup %4014 }
 0x3b9   : > { %2025 = vperm.xlu1 %3798, %v3995_v33   ;;  %v1518_v33 = vpack.c.bf16 %v1464_v15, %v1461_v5  ;;  %v4017_v39 = vpop.eup %4016 }
 0x3ba   : > { %v4019_v47 = vpop.eup %4018  ;;  %v1849_v44 = vpack.c.bf16 %v4017_v39, %v4011_v12 }
 0x3bb   : > { %v2318_v62 = vpop.f32.mrf.mxu3  ;;  %2340 = vmatmul.bf16.gmra.mxu3 %v1846_v61  ;;  %v1605_v34 = vunpack.c.l.bf16 %v1518_v33  ;;  %v4021_v52 = vpop.eup %4020  ;;  %v1608_v20 = vunpack.c.h.bf16 %v1518_v33  ;;  %v1850_v11 = vpack.c.bf16 %v4019_v47, %v4013_v36 }
 0x3bc   : > { %v2408_v0 = vadd.f32 %v2407_v7, %v2318_v62  ;;  %2429 = vmatmul.bf16.gmra.mxu0 %v1847_v51  ;;  %v1851_v57 = vpack.c.bf16 %v4021_v52, %v4015_v54  ;;  %v1785_v62 = vmul.f32 1.442695, %v1607_v63  ;;  %v6358_v51 = vld [vmem:[#allocation90_spill] sm:$0xff]  ;;  %v4023_v46 = vpop.eup %4022  ;;  %v6363_v54 = vld [vmem:[#allocation16_spill] sm:$0xff] }
 0x3bd   : > { %2518 = vmatmul.bf16.gmra.mxu1 %v1848_v35  ;;  %v1781_v13 = vmul.f32 1.442695, %v1605_v34  ;;  %v1787_v28 = vmul.f32 1.442695, %v1608_v20  ;;  %v1466_v35 = vsub.f32 %v6358_v51, %v1364_v45  ;;  %v2472_v17 = vadd.f32 %v6363_v54, %v2383_v4 }
 0x3be   : > { %v2497_v10 = vadd.f32 %v2496_v19, %v2408_v0  ;;  %v6356_v0 = vld [vmem:[#allocation89_spill] sm:$0xff] }
 0x3bf   : > { %v1465_v61 = vsub.f32 %v6356_v0, %v1364_v45  ;;  %4026 = vpow2.f32 %v1781_v13 }
 0x3c0   : > { %v2557_v41 = vadd.f32 %v2497_v10, %v2066_v27  ;;  %4028 = vpow2.f32 %v1783_v32  ;;  %v6359_v27 = vld [vmem:[#allocation91_spill] sm:$0xff] }
 0x3c1   : > { %2040 = vperm.xlu1 %3798, %v4009_v23   ;;  %v1467_v10 = vsub.f32 %v6359_v27, %v1364_v45  ;;  %4030 = vpow2.f32 %v1785_v62  ;;  %v6365_v62 = vld [vmem:[#allocation84_spill] sm:$0xff]  ;;  %v6370_v27 = vld [vmem:[#allocation9_spill] sm:$0xff] }
 0x3c2   : > { %2589 = vst.msk [vmem:[#allocation3 + $0x68] sm:$0xff] %vm328_vm2, %v2557_v41  ;;  %4032 = vpow2.f32 %v1787_v28  ;;  %v4025_v41 = vpop.eup %4024 }
 0x3c5   : > { %v4027_v2 = vpop.eup %4026 }
 0x3c6   : > { %v4029_v15 = vpop.eup %4028 }
 0x3c7   : > { %v4031_v30 = vpop.eup %4030  ;;  %v1852_v31 = vpack.c.bf16 %v4029_v15, %v4023_v46  ;;  %v1870_v46 = vld [vmem:[#allocation3 + $0x48] sm:$0xff] }
 0x3c8   : > { %v4033_v36 = vpop.eup %4032  ;;  %v1853_v20 = vpack.c.bf16 %v4031_v30, %v4025_v41 }
 0x3c9   : > { %v1369_v9 = vpop.permute.xlu0 %1368  ;;  %3799 = vset.pattern.permute.xlu1 %v4149_v37  ;;  %v6355_v37 = vld [vmem:[#allocation95_spill] sm:$0xff]  ;;  %v1854_v29 = vpack.c.bf16 %v4033_v36, %v4027_v2 }
 0x3ca   : > { %v1468_v7 = vsub.f32 %v6354_v18, %v1369_v9  ;;  %v1469_v55 = vsub.f32 %v6355_v37, %v1369_v9  ;;  %v1470_v19 = vsub.f32 %v6357_v14, %v1369_v9  ;;  %v6364_v18 = vld [vmem:[#allocation83_spill] sm:$0xff]  ;;  %v1472_v37 = vsub.f32 %v6365_v62, %v5384_v21 }
 0x3cb   : > { %2345 = vmatmul.bf16.gmra.mxu3 %v1849_v44 }
 0x3cc   : > { %2434 = vmatmul.bf16.gmra.mxu0 %v1850_v11  ;;  %v1519_v43 = vpack.c.bf16 %v1468_v7, %v1465_v61  ;;  %v1520_v38 = vpack.c.bf16 %v1469_v55, %v1466_v35  ;;  %v1521_v23 = vpack.c.bf16 %v1470_v19, %v1467_v10  ;;  %v1867_v11 = vld [vmem:[#allocation3 + $0x30] sm:$0xff]  ;;  %v1471_v7 = vsub.f32 %v6364_v18, %v5384_v21  ;;  %v6366_v55 = vld [vmem:[#allocation85_spill] sm:$0xff]  ;;  %v6368_v19 = vld [vmem:[#allocation7_spill] sm:$0xff] }
 0x3cd   : > { %2523 = vmatmul.bf16.gmra.mxu1 %v1851_v57  ;;  %v6367_v61 = vld [vmem:[#allocation21_spill] sm:$0xff]  ;;  %v6369_v35 = vld [vmem:[#allocation8_spill] sm:$0xff] }
 0x3ce   : > { %v1609_v5 = vunpack.c.l.bf16 %v1519_v43  ;;  %v1610_v26 = vunpack.c.l.bf16 %v1520_v38  ;;  %v1611_v6 = vunpack.c.l.bf16 %v1521_v23  ;;  %v1612_v12 = vunpack.c.h.bf16 %v1519_v43 }
 0x3cf   : > { %v1613_v39 = vunpack.c.h.bf16 %v1520_v38  ;;  %v1614_v34 = vunpack.c.h.bf16 %v1521_v23 }
 0x3d0   : > { %v1789_v8 = vmul.f32 1.442695, %v1609_v5  ;;  %v1791_v9 = vmul.f32 1.442695, %v1610_v26  ;;  %v1793_v52 = vmul.f32 1.442695, %v1611_v6 }
 0x3d1   : > { %v1896_v40 = vpop.permute.xlu0 %1895  ;;  %v1795_v1 = vmul.f32 1.442695, %v1612_v12  ;;  %v1797_v13 = vmul.f32 1.442695, %v1613_v39  ;;  %v1799_v45 = vmul.f32 1.442695, %v1614_v34 }
 0x3d2   : > { %v2053_v56 = vmul.f32 %v1896_v40, %v1861_v60  ;;  %4034 = vpow2.f32 %v1789_v8  ;;  %v1473_v60 = vsub.f32 %v6366_v55, %v5384_v21  ;;  %v1863_v26 = vld [vmem:[#allocation3 + $0x10] sm:$0xff] }
 0x3d3   : > { %4036 = vpow2.f32 %v1791_v9 }
 0x3d4   : > { %v2544_v22 = vadd.f32 %v6360_v24, %v2053_v56  ;;  %4038 = vpow2.f32 %v1793_v52  ;;  %v2406_v52 = vadd.f32 %v5486_v58, %v5494_v42 }
 0x3d5   : > { %4040 = vpow2.f32 %v1795_v1 }
 0x3d6   : > { %2576 = vst.msk [vmem:[#allocation3] sm:$0xff] %vm328_vm2, %v2544_v22  ;;  %4042 = vpow2.f32 %v1797_v13  ;;  %v6373_v13 = vld [vmem:[#allocation17_spill] sm:$0xff] }
 0x3d7   : > { %4044 = vpow2.f32 %v1799_v45 }
 0x3d8   : > { %v4035_v0 = vpop.eup %4034 }
 0x3d9   : > { %v1911_v33 = vpop.permute.xlu0 %1910  ;;  %v4037_v43 = vpop.eup %4036 }
 0x3da   : > { %v2056_v47 = vmul.f32 %v1911_v33, %v1864_v16  ;;  %v4039_v38 = vpop.eup %4038 }
 0x3db   : > { %2350 = vmatmul.bf16.gmra.mxu3 %v1852_v31  ;;  %v4041_v22 = vpop.eup %4040 }
 0x3dc   : > { %v2547_v63 = vadd.f32 %v2472_v17, %v2056_v47  ;;  %2439 = vmatmul.bf16.gmra.mxu0 %v1853_v20  ;;  %v4043_v41 = vpop.eup %4042  ;;  %v1855_v12 = vpack.c.bf16 %v4041_v22, %v4035_v0 }
 0x3dd   : > { %v5525_v44 = vld [vmem:[#allocation3] sm:$0xff]  ;;  %2528 = vmatmul.bf16.gmra.mxu1 %v1854_v29  ;;  %v4045_v4 = vpop.eup %4044  ;;  %v1856_v47 = vpack.c.bf16 %v4043_v41, %v4037_v43  ;;  %v6372_v29 = vld [vmem:[#allocation5_spill] sm:$0xff] }
 0x3de   : > { %2579 = vst.msk [vmem:[#allocation3 + $0x18] sm:$0xff] %vm328_vm2, %v2547_v63  ;;  %2674 = vperm.xlu1 %3799, %v5525_v44   ;;  %v1857_v34 = vpack.c.bf16 %v4045_v4, %v4039_v38  ;;  %v6371_v63 = vld [vmem:[#allocation6_spill] sm:$0xff]  ;;  %v2388_v45 = vadd.f32 %v6373_v13, %v6372_v29  ;;  %v1869_v43 = vld [vmem:[#allocation3 + $0x40] sm:$0xff]  ;;  %v1876_v4 = vld [vmem:[#allocation3 + $0x78] sm:$0xff] }
 0x3e1   : > { %v1926_v57 = vpop.permute.xlu0 %1925 }
 0x3e2   : > { %v2059_v32 = vmul.f32 %v1926_v57, %v1867_v11  ;;  %v1866_v57 = vld [vmem:[#allocation3 + $0x28] sm:$0xff] }
 0x3e3   : > { %v1379_v28 = vpop.permute.xlu1 %1378 }
 0x3e4   : > { %v2550_v14 = vadd.f32 %v6367_v61, %v2059_v32  ;;  %v1474_v51 = vsub.f32 %v6368_v19, %v1379_v28  ;;  %v1475_v40 = vsub.f32 %v6369_v35, %v1379_v28  ;;  %v1476_v10 = vsub.f32 %v6370_v27, %v1379_v28 }
 0x3e5   : > { %v5539_v56 = vld [vmem:[#allocation3 + $0x18] sm:$0xff]  ;;  %v2495_v32 = vadd.f32 %v5492_v50, %v2406_v52 }
 0x3e6   : > { %2582 = vst.msk [vmem:[#allocation3 + $0x30] sm:$0xff] %vm328_vm2, %v2550_v14  ;;  %v1522_v23 = vpack.c.bf16 %v1474_v51, %v1471_v7  ;;  %v1523_v24 = vpack.c.bf16 %v1475_v40, %v1472_v37  ;;  %v1524_v21 = vpack.c.bf16 %v1476_v10, %v1473_v60  ;;  %2689 = vperm.xlu1 %3799, %v5539_v56   ;;  %v6374_v37 = vld [vmem:[#allocation69_spill] sm:$0xff] }
 0x3e7   : > { %v2477_v55 = vadd.f32 %v6374_v37, %v2388_v45  ;;  %v1875_v45 = vld [vmem:[#allocation3 + $0x70] sm:$0xff] }
 0x3e8   : > { %v1615_v49 = vunpack.c.l.bf16 %v1522_v23  ;;  %v1616_v3 = vunpack.c.l.bf16 %v1523_v24  ;;  %v1617_v5 = vunpack.c.l.bf16 %v1524_v21  ;;  %v1618_v16 = vunpack.c.h.bf16 %v1522_v23  ;;  %v5598_v37 = vld [vmem:[#allocation3 + $0x50] sm:$0xff] }
 0x3e9   : > { %v1941_v2 = vpop.permute.xlu0 %1940  ;;  %v1619_v6 = vunpack.c.h.bf16 %v1523_v24  ;;  %v1620_v36 = vunpack.c.h.bf16 %v1524_v21 }
 0x3ea   : > { %v2062_v15 = vmul.f32 %v1941_v2, %v1870_v46  ;;  %v1801_v30 = vmul.f32 1.442695, %v1615_v49  ;;  %v1803_v54 = vmul.f32 1.442695, %v1616_v3  ;;  %v1805_v8 = vmul.f32 1.442695, %v1617_v5 }
 0x3eb   : > { %v1906_v33 = vpop.permute.xlu1 %1905  ;;  %v1807_v31 = vmul.f32 1.442695, %v1618_v16  ;;  %2355 = vmatmul.bf16.gmra.mxu3 %v1855_v12  ;;  %v1809_v20 = vmul.f32 1.442695, %v1619_v6  ;;  %v1811_v11 = vmul.f32 1.442695, %v1620_v36 }
 0x3ec   : > { %v2553_v17 = vadd.f32 %v5355_v59, %v2062_v15  ;;  %v2055_v39 = vmul.f32 %v1906_v33, %v1863_v26  ;;  %4046 = vpow2.f32 %v1801_v30  ;;  %2444 = vmatmul.bf16.gmra.mxu0 %v1856_v47  ;;  %v1873_v59 = vld [vmem:[#allocation3 + $0x60] sm:$0xff]  ;;  %v1872_v33 = vld [vmem:[#allocation3 + $0x58] sm:$0xff] }
 0x3ed   : > { %v5544_v9 = vld [vmem:[#allocation3 + $0x30] sm:$0xff]  ;;  %2533 = vmatmul.bf16.gmra.mxu1 %v1857_v34  ;;  %4048 = vpow2.f32 %v1803_v54  ;;  %v5572_v16 = vld [vmem:[#allocation3 + $0x20] sm:$0xff]  ;;  %v1976_v54 = vpop.permute.xlu2 %1975 }
 0x3ee   : > { %2585 = vst.msk [vmem:[#allocation3 + $0x48] sm:$0xff] %vm328_vm2, %v2553_v17  ;;  %v2546_v1 = vadd.f32 %v6371_v63, %v2055_v39  ;;  %2704 = vperm.xlu0 %3800, %v5544_v9   ;;  %4050 = vpow2.f32 %v1805_v8  ;;  %v1877_v39 = vld [vmem:[#allocation3 + $0x80] sm:$0xff]  ;;  %v5583_v63 = vld [vmem:[#allocation3 + $0x38] sm:$0xff] }
 0x3ef   : > { %v5554_v58 = vpop.f32.mrf.mxu0  ;;  %4052 = vpow2.f32 %v1807_v31 }
 0x3f0   : > { %2578 = vst.msk [vmem:[#allocation3 + $0x10] sm:$0xff] %vm328_vm2, %v2546_v1  ;;  %4054 = vpow2.f32 %v1809_v20  ;;  %v5557_v7 = vpop.f32.mrf.mxu1  ;;  %v2069_v20 = vmul.f32 %v1976_v54, %v1877_v39 }
 0x3f1   : > { %v1956_v42 = vpop.permute.xlu0 %1955  ;;  %4056 = vpow2.f32 %v1811_v11 }
 0x3f2   : > { %v2065_v18 = vmul.f32 %v1956_v42, %v1873_v59  ;;  %v4047_v0 = vpop.eup %4046 }
 0x3f3   : > { %v1921_v62 = vpop.permute.xlu1 %1920  ;;  %v4049_v19 = vpop.eup %4048 }
 0x3f4   : > { %v2556_v60 = vadd.f32 %v2495_v32, %v2065_v18  ;;  %v2058_v28 = vmul.f32 %v1921_v62, %v1866_v57  ;;  %v4051_v50 = vpop.eup %4050 }
 0x3f5   : > { %v2321_v61 = vpop.f32.mrf.mxu3  ;;  %v5560_v14 = vld [vmem:[#allocation3 + $0x48] sm:$0xff]  ;;  %v4053_v40 = vpop.eup %4052 }
 0x3f6   : > { %2588 = vst.msk [vmem:[#allocation3 + $0x60] sm:$0xff] %vm328_vm2, %v2556_v60  ;;  %v2549_v51 = vadd.f32 %v2477_v55, %v2058_v28  ;;  %2719 = vperm.xlu0 %3800, %v5560_v14   ;;  %v4055_v27 = vpop.eup %4054  ;;  %v1858_v21 = vpack.c.bf16 %v4053_v40, %v4047_v0  ;;  %v2411_v59 = vadd.f32 %v5554_v58, %v2321_v61  ;;  %v5607_v40 = vld [vmem:[#allocation3 + $0x68] sm:$0xff] }
 0x3f7   : > { %v5564_v35 = vld [vmem:[#allocation3 + $0x10] sm:$0xff]  ;;  %v4057_v38 = vpop.eup %4056  ;;  %v2412_v23 = vpop.f32.mrf.mxu0  ;;  %v1859_v41 = vpack.c.bf16 %v4055_v27, %v4049_v19 }
 0x3f8   : > { %2581 = vst.msk [vmem:[#allocation3 + $0x28] sm:$0xff] %vm328_vm2, %v2549_v51  ;;  %2684 = vperm.xlu2 %3801, %v5564_v35   ;;  %v2501_v46 = vpop.f32.mrf.mxu1  ;;  %v1860_v49 = vpack.c.bf16 %v4057_v38, %v4051_v50  ;;  %v2500_v57 = vadd.f32 %v5557_v7, %v2411_v59  ;;  %v1878_v7 = vld [vmem:[#allocation3 + $0x88] sm:$0xff] }
 0x3f9   : > { %v1971_v10 = vpop.permute.xlu0 %1970 }
 0x3fa   : > { %v2068_v30 = vmul.f32 %v1971_v10, %v1876_v4 }
 0x3fb   : > { %v1936_v24 = vpop.permute.xlu1 %1935  ;;  %2360 = vmatmul.bf16.gmra.mxu3 %v1858_v21  ;;  %v1991_v21 = vpop.permute.xlu2 %1990 }
 0x3fc   : > { %v2061_v22 = vmul.f32 %v1936_v24, %v1869_v43  ;;  %2449 = vmatmul.bf16.gmra.mxu0 %v1859_v41 }
 0x3fd   : > { %v2323_v3 = vpop.f32.mrf.mxu3  ;;  %v5568_v5 = vld [vmem:[#allocation3 + $0x60] sm:$0xff]  ;;  %2538 = vmatmul.bf16.gmra.mxu1 %v1860_v49 }
 0x3fe   : > { %v2413_v2 = vadd.f32 %v2412_v23, %v2323_v3  ;;  %v2552_v26 = vadd.f32 %v5330_v53, %v2061_v22  ;;  %2734 = vperm.xlu0 %3800, %v5568_v5   ;;  %v1879_v22 = vld [vmem:[#allocation3 + $0x90] sm:$0xff] }
 0x3ff   : > { %v5574_v15 = vld [vmem:[#allocation3 + $0x28] sm:$0xff]  ;;  %v2415_v8 = vpop.f32.mrf.mxu0 }
 0x400   : > { %v2502_v6 = vadd.f32 %v2501_v46, %v2413_v2  ;;  %2584 = vst.msk [vmem:[#allocation3 + $0x40] sm:$0xff] %vm328_vm2, %v2552_v26  ;;  %2694 = vperm.xlu2 %3801, %v5572_v16   ;;  %2699 = vperm.xlu1 %3799, %v5574_v15   ;;  %v2504_v31 = vpop.f32.mrf.mxu1 }
 0x401   : > { %v5579_v12 = vpop.permute.xlu0 %1985 }
 0x402   : > { %v2559_v53 = vadd.f32 %v2502_v6, %v2068_v30  ;;  %v2071_v3 = vmul.f32 %v5579_v12, %v1879_v22  ;;  %v1880_v30 = vld [vmem:[#allocation3 + $0x98] sm:$0xff]  ;;  %v1881_v12 = vld [vmem:[#allocation3 + $0xa0] sm:$0xff] }
 0x403   : > { %v1951_v36 = vpop.permute.xlu1 %1950  ;;  %v2006_v54 = vpop.permute.xlu2 %2005  ;;  %v2072_v39 = vmul.f32 %v1991_v21, %v1880_v30 }
 0x404   : > { %2591 = vst.msk [vmem:[#allocation3 + $0x78] sm:$0xff] %vm328_vm2, %v2559_v53  ;;  %v2064_v17 = vmul.f32 %v1951_v36, %v1872_v33 }
 0x405   : > { %v2326_v47 = vpop.f32.mrf.mxu3 }
 0x406   : > { %v2416_v34 = vadd.f32 %v2415_v8, %v2326_v47  ;;  %v2555_v52 = vadd.f32 %v5419_v25, %v2064_v17 }
 0x407   : > { %v5585_v1 = vld [vmem:[#allocation3 + $0x40] sm:$0xff]  ;;  %v2417_v62 = vpop.f32.mrf.mxu0 }
 0x408   : > { %v2505_v29 = vadd.f32 %v2504_v31, %v2416_v34  ;;  %2587 = vst.msk [vmem:[#allocation3 + $0x58] sm:$0xff] %vm328_vm2, %v2555_v52  ;;  %2709 = vperm.xlu2 %3801, %v5583_v63   ;;  %2714 = vperm.xlu1 %3799, %v5585_v1   ;;  %v2506_v0 = vpop.f32.mrf.mxu1 }
 0x409   : > { %v5591_v13 = vpop.permute.xlu0 %2000 }
 0x40a   : > { %v2560_v11 = vadd.f32 %v2505_v29, %v2069_v20 }
 0x40b   : > { %v5593_v25 = vld [vmem:[#allocation3 + $0x78] sm:$0xff]  ;;  %v1966_v42 = vpop.permute.xlu1 %1965 }
 0x40c   : > { %2592 = vst.msk [vmem:[#allocation3 + $0x80] sm:$0xff] %vm328_vm2, %v2560_v11  ;;  %2749 = vperm.xlu0 %3800, %v5593_v25   ;;  %v2067_v58 = vmul.f32 %v1966_v42, %v1875_v45 }
 0x40d   : > { %v2328_v32 = vpop.f32.mrf.mxu3 }
 0x40e   : > { %v2558_v18 = vadd.f32 %v2500_v57, %v2067_v58  ;;  %v2418_v60 = vadd.f32 %v2417_v62, %v2328_v32  ;;  %v5630_v62 = vpop.permute.xlu2 %2020 }
 0x40f   : > { %v5600_v55 = vld [vmem:[#allocation3 + $0x58] sm:$0xff] }
 0x410   : > { %2590 = vst.msk [vmem:[#allocation3 + $0x70] sm:$0xff] %vm328_vm2, %v2558_v18  ;;  %2724 = vperm.xlu2 %3801, %v5598_v37   ;;  %2729 = vperm.xlu1 %3799, %v5600_v55   ;;  %v2507_v19 = vadd.f32 %v2506_v0, %v2418_v60 }
 0x411   : > { %v5605_v28 = vpop.permute.xlu0 %2015 }
 0x413   : > { %v1981_v61 = vpop.permute.xlu1 %1980  ;;  %v5616_v23 = vld [vmem:[#allocation3 + $0x80] sm:$0xff] }
 0x414   : > { %v2070_v51 = vmul.f32 %v1981_v61, %v1878_v7 }
 0x416   : > { %v2561_v50 = vadd.f32 %v2507_v19, %v2070_v51  ;;  %v1882_v51 = vld [vmem:[#allocation3 + $0xa8] sm:$0xff] }
 0x417   : > { %v5609_v27 = vld [vmem:[#allocation3 + $0x70] sm:$0xff] }
 0x418   : > { %2593 = vst.msk [vmem:[#allocation3 + $0x88] sm:$0xff] %vm328_vm2, %v2561_v50  ;;  %2739 = vperm.xlu2 %3801, %v5607_v40   ;;  %2744 = vperm.xlu1 %3799, %v5609_v27  }
 0x419   : > { %v5614_v10 = vpop.permute.xlu0 %2030  ;;  %v2420_v43 = vpop.f32.mrf.mxu0 }
 0x41a   : > { %v2509_v38 = vpop.f32.mrf.mxu1 }
 0x41b   : > { %v1996_v33 = vpop.permute.xlu1 %1995 }
 0x41c   : > { %v2073_v42 = vmul.f32 %v1996_v33, %v1881_v12 }
 0x41e   : > { %v2331_v46 = vpop.f32.mrf.mxu3 }
 0x41f   : > { %v5618_v24 = vld [vmem:[#allocation3 + $0x88] sm:$0xff]  ;;  %v2421_v41 = vadd.f32 %v2420_v43, %v2331_v46  ;;  %v2074_v46 = vmul.f32 %v5591_v13, %v1882_v51  ;;  %v1883_v13 = vld [vmem:[#allocation3 + $0xb0] sm:$0xff] }
 0x420   : > { %2754 = vperm.xlu2 %3801, %v5616_v23   ;;  %2759 = vperm.xlu1 %3799, %v5618_v24  }
 0x421   : > { %v5622_v49 = vpop.permute.xlu0 %2045  ;;  %v2510_v4 = vadd.f32 %v2509_v38, %v2421_v41  ;;  %v2422_v2 = vpop.f32.mrf.mxu0 }
 0x422   : > { %v2511_v26 = vpop.f32.mrf.mxu1 }
 0x423   : > { %v2562_v6 = vadd.f32 %v2510_v4, %v2071_v3  ;;  %v2011_v45 = vpop.permute.xlu1 %2010 }
 0x425   : > { %2594 = vst.msk [vmem:[#allocation3 + $0x90] sm:$0xff] %vm328_vm2, %v2562_v6 }
 0x426   : > { %v2333_v53 = vpop.f32.mrf.mxu3 }
 0x427   : > { %v2423_v36 = vadd.f32 %v2422_v2, %v2333_v53  ;;  %v5650_v53 = vpop.permute.xlu2 %2035 }
 0x429   : > { %v2512_v8 = vadd.f32 %v2511_v26, %v2423_v36  ;;  %v2425_v47 = vpop.f32.mrf.mxu0 }
 0x42a   : > { %v2680_v17 = vpop.permute.xlu0 %2679  ;;  %v2514_v34 = vpop.f32.mrf.mxu1 }
 0x42b   : > { %4058 = vrcp.f32 %v2680_v17  ;;  %v2563_v52 = vadd.f32 %v2512_v8, %v2072_v39  ;;  %v2858_v60 = vand.u32 2147483648, %v2680_v17  ;;  %v2856_v61 = vand.u32 2147483647, %v2680_v17  ;;  %v5644_v6 = vpop.permute.xlu1 %2025 }
 0x42c   : > { %v5626_v31 = vld [vmem:[#allocation3 + $0x90] sm:$0xff]  ;;  %vm2852_vm4 = vweird.f32 %v2680_v17  ;;  %v2075_v39 = vmul.f32 %v2006_v54, %v1883_v13 }
 0x42d   : > { %2595 = vst.msk [vmem:[#allocation3 + $0x98] sm:$0xff] %vm328_vm2, %v2563_v52  ;;  %2764 = vperm.xlu0 %3800, %v5626_v31   ;;  %v2859_v38 = vor.u32 1.1754944e-38, %v2858_v60  ;;  %vm2857_vm6 = vcmp.eq.f32.partialorder %v2856_v61, 8.507059e+37 }
 0x42e   : > { %v2336_v20 = vpop.f32.mrf.mxu3 }
 0x42f   : > { %v2426_v29 = vadd.f32 %v2425_v47, %v2336_v20  ;;  %v1884_v20 = vld [vmem:[#allocation3 + $0xb8] sm:$0xff] }
 0x431   : > { %v4059_v59 = vpop.eup %4058  ;;  %v2515_v57 = vadd.f32 %v2514_v34, %v2426_v29  ;;  %v2427_v58 = vpop.f32.mrf.mxu0 }
 0x432   : > { %v2848_v11 = vmul.f32 %v4059_v59, %v2680_v17  ;;  %v2516_v32 = vpop.f32.mrf.mxu1  ;;  %vm2853_vm3 = vweird.f32 %v4059_v59  ;;  %v5660_v29 = vpop.permute.xlu2 %2050 }
 0x433   : > { %v2564_v7 = vadd.f32 %v2515_v57, %v2073_v42  ;;  %vm2854_vm5 = vmor %vm2852_vm4, %vm2853_vm3  ;;  %v5656_v12 = vpop.permute.xlu1 %2040  ;;  %v2076_v42 = vmul.f32 %v2011_v45, %v1884_v20 }
 0x434   : > { %v2849_v18 = vsub.f32 1.0, %v2848_v11  ;;  %v5632_v19 = vld [vmem:[#allocation3 + $0x98] sm:$0xff] }
 0x435   : > { %2596 = vst.msk [vmem:[#allocation3 + $0xa0] sm:$0xff] %vm328_vm2, %v2564_v7  ;;  %2769 = vperm.xlu2 %3801, %v5632_v19   ;;  %v1885_v7 = vld [vmem:[#allocation3 + $0xc0] sm:$0xff] }
 0x436   : > { %v2850_v0 = vmul.f32 %v4059_v59, %v2849_v18  ;;  %v2338_v43 = vpop.f32.mrf.mxu3 }
 0x437   : > { %v2428_v21 = vadd.f32 %v2427_v58, %v2338_v43 }
 0x438   : > { %v2851_v50 = vadd.f32 %v4059_v59, %v2850_v0 }
 0x439   : > { %v2517_v3 = vadd.f32 %v2516_v32, %v2428_v21  ;;  %v2430_v4 = vpop.f32.mrf.mxu0 }
 0x43a   : > { %v2855_v22 = vsel %vm2854_vm5, %v4059_v59, %v2851_v50  ;;  %v2519_v2 = vpop.f32.mrf.mxu1  ;;  %v2077_v50 = vmul.f32 %v5605_v28, %v1885_v7 }
 0x43b   : > { %v2860_v41 = vsel %vm2857_vm6, %v2859_v38, %v2855_v22  ;;  %v2565_v30 = vadd.f32 %v2517_v3, %v2074_v46  ;;  %v1886_v46 = vld [vmem:[#allocation3 + $0xc8] sm:$0xff] }
 0x43c   : > { %v2861_v26 = vmul.f32 %v2860_v41, %v5500_v48  ;;  %v5648_v33 = vld [vmem:[#allocation3 + $0xa0] sm:$0xff]  ;;  %v2078_v28 = vmul.f32 %v5630_v62, %v1886_v46 }
 0x43d   : > { %2597 = vst.msk [vmem:[#allocation3 + $0xa8] sm:$0xff] %vm328_vm2, %v2565_v30  ;;  %2774 = vperm.xlu1 %3799, %v5648_v33   ;;  %v1889_v30 = vld [vmem:[#allocation3 + $0xe0] sm:$0xff] }
 0x43e   : > { %3314 = vst.msk [vmem:[%s5640_s12 + $0x8] sm:$0xff] %vm3312_vm7, %v2861_v26  ;;  %v2341_v36 = vpop.f32.mrf.mxu3  ;;  %v5679_v62 = vmul.f32 %v5650_v53, %v1889_v30 }
 0x43f   : > { %v2431_v17 = vadd.f32 %v2430_v4, %v2341_v36 }
 0x441   : > { %v2520_v8 = vadd.f32 %v2519_v2, %v2431_v17  ;;  %v2432_v47 = vpop.f32.mrf.mxu0 }
 0x442   : > { %v2521_v48 = vpop.f32.mrf.mxu1 }
 0x443   : > { %v2566_v34 = vadd.f32 %v2520_v8, %v2075_v39 }
 0x444   : > { %v5654_v52 = vld [vmem:[#allocation3 + $0xa8] sm:$0xff] }
 0x445   : > { %2598 = vst.msk [vmem:[#allocation3 + $0xb0] sm:$0xff] %vm328_vm2, %v2566_v34  ;;  %2779 = vperm.xlu0 %3800, %v5654_v52   ;;  %v1888_v34 = vld [vmem:[#allocation3 + $0xd8] sm:$0xff] }
 0x446   : > { %v2343_v59 = vpop.f32.mrf.mxu3 }
 0x447   : > { %v2433_v11 = vadd.f32 %v2432_v47, %v2343_v59 }
 0x449   : > { %v2522_v57 = vadd.f32 %v2521_v48, %v2433_v11  ;;  %v2435_v54 = vpop.f32.mrf.mxu0 }
 0x44a   : > { %v2524_v58 = vpop.f32.mrf.mxu1 }
 0x44b   : > { %v2567_v32 = vadd.f32 %v2522_v57, %v2076_v42 }
 0x44c   : > { %v5662_v18 = vld [vmem:[#allocation3 + $0xb0] sm:$0xff] }
 0x44d   : > { %2599 = vst.msk [vmem:[#allocation3 + $0xb8] sm:$0xff] %vm328_vm2, %v2567_v32  ;;  %2784 = vperm.xlu2 %3801, %v5662_v18  }
 0x44e   : > { %v2346_v0 = vpop.f32.mrf.mxu3 }
 0x44f   : > { %v2436_v61 = vadd.f32 %v2435_v54, %v2346_v0 }
 0x450   : > { %v2675_v60 = vpop.permute.xlu1 %2674 }
 0x451   : > { %4060 = vrcp.f32 %v2675_v60  ;;  %v2525_v45 = vadd.f32 %v2524_v58, %v2436_v61  ;;  %v2437_v43 = vpop.f32.mrf.mxu0  ;;  %v2841_v8 = vand.u32 2147483647, %v2675_v60  ;;  %v2843_v47 = vand.u32 2147483648, %v2675_v60 }
 0x452   : > { %v2685_v51 = vpop.permute.xlu2 %2684  ;;  %v2526_v38 = vpop.f32.mrf.mxu1  ;;  %vm2837_vm9 = vweird.f32 %v2675_v60  ;;  %v5682_v61 = vmul.f32 %v5614_v10, %v1888_v34 }
 0x453   : > { %4062 = vrcp.f32 %v2685_v51  ;;  %v2568_v21 = vadd.f32 %v2525_v45, %v2077_v50  ;;  %v2871_v48 = vand.u32 2147483647, %v2685_v51  ;;  %v2873_v54 = vand.u32 2147483648, %v2685_v51 }
 0x454   : > { %v5667_v41 = vld [vmem:[#allocation3 + $0xb8] sm:$0xff]  ;;  %vm2842_vm12 = vcmp.eq.f32.partialorder %v2841_v8, 8.507059e+37  ;;  %v2844_v50 = vor.u32 1.1754944e-38, %v2843_v47  ;;  %vm2867_vm13 = vweird.f32 %v2685_v51 }
 0x455   : > { %2600 = vst.msk [vmem:[#allocation3 + $0xc0] sm:$0xff] %vm328_vm2, %v2568_v21  ;;  %2789 = vperm.xlu1 %3799, %v5667_v41   ;;  %vm5686_vm14 = vcmp.eq.f32.partialorder %v2871_v48, 8.507059e+37 }
 0x456   : > { %v2348_v26 = vpop.f32.mrf.mxu3 }
 0x457   : > { %v4061_v22 = vpop.eup %4060  ;;  %v2438_v17 = vadd.f32 %v2437_v43, %v2348_v26  ;;  %v1887_v26 = vld [vmem:[#allocation3 + $0xd0] sm:$0xff] }
 0x458   : > { %v2833_v3 = vmul.f32 %v4061_v22, %v2675_v60  ;;  %v5671_v4 = vpop.permute.xlu1 %2689  ;;  %vm2838_vm8 = vweird.f32 %v4061_v22 }
 0x459   : > { %v4063_v2 = vpop.eup %4062  ;;  %4064 = vrcp.f32 %v5671_v4  ;;  %v2527_v11 = vadd.f32 %v2526_v38, %v2438_v17  ;;  %v2440_v42 = vpop.f32.mrf.mxu0  ;;  %vm2839_vm11 = vmor %vm2837_vm9, %vm2838_vm8  ;;  %v2888_v47 = vand.u32 2147483648, %v5671_v4  ;;  %vm2882_vm1 = vweird.f32 %v5671_v4 }
 0x45a   : > { %v2834_v13 = vsub.f32 1.0, %v2833_v3  ;;  %v2863_v36 = vmul.f32 %v4063_v2, %v2685_v51  ;;  %v5675_v39 = vpop.permute.xlu2 %2694  ;;  %v2529_v57 = vpop.f32.mrf.mxu1  ;;  %vm2868_vm10 = vweird.f32 %v4063_v2  ;;  %v2874_v51 = vor.u32 1.1754944e-38, %v2873_v54 }
 0x45b   : > { %4066 = vrcp.f32 %v5675_v39  ;;  %v2569_v7 = vadd.f32 %v2527_v11, %v2078_v28  ;;  %vm2869_vm15 = vmor %vm2867_vm13, %vm2868_vm10  ;;  %v2901_v48 = vand.u32 2147483647, %v5675_v39  ;;  %v2079_v11 = vmul.f32 %v5644_v6, %v1887_v26 }
 0x45c   : > { %v2835_v20 = vmul.f32 %v4061_v22, %v2834_v13  ;;  %v2864_v59 = vsub.f32 1.0, %v2863_v36  ;;  %v5684_v45 = vld [vmem:[#allocation3 + $0xc0] sm:$0xff]  ;;  %v2903_v54 = vand.u32 2147483648, %v5675_v39  ;;  %v2889_v6 = vor.u32 1.1754944e-38, %v2888_v47 }
 0x45d   : > { %2601 = vst.msk [vmem:[#allocation3 + $0xc8] sm:$0xff] %vm328_vm2, %v2569_v7  ;;  %2794 = vperm.xlu0 %3800, %v5684_v45   ;;  %vm2897_vm6 = vweird.f32 %v5675_v39  ;;  %vm5726_vm8 = vcmp.eq.f32.partialorder %v2901_v48, 8.507059e+37 }
 0x45e   : > { %v2836_v58 = vadd.f32 %v4061_v22, %v2835_v20  ;;  %v2865_v32 = vmul.f32 %v4063_v2, %v2864_v59  ;;  %v2351_v3 = vpop.f32.mrf.mxu3 }
 0x45f   : > { %v4065_v0 = vpop.eup %4064  ;;  %v2441_v34 = vadd.f32 %v2440_v42, %v2351_v3  ;;  %v1890_v3 = vld [vmem:[#allocation3 + $0xe8] sm:$0xff] }
 0x460   : > { %v2840_v43 = vsel %vm2839_vm11, %v4061_v22, %v2836_v58  ;;  %v2866_v38 = vadd.f32 %v4063_v2, %v2865_v32  ;;  %v2878_v60 = vmul.f32 %v4065_v0, %v5671_v4  ;;  %v5693_v10 = vpop.permute.xlu0 %2704  ;;  %v2886_v22 = vand.u32 2147483647, %v5671_v4 }
 0x461   : > { %v5695_v21 = vpop.eup %4066  ;;  %v2845_v46 = vsel %vm2842_vm12, %v2844_v50, %v2840_v43  ;;  %4068 = vrcp.f32 %v5693_v10  ;;  %vm2883_vm0 = vweird.f32 %v4065_v0  ;;  %v2442_v59 = vpop.f32.mrf.mxu0  ;;  %v2530_v58 = vadd.f32 %v2529_v57, %v2441_v34 }
 0x462   : > { %v2846_v28 = vmul.f32 %v2845_v46, %v5525_v44  ;;  %v2870_v30 = vsel %vm2869_vm15, %v4063_v2, %v2866_v38  ;;  %v2879_v13 = vsub.f32 1.0, %v2878_v60  ;;  %v2893_v36 = vmul.f32 %v5695_v21, %v5675_v39  ;;  %v5703_v17 = vpop.permute.xlu2 %2709  ;;  %v2531_v32 = vpop.f32.mrf.mxu1  ;;  %vm2884_vm4 = vmor %vm2882_vm1, %vm2883_vm0 }
 0x463   : > { %v2875_v8 = vsel %vm5686_vm14, %v2874_v51, %v2870_v30  ;;  %4070 = vrcp.f32 %v5703_v17  ;;  %vm2898_vm3 = vweird.f32 %v5695_v21  ;;  %vm2887_vm5 = vcmp.eq.f32.partialorder %v2886_v22, 8.507059e+37  ;;  %v1891_v22 = vld [vmem:[#allocation3 + $0xf0] sm:$0xff] }
 0x464   : > { %3313 = vst.msk [vmem:[%s5640_s12] sm:$0xff] %vm3312_vm7, %v2846_v28  ;;  %v2876_v44 = vmul.f32 %v2875_v8, %v5564_v35  ;;  %v2880_v2 = vmul.f32 %v4065_v0, %v2879_v13  ;;  %v2894_v20 = vsub.f32 1.0, %v2893_v36  ;;  %v2570_v57 = vadd.f32 %v2530_v58, %v2079_v11  ;;  %v5723_v50 = vld [vmem:[#allocation3 + $0xc8] sm:$0xff]  ;;  %vm2899_vm9 = vmor %vm2897_vm6, %vm2898_vm3 }
 0x465   : > { %2799 = vperm.xlu2 %3801, %v5723_v50   ;;  %v2904_v39 = vor.u32 1.1754944e-38, %v2903_v54  ;;  %v2933_v48 = vand.u32 2147483648, %v5693_v10  ;;  %v2946_v34 = vand.u32 2147483647, %v5703_v17  ;;  %vm2927_vm11 = vweird.f32 %v5693_v10 }
 0x466   : > { %3315 = vst.msk [vmem:[%s5640_s12 + $0x10] sm:$0xff] %vm3312_vm7, %v2876_v44  ;;  %v2881_v7 = vadd.f32 %v4065_v0, %v2880_v2  ;;  %v2895_v42 = vmul.f32 %v5695_v21, %v2894_v20  ;;  %v2353_v51 = vpop.f32.mrf.mxu3  ;;  %v5756_v2 = vmul.f32 %v5622_v49, %v1891_v22  ;;  %v5759_v20 = vmul.f32 %v5656_v12, %v1890_v3 }
 0x467   : > { %v5720_v35 = vpop.eup %4068  ;;  %2602 = vst.msk [vmem:[#allocation3 + $0xd0] sm:$0xff] %vm328_vm2, %v2570_v57  ;;  %v2443_v13 = vadd.f32 %v2442_v59, %v2353_v51  ;;  %v2948_v59 = vand.u32 2147483648, %v5703_v17  ;;  %vm2942_vm14 = vweird.f32 %v5703_v17  ;;  %vm5771_vm15 = vcmp.eq.f32.partialorder %v2946_v34, 8.507059e+37 }
 0x468   : > { %v2885_v43 = vsel %vm2884_vm4, %v4065_v0, %v2881_v7  ;;  %v2896_v38 = vadd.f32 %v5695_v21, %v2895_v42  ;;  %v2923_v4 = vmul.f32 %v5720_v35, %v5693_v10  ;;  %v5733_v60 = vpop.permute.xlu0 %2719  ;;  %v2931_v0 = vand.u32 2147483647, %v5693_v10 }
 0x469   : > { %v2890_v46 = vsel %vm2887_vm5, %v2889_v6, %v2885_v43  ;;  %4072 = vrcp.f32 %v5733_v60  ;;  %v4071_v8 = vpop.eup %4070  ;;  %vm2928_vm10 = vweird.f32 %v5720_v35  ;;  %v2532_v11 = vadd.f32 %v2531_v32, %v2443_v13  ;;  %v2445_v54 = vpop.f32.mrf.mxu0 }
 0x46a   : > { %v2891_v26 = vmul.f32 %v2890_v46, %v5539_v56  ;;  %v2900_v28 = vsel %vm2899_vm9, %v5695_v21, %v2896_v38  ;;  %v2924_v30 = vsub.f32 1.0, %v2923_v4  ;;  %v5742_v36 = vpop.permute.xlu2 %2724  ;;  %v2938_v44 = vmul.f32 %v4071_v8, %v5703_v17  ;;  %vm2929_vm13 = vmor %vm2927_vm11, %vm2928_vm10  ;;  %v2534_v6 = vpop.f32.mrf.mxu1 }
 0x46b   : > { %v2905_v47 = vsel %vm5726_vm8, %v2904_v39, %v2900_v28  ;;  %4074 = vrcp.f32 %v5742_v36  ;;  %vm5766_vm12 = vcmp.eq.f32.partialorder %v2931_v0, 8.507059e+37  ;;  %v2934_v42 = vor.u32 1.1754944e-38, %v2933_v48 }
 0x46c   : > { %3316 = vst.msk [vmem:[%s5640_s12 + $0x18] sm:$0xff] %vm3312_vm7, %v2891_v26  ;;  %v2906_v56 = vmul.f32 %v2905_v47, %v5572_v16  ;;  %v2925_v21 = vmul.f32 %v5720_v35, %v2924_v30  ;;  %v2939_v7 = vsub.f32 1.0, %v2938_v44  ;;  %v2571_v32 = vadd.f32 %v2532_v11, %v5682_v61 }
 0x46d   : > { %vm2943_vm0 = vweird.f32 %v4071_v8  ;;  %v2949_v39 = vor.u32 1.1754944e-38, %v2948_v59  ;;  %vm2972_vm1 = vweird.f32 %v5733_v60  ;;  %v2976_v28 = vand.u32 2147483647, %v5733_v60 }
 0x46e   : > { %3317 = vst.msk [vmem:[%s5640_s12 + $0x20] sm:$0xff] %vm3312_vm7, %v2906_v56  ;;  %v2926_v16 = vadd.f32 %v5720_v35, %v2925_v21  ;;  %v2940_v10 = vmul.f32 %v4071_v8, %v2939_v7  ;;  %v5778_v38 = vld [vmem:[#allocation3 + $0xd0] sm:$0xff]  ;;  %v2356_v61 = vpop.f32.mrf.mxu3  ;;  %vm2944_vm3 = vmor %vm2942_vm14, %vm2943_vm0  ;;  %v2978_v30 = vand.u32 2147483648, %v5733_v60  ;;  %v2991_v13 = vand.u32 2147483647, %v5742_v36 }
 0x46f   : > { %v4073_v49 = vpop.eup %4072  ;;  %2603 = vst.msk [vmem:[#allocation3 + $0xd8] sm:$0xff] %vm328_vm2, %v2571_v32  ;;  %2804 = vperm.xlu1 %3799, %v5778_v38   ;;  %v2993_v17 = vand.u32 2147483648, %v5742_v36  ;;  %vm2977_vm8 = vcmp.eq.f32.partialorder %v2976_v28, 8.507059e+37  ;;  %vm2987_vm9 = vweird.f32 %v5742_v36 }
 0x470   : > { %v2930_v57 = vsel %vm2929_vm13, %v5720_v35, %v2926_v16  ;;  %v2968_v43 = vmul.f32 %v4073_v49, %v5733_v60  ;;  %v5780_v53 = vpop.permute.xlu0 %2734  ;;  %v2941_v0 = vadd.f32 %v4071_v8, %v2940_v10  ;;  %vm2973_vm4 = vweird.f32 %v4073_v49 }
 0x471   : > { %v5782_v4 = vpop.eup %4074  ;;  %v2935_v46 = vsel %vm5766_vm12, %v2934_v42, %v2930_v57  ;;  %4076 = vrcp.f32 %v5780_v53  ;;  %vm2974_vm6 = vmor %vm2972_vm1, %vm2973_vm4  ;;  %v2447_v58 = vpop.f32.mrf.mxu0  ;;  %v3021_v7 = vand.u32 2147483647, %v5780_v53  ;;  %vm2992_vm11 = vcmp.eq.f32.partialorder %v2991_v13, 8.507059e+37 }
 0x472   : > { %v2936_v35 = vmul.f32 %v2935_v46, %v5544_v9  ;;  %v2969_v51 = vsub.f32 1.0, %v2968_v43  ;;  %v2983_v22 = vmul.f32 %v5782_v4, %v5742_v36  ;;  %v5793_v3 = vpop.permute.xlu2 %2739  ;;  %v5795_v26 = vpop.permute.xlu1 %2699  ;;  %v2446_v9 = vadd.f32 %v2445_v54, %v2356_v61 }
 0x473   : > { %v2945_v47 = vsel %vm2944_vm3, %v4071_v8, %v2941_v0  ;;  %4078 = vrcp.f32 %v5793_v3  ;;  %vm2988_vm5 = vweird.f32 %v5782_v4  ;;  %v2979_v54 = vor.u32 1.1754944e-38, %v2978_v30 }
 0x474   : > { %3319 = vst.msk [vmem:[%s5640_s12 + $0x30] sm:$0xff] %vm3312_vm7, %v2936_v35  ;;  %v2970_v48 = vmul.f32 %v4073_v49, %v2969_v51  ;;  %v2984_v34 = vsub.f32 1.0, %v2983_v22  ;;  %v2950_v56 = vsel %vm5771_vm15, %v2949_v39, %v2945_v47  ;;  %v2535_v21 = vadd.f32 %v2534_v6, %v2446_v9  ;;  %vm5825_vm10 = vmor %vm2987_vm9, %vm2988_vm5 }
 0x475   : > { %v2951_v44 = vmul.f32 %v2950_v56, %v5583_v63  ;;  %4080 = vrcp.f32 %v5795_v26  ;;  %v3023_v46 = vand.u32 2147483648, %v5780_v53  ;;  %vm3017_vm12 = vweird.f32 %v5780_v53 }
 0x476   : > { %v2971_v59 = vadd.f32 %v4073_v49, %v2970_v48  ;;  %v2985_v11 = vmul.f32 %v5782_v4, %v2984_v34  ;;  %v2572_v16 = vadd.f32 %v2535_v21, %v5679_v62  ;;  %v5821_v32 = vld [vmem:[#allocation3 + $0xd8] sm:$0xff]  ;;  %v2994_v62 = vor.u32 1.1754944e-38, %v2993_v17  ;;  %v2358_v36 = vpop.f32.mrf.mxu3 }
 0x477   : > { %v4077_v8 = vpop.eup %4076  ;;  %3320 = vst.msk [vmem:[%s5640_s12 + $0x38] sm:$0xff] %vm3312_vm7, %v2951_v44  ;;  %2809 = vperm.xlu0 %3800, %v5821_v32   ;;  %vm5842_vm13 = vcmp.eq.f32.partialorder %v3021_v7, 8.507059e+37  ;;  %v3036_v30 = vand.u32 2147483647, %v5793_v3  ;;  %v3038_v13 = vand.u32 2147483648, %v5793_v3  ;;  %v3024_v48 = vor.u32 1.1754944e-38, %v3023_v46 }
 0x478   : > { %v2975_v42 = vsel %vm2974_vm6, %v4073_v49, %v2971_v59  ;;  %v2986_v63 = vadd.f32 %v5782_v4, %v2985_v11  ;;  %v3013_v12 = vmul.f32 %v4077_v8, %v5780_v53  ;;  %2604 = vst.msk [vmem:[#allocation3 + $0xe0] sm:$0xff] %vm328_vm2, %v2572_v16  ;;  %v2536_v49 = vpop.f32.mrf.mxu1  ;;  %vm3018_vm14 = vweird.f32 %v4077_v8 }
 0x479   : > { %v2980_v60 = vsel %vm2977_vm8, %v2979_v54, %v2975_v42  ;;  %v4079_v35 = vpop.eup %4078  ;;  %vm3032_vm15 = vweird.f32 %v5793_v3  ;;  %vm3019_vm0 = vmor %vm3017_vm12, %vm3018_vm14  ;;  %v2918_v17 = vand.u32 2147483648, %v5795_v26  ;;  %vm5869_vm3 = vcmp.eq.f32.partialorder %v3036_v30, 8.507059e+37 }
 0x47a   : > { %v2981_v57 = vmul.f32 %v2980_v60, %v5560_v14  ;;  %v2990_v10 = vsel %vm5825_vm10, %v5782_v4, %v2986_v63  ;;  %v3014_v43 = vsub.f32 1.0, %v3013_v12  ;;  %v5837_v39 = vpop.permute.xlu2 %2754  ;;  %v5839_v61 = vpop.permute.xlu1 %2714  ;;  %v2448_v14 = vadd.f32 %v2447_v58, %v2358_v36 }
 0x47b   : > { %v2995_v0 = vsel %vm2992_vm11, %v2994_v62, %v2990_v10  ;;  %v3028_v28 = vmul.f32 %v4079_v35, %v5793_v3  ;;  %4082 = vrcp.f32 %v5837_v39  ;;  %v4081_v56 = vpop.eup %4080  ;;  %vm3033_vm1 = vweird.f32 %v4079_v35 }
 0x47c   : > { %3322 = vst.msk [vmem:[%s5640_s12 + $0x48] sm:$0xff] %vm3312_vm7, %v2981_v57  ;;  %v2996_v4 = vmul.f32 %v2995_v0, %v5598_v37  ;;  %v3015_v22 = vmul.f32 %v4077_v8, %v3014_v43  ;;  %v2537_v9 = vadd.f32 %v2536_v49, %v2448_v14  ;;  %v2916_v37 = vand.u32 2147483647, %v5795_v26  ;;  %vm3034_vm5 = vmor %vm3032_vm15, %vm3033_vm1 }
 0x47d   : > { %v3029_v34 = vsub.f32 1.0, %v3028_v28  ;;  %4084 = vrcp.f32 %v5839_v61  ;;  %v2908_v11 = vmul.f32 %v4081_v56, %v5795_v26  ;;  %v3039_v7 = vor.u32 1.1754944e-38, %v3038_v13 }
 0x47e   : > { %3323 = vst.msk [vmem:[%s5640_s12 + $0x50] sm:$0xff] %vm3312_vm7, %v2996_v4  ;;  %v3016_v47 = vadd.f32 %v4077_v8, %v3015_v22  ;;  %v2573_v21 = vadd.f32 %v2537_v9, %v5759_v20  ;;  %v5865_v16 = vpop.permute.xlu0 %2749  ;;  %v2450_v20 = vpop.f32.mrf.mxu0  ;;  %vm2912_vm4 = vweird.f32 %v5795_v26  ;;  %vm5883_vm6 = vcmp.eq.f32.partialorder %v2916_v37, 8.507059e+37 }
 0x47f   : > { %v3030_v59 = vmul.f32 %v4079_v35, %v3029_v34  ;;  %v5863_v54 = vld [vmem:[#allocation3 + $0xe0] sm:$0xff]  ;;  %v2361_v42 = vpop.f32.mrf.mxu3  ;;  %v2909_v60 = vsub.f32 1.0, %v2908_v11  ;;  %v2919_v36 = vor.u32 1.1754944e-38, %v2918_v17  ;;  %vm3077_vm8 = vweird.f32 %v5837_v39 }
 0x480   : > { %v3020_v44 = vsel %vm3019_vm0, %v4077_v8, %v3016_v47  ;;  %2605 = vst.msk [vmem:[#allocation3 + $0xe8] sm:$0xff] %vm328_vm2, %v2573_v21  ;;  %v3081_v8 = vand.u32 2147483647, %v5837_v39  ;;  %2814 = vperm.xlu2 %3801, %v5863_v54   ;;  %4086 = vrcp.f32 %v5865_v16  ;;  %vm2913_vm9 = vweird.f32 %v4081_v56  ;;  %v2539_v10 = vpop.f32.mrf.mxu1 }
 0x481   : > { %v3025_v53 = vsel %vm5842_vm13, %v3024_v48, %v3020_v44  ;;  %v3031_v12 = vadd.f32 %v4079_v35, %v3030_v59  ;;  %v4083_v62 = vpop.eup %4082  ;;  %v2910_v57 = vmul.f32 %v4081_v56, %v2909_v60  ;;  %v3083_v51 = vand.u32 2147483648, %v5837_v39  ;;  %vm2914_vm12 = vmor %vm2912_vm4, %vm2913_vm9 }
 0x482   : > { %v3026_v63 = vmul.f32 %v3025_v53, %v5568_v5  ;;  %v5878_v6 = vpop.permute.xlu1 %2729  ;;  %v3073_v43 = vmul.f32 %v4083_v62, %v5837_v39  ;;  %vm5894_vm10 = vcmp.eq.f32.partialorder %v3081_v8, 8.507059e+37  ;;  %vm2957_vm11 = vweird.f32 %v5839_v61 }
 0x483   : > { %v3035_v5 = vsel %vm3034_vm5, %v4079_v35, %v3031_v12  ;;  %v4085_v3 = vpop.eup %4084  ;;  %v2911_v14 = vadd.f32 %v4081_v56, %v2910_v57  ;;  %v2961_v28 = vand.u32 2147483647, %v5839_v61  ;;  %v2963_v30 = vand.u32 2147483648, %v5839_v61 }
 0x484   : > { %3325 = vst.msk [vmem:[%s5640_s12 + $0x60] sm:$0xff] %vm3312_vm7, %v3026_v63  ;;  %v3040_v46 = vsel %vm5869_vm3, %v3039_v7, %v3035_v5  ;;  %v3074_v4 = vsub.f32 1.0, %v3073_v43  ;;  %v2953_v22 = vmul.f32 %v4085_v3, %v5839_v61  ;;  %v2451_v13 = vadd.f32 %v2450_v20, %v2361_v42  ;;  %v1892_v42 = vld [vmem:[#allocation3 + $0xf8] sm:$0xff] }
 0x485   : > { %v3041_v35 = vmul.f32 %v3040_v46, %v5607_v40  ;;  %4088 = vrcp.f32 %v5878_v6  ;;  %v2915_v9 = vsel %vm2914_vm12, %v4081_v56, %v2911_v14  ;;  %vm3078_vm13 = vweird.f32 %v4083_v62 }
 0x486   : > { %v3075_v47 = vmul.f32 %v4083_v62, %v3074_v4  ;;  %v2954_v40 = vsub.f32 1.0, %v2953_v22  ;;  %v4087_v34 = vpop.eup %4086  ;;  %v2920_v26 = vsel %vm5883_vm6, %v2919_v36, %v2915_v9  ;;  %v3084_v37 = vor.u32 1.1754944e-38, %v3083_v51  ;;  %vm3079_vm15 = vmor %vm3077_vm8, %vm3078_vm13 }
 0x487   : > { %3326 = vst.msk [vmem:[%s5640_s12 + $0x68] sm:$0xff] %vm3312_vm7, %v3041_v35  ;;  %v5909_v48 = vld [vmem:[#allocation3 + $0xe8] sm:$0xff]  ;;  %vm2958_vm14 = vweird.f32 %v4085_v3  ;;  %v2540_v17 = vadd.f32 %v2539_v10, %v2451_v13  ;;  %v2363_v21 = vpop.f32.mrf.mxu3  ;;  %v2921_v44 = vmul.f32 %v2920_v26, %v5574_v15  ;;  %v3058_v11 = vmul.f32 %v4087_v34, %v5865_v16  ;;  %v2452_v15 = vpop.f32.mrf.mxu0 }
 0x488   : > { %2819 = vperm.xlu1 %3799, %v5909_v48   ;;  %v3076_v59 = vadd.f32 %v4083_v62, %v3075_v47  ;;  %v2955_v56 = vmul.f32 %v4085_v3, %v2954_v40  ;;  %vm5921_vm0 = vcmp.eq.f32.partialorder %v2961_v28, 8.507059e+37  ;;  %v2964_v7 = vor.u32 1.1754944e-38, %v2963_v30  ;;  %vm2959_vm1 = vmor %vm2957_vm11, %vm2958_vm14  ;;  %v2541_v10 = vpop.f32.mrf.mxu1 }
 0x489   : > { %v3066_v20 = vand.u32 2147483647, %v5865_v16  ;;  %v2574_v8 = vadd.f32 %v2540_v17, %v5756_v2  ;;  %3318 = vst.msk [vmem:[%s5640_s12 + $0x28] sm:$0xff] %vm3312_vm7, %v2921_v44  ;;  %v3059_v60 = vsub.f32 1.0, %v3058_v11  ;;  %v2453_v49 = vadd.f32 %v2452_v15, %v2363_v21 }
 0x48a   : > { %v5916_v53 = vpop.permute.xlu1 %2744  ;;  %v3080_v63 = vsel %vm3079_vm15, %v4083_v62, %v3076_v59  ;;  %v2956_v12 = vadd.f32 %v4085_v3, %v2955_v56  ;;  %vm3063_vm3 = vweird.f32 %v4087_v34  ;;  %v3068_v2 = vand.u32 2147483648, %v5865_v16 }
 0x48b   : > { %v4089_v39 = vpop.eup %4088  ;;  %v3085_v36 = vsel %vm5894_vm10, %v3084_v37, %v3080_v63  ;;  %2606 = vst.msk [vmem:[#allocation3 + $0xf0] sm:$0xff] %vm328_vm2, %v2574_v8  ;;  %4090 = vrcp.f32 %v5916_v53  ;;  %v3060_v57 = vmul.f32 %v4087_v34, %v3059_v60  ;;  %v2084_v46 = vmul.f32 %v5660_v29, %v1892_v42 }
 0x48c   : > { %v3086_v62 = vmul.f32 %v3085_v36, %v5616_v23  ;;  %v2960_v5 = vsel %vm2959_vm1, %v4085_v3, %v2956_v12  ;;  %v2998_v43 = vmul.f32 %v4089_v39, %v5878_v6  ;;  %v2542_v0 = vadd.f32 %v2541_v10, %v2453_v49 }
 0x48d   : > { %v2965_v61 = vsel %vm5921_vm0, %v2964_v7, %v2960_v5  ;;  %v3061_v35 = vadd.f32 %v4087_v34, %v3060_v57  ;;  %vm3062_vm4 = vweird.f32 %v5865_v16  ;;  %vm3067_vm6 = vcmp.eq.f32.partialorder %v3066_v20, 8.507059e+37 }
 0x48e   : > { %3329 = vst.msk [vmem:[%s5640_s12 + $0x80] sm:$0xff] %vm3312_vm7, %v3086_v62  ;;  %v2966_v51 = vmul.f32 %v2965_v61, %v5585_v1  ;;  %v2999_v23 = vsub.f32 1.0, %v2998_v43  ;;  %vm3064_vm5 = vmor %vm3062_vm4, %vm3063_vm3  ;;  %v3069_v3 = vor.u32 1.1754944e-38, %v3068_v2  ;;  %v3008_v14 = vand.u32 2147483648, %v5878_v6 }
 0x48f   : > { %v2575_v4 = vadd.f32 %v2542_v0, %v2084_v46  ;;  %v3065_v29 = vsel %vm3064_vm5, %v4087_v34, %v3061_v35  ;;  %vm3003_vm8 = vweird.f32 %v4089_v39  ;;  %v3006_v28 = vand.u32 2147483647, %v5878_v6  ;;  %v2770_v1 = vpop.permute.xlu2 %2769 }
 0x490   : > { %3321 = vst.msk [vmem:[%s5640_s12 + $0x40] sm:$0xff] %vm3312_vm7, %v2966_v51  ;;  %v3000_v22 = vmul.f32 %v4089_v39, %v2999_v23  ;;  %v3070_v13 = vsel %vm3067_vm6, %v3069_v3, %v3065_v29  ;;  %4092 = vrcp.f32 %v2770_v1  ;;  %vm3002_vm9 = vweird.f32 %v5878_v6 }
 0x491   : > { %v4091_v16 = vpop.eup %4090  ;;  %2607 = vst.msk [vmem:[#allocation3 + $0xf8] sm:$0xff] %vm328_vm2, %v2575_v4  ;;  %v3071_v9 = vmul.f32 %v3070_v13, %v5593_v25  ;;  %vm3004_vm10 = vmor %vm3002_vm9, %vm3003_vm8  ;;  %v3009_v26 = vor.u32 1.1754944e-38, %v3008_v14  ;;  %vm3007_vm2 = vcmp.eq.f32.partialorder %v3006_v28, 8.507059e+37  ;;  %v3053_v21 = vand.u32 2147483648, %v5916_v53 }
 0x492   : > { %v5951_v30 = vpop.permute.xlu1 %2759  ;;  %v3001_v47 = vadd.f32 %v4089_v39, %v3000_v22  ;;  %v3043_v40 = vmul.f32 %v4091_v16, %v5916_v53  ;;  %v5957_v34 = vld [vmem:[#allocation3 + $0xf0] sm:$0xff]  ;;  %vm3048_vm11 = vweird.f32 %v4091_v16  ;;  %v3051_v59 = vand.u32 2147483647, %v5916_v53 }
 0x493   : > { %2824 = vperm.xlu0 %3800, %v5957_v34   ;;  %4094 = vrcp.f32 %v5951_v30  ;;  %3328 = vst.msk [vmem:[%s5640_s12 + $0x78] sm:$0xff] %vm3312_vm7, %v3071_v9  ;;  %vm3047_vm12 = vweird.f32 %v5916_v53  ;;  %v3054_v8 = vor.u32 1.1754944e-38, %v3053_v21  ;;  %v3126_v12 = vand.u32 2147483647, %v2770_v1 }
 0x494   : > { %v3005_v37 = vsel %vm3004_vm10, %v4089_v39, %v3001_v47  ;;  %v3044_v17 = vsub.f32 1.0, %v3043_v40  ;;  %vm3049_vm13 = vmor %vm3047_vm12, %vm3048_vm11  ;;  %vm3052_vm14 = vcmp.eq.f32.partialorder %v3051_v59, 8.507059e+37  ;;  %v3128_v60 = vand.u32 2147483648, %v2770_v1 }
 0x495   : > { %v3010_v25 = vsel %vm3007_vm2, %v3009_v26, %v3005_v37  ;;  %vm3122_vm0 = vweird.f32 %v2770_v1  ;;  %v3098_v36 = vand.u32 2147483648, %v5951_v30  ;;  %v3096_v5 = vand.u32 2147483647, %v5951_v30 }
 0x496   : > { %v3011_v6 = vmul.f32 %v3010_v25, %v5600_v55  ;;  %v3045_v44 = vmul.f32 %v4091_v16, %v3044_v17  ;;  %v4093_v56 = vpop.eup %4092  ;;  %v3129_v57 = vor.u32 1.1754944e-38, %v3128_v60  ;;  %vm3127_vm4 = vcmp.eq.f32.partialorder %v3126_v12, 8.507059e+37 }
 0x497   : > { %v3118_v58 = vmul.f32 %v4093_v56, %v2770_v1  ;;  %vm3123_vm15 = vweird.f32 %v4093_v56  ;;  %vm3092_vm5 = vweird.f32 %v5951_v30  ;;  %v3099_v61 = vor.u32 1.1754944e-38, %v3098_v36 }
 0x498   : > { %3324 = vst.msk [vmem:[%s5640_s12 + $0x58] sm:$0xff] %vm3312_vm7, %v3011_v6  ;;  %v3046_v11 = vadd.f32 %v4091_v16, %v3045_v44  ;;  %v5969_v7 = vld [vmem:[#allocation3 + $0xf8] sm:$0xff]  ;;  %vm3124_vm3 = vmor %vm3122_vm0, %vm3123_vm15  ;;  %vm3097_vm8 = vcmp.eq.f32.partialorder %v3096_v5, 8.507059e+37 }
 0x499   : > { %v4095_v20 = vpop.eup %4094  ;;  %2829 = vperm.xlu2 %3801, %v5969_v7   ;;  %v3119_v15 = vsub.f32 1.0, %v3118_v58 }
 0x49a   : > { %v3050_v55 = vsel %vm3049_vm13, %v4091_v16, %v3046_v11  ;;  %v3088_v42 = vmul.f32 %v4095_v20, %v5951_v30  ;;  %vm3093_vm1 = vweird.f32 %v4095_v20 }
 0x49b   : > { %v3055_v63 = vsel %vm3052_vm14, %v3054_v8, %v3050_v55  ;;  %v3120_v53 = vmul.f32 %v4093_v56, %v3119_v15  ;;  %vm3094_vm6 = vmor %vm3092_vm5, %vm3093_vm1 }
 0x49c   : > { %v3056_v49 = vmul.f32 %v3055_v63, %v5609_v27  ;;  %v3089_v39 = vsub.f32 1.0, %v3088_v42 }
 0x49d   : > { %v3121_v2 = vadd.f32 %v4093_v56, %v3120_v53 }
 0x49e   : > { %3327 = vst.msk [vmem:[%s5640_s12 + $0x70] sm:$0xff] %vm3312_vm7, %v3056_v49  ;;  %v3090_v62 = vmul.f32 %v4095_v20, %v3089_v39 }
 0x49f   : > { %v3125_v10 = vsel %vm3124_vm3, %v4093_v56, %v3121_v2  ;;  %v2765_v43 = vpop.permute.xlu0 %2764 }
 0x4a0   : > { %v3091_v27 = vadd.f32 %v4095_v20, %v3090_v62  ;;  %v3130_v46 = vsel %vm3127_vm4, %v3129_v57, %v3125_v10  ;;  %4096 = vrcp.f32 %v2765_v43  ;;  %v3113_v22 = vand.u32 2147483648, %v2765_v43 }
 0x4a1   : > { %v3131_v0 = vmul.f32 %v3130_v46, %v5632_v19  ;;  %v3111_v1 = vand.u32 2147483647, %v2765_v43  ;;  %vm3107_vm10 = vweird.f32 %v2765_v43 }
 0x4a2   : > { %v3095_v51 = vsel %vm3094_vm6, %v4095_v20, %v3091_v27  ;;  %v3114_v16 = vor.u32 1.1754944e-38, %v3113_v22 }
 0x4a3   : > { %v3100_v35 = vsel %vm3097_vm8, %v3099_v61, %v3095_v51  ;;  %3332 = vst.msk [vmem:[%s5640_s12 + $0x98] sm:$0xff] %vm3312_vm7, %v3131_v0  ;;  %vm3112_vm11 = vcmp.eq.f32.partialorder %v3111_v1, 8.507059e+37 }
 0x4a4   : > { %v3101_v23 = vmul.f32 %v3100_v35, %v5618_v24 }
 0x4a6   : > { %3330 = vst.msk [vmem:[%s5640_s12 + $0x88] sm:$0xff] %vm3312_vm7, %v3101_v23  ;;  %v4097_v3 = vpop.eup %4096 }
 0x4a7   : > { %v3103_v14 = vmul.f32 %v4097_v3, %v2765_v43  ;;  %v2785_v4 = vpop.permute.xlu2 %2784  ;;  %vm3108_vm9 = vweird.f32 %v4097_v3 }
 0x4a8   : > { %4098 = vrcp.f32 %v2785_v4  ;;  %vm3109_vm2 = vmor %vm3107_vm10, %vm3108_vm9  ;;  %v3173_v37 = vand.u32 2147483648, %v2785_v4  ;;  %v3171_v25 = vand.u32 2147483647, %v2785_v4  ;;  %vm3167_vm13 = vweird.f32 %v2785_v4 }
 0x4a9   : > { %v3104_v29 = vsub.f32 1.0, %v3103_v14 }
 0x4aa   : > { %v3174_v44 = vor.u32 1.1754944e-38, %v3173_v37  ;;  %vm3172_vm15 = vcmp.eq.f32.partialorder %v3171_v25, 8.507059e+37 }
 0x4ab   : > { %v3105_v28 = vmul.f32 %v4097_v3, %v3104_v29 }
 0x4ad   : > { %v3106_v19 = vadd.f32 %v4097_v3, %v3105_v28 }
 0x4ae   : > { %v4099_v30 = vpop.eup %4098 }
 0x4af   : > { %v3110_v13 = vsel %vm3109_vm2, %v4097_v3, %v3106_v19  ;;  %v3163_v24 = vmul.f32 %v4099_v30, %v2785_v4  ;;  %v2775_v9 = vpop.permute.xlu1 %2774  ;;  %vm3168_vm12 = vweird.f32 %v4099_v30 }
 0x4b0   : > { %v3115_v47 = vsel %vm3112_vm11, %v3114_v16, %v3110_v13  ;;  %4100 = vrcp.f32 %v2775_v9  ;;  %vm3169_vm14 = vmor %vm3167_vm13, %vm3168_vm12  ;;  %v3143_v8 = vand.u32 2147483648, %v2775_v9  ;;  %v3141_v15 = vand.u32 2147483647, %v2775_v9 }
 0x4b1   : > { %v3116_v40 = vmul.f32 %v3115_v47, %v5626_v31  ;;  %v3164_v26 = vsub.f32 1.0, %v3163_v24  ;;  %vm3137_vm1 = vweird.f32 %v2775_v9 }
 0x4b2   : > { %v3144_v12 = vor.u32 1.1754944e-38, %v3143_v8  ;;  %vm3142_vm4 = vcmp.eq.f32.partialorder %v3141_v15, 8.507059e+37 }
 0x4b3   : > { %3331 = vst.msk [vmem:[%s5640_s12 + $0x90] sm:$0xff] %vm3312_vm7, %v3116_v40  ;;  %v3165_v17 = vmul.f32 %v4099_v30, %v3164_v26 }
 0x4b5   : > { %v3166_v21 = vadd.f32 %v4099_v30, %v3165_v17 }
 0x4b6   : > { %v4101_v6 = vpop.eup %4100 }
 0x4b7   : > { %v3170_v59 = vsel %vm3169_vm14, %v4099_v30, %v3166_v21  ;;  %v3133_v56 = vmul.f32 %v4101_v6, %v2775_v9  ;;  %v2780_v11 = vpop.permute.xlu0 %2779  ;;  %vm3138_vm0 = vweird.f32 %v4101_v6 }
 0x4b8   : > { %v3175_v58 = vsel %vm3172_vm15, %v3174_v44, %v3170_v59  ;;  %4102 = vrcp.f32 %v2780_v11  ;;  %vm3139_vm3 = vmor %vm3137_vm1, %vm3138_vm0  ;;  %v3158_v2 = vand.u32 2147483648, %v2780_v11  ;;  %v3156_v5 = vand.u32 2147483647, %v2780_v11 }
 0x4b9   : > { %v3176_v31 = vmul.f32 %v3175_v58, %v5662_v18  ;;  %v3134_v20 = vsub.f32 1.0, %v3133_v56  ;;  %vm3152_vm6 = vweird.f32 %v2780_v11 }
 0x4ba   : > { %v3159_v27 = vor.u32 1.1754944e-38, %v3158_v2  ;;  %vm3157_vm9 = vcmp.eq.f32.partialorder %v3156_v5, 8.507059e+37 }
 0x4bb   : > { %3335 = vst.msk [vmem:[%s5640_s12 + $0xb0] sm:$0xff] %vm3312_vm7, %v3176_v31  ;;  %v3135_v55 = vmul.f32 %v4101_v6, %v3134_v20 }
 0x4bd   : > { %v3136_v42 = vadd.f32 %v4101_v6, %v3135_v55 }
 0x4be   : > { %v4103_v63 = vpop.eup %4102 }
 0x4bf   : > { %v3140_v60 = vsel %vm3139_vm3, %v4101_v6, %v3136_v42  ;;  %v3148_v49 = vmul.f32 %v4103_v63, %v2780_v11  ;;  %v2800_v53 = vpop.permute.xlu2 %2799  ;;  %vm3153_vm5 = vweird.f32 %v4103_v63 }
 0x4c0   : > { %v3145_v39 = vsel %vm3142_vm4, %v3144_v12, %v3140_v60  ;;  %4104 = vrcp.f32 %v2800_v53  ;;  %vm3154_vm8 = vmor %vm3152_vm6, %vm3153_vm5  ;;  %v3218_v35 = vand.u32 2147483648, %v2800_v53  ;;  %v3216_v3 = vand.u32 2147483647, %v2800_v53 }
 0x4c1   : > { %v3146_v18 = vmul.f32 %v3145_v39, %v5648_v33  ;;  %v3149_v36 = vsub.f32 1.0, %v3148_v49  ;;  %vm3212_vm2 = vweird.f32 %v2800_v53 }
 0x4c2   : > { %v3219_v29 = vor.u32 1.1754944e-38, %v3218_v35  ;;  %vm3217_vm12 = vcmp.eq.f32.partialorder %v3216_v3, 8.507059e+37 }
 0x4c3   : > { %3333 = vst.msk [vmem:[%s5640_s12 + $0xa0] sm:$0xff] %vm3312_vm7, %v3146_v18  ;;  %v3150_v62 = vmul.f32 %v4103_v63, %v3149_v36 }
 0x4c5   : > { %v3151_v57 = vadd.f32 %v4103_v63, %v3150_v62 }
 0x4c6   : > { %v4105_v10 = vpop.eup %4104 }
 0x4c7   : > { %v3155_v43 = vsel %vm3154_vm8, %v4103_v63, %v3151_v57  ;;  %v3208_v46 = vmul.f32 %v4105_v10, %v2800_v53  ;;  %v2790_v61 = vpop.permute.xlu1 %2789  ;;  %vm3213_vm10 = vweird.f32 %v4105_v10 }
 0x4c8   : > { %v3160_v0 = vsel %vm3157_vm9, %v3159_v27, %v3155_v43  ;;  %4106 = vrcp.f32 %v2790_v61  ;;  %vm3214_vm11 = vmor %vm3212_vm2, %vm3213_vm10  ;;  %v3188_v16 = vand.u32 2147483648, %v2790_v61  ;;  %v3186_v24 = vand.u32 2147483647, %v2790_v61 }
 0x4c9   : > { %v3161_v33 = vmul.f32 %v3160_v0, %v5654_v52  ;;  %v3209_v51 = vsub.f32 1.0, %v3208_v46  ;;  %vm3182_vm14 = vweird.f32 %v2790_v61 }
 0x4ca   : > { %v3189_v40 = vor.u32 1.1754944e-38, %v3188_v16  ;;  %vm3187_vm0 = vcmp.eq.f32.partialorder %v3186_v24, 8.507059e+37 }
 0x4cb   : > { %3334 = vst.msk [vmem:[%s5640_s12 + $0xa8] sm:$0xff] %vm3312_vm7, %v3161_v33  ;;  %v3210_v23 = vmul.f32 %v4105_v10, %v3209_v51 }
 0x4cd   : > { %v3211_v14 = vadd.f32 %v4105_v10, %v3210_v23 }
 0x4ce   : > { %v4107_v4 = vpop.eup %4106 }
 0x4cf   : > { %v3215_v22 = vsel %vm3214_vm11, %v4105_v10, %v3211_v14  ;;  %v3178_v28 = vmul.f32 %v4107_v4, %v2790_v61  ;;  %v2795_v1 = vpop.permute.xlu0 %2794  ;;  %vm3183_vm13 = vweird.f32 %v4107_v4 }
 0x4d0   : > { %v3220_v19 = vsel %vm3217_vm12, %v3219_v29, %v3215_v22  ;;  %4108 = vrcp.f32 %v2795_v1  ;;  %vm3184_vm15 = vmor %vm3182_vm14, %vm3183_vm13  ;;  %v3203_v6 = vand.u32 2147483648, %v2795_v1  ;;  %v3201_v59 = vand.u32 2147483647, %v2795_v1 }
 0x4d1   : > { %v3221_v52 = vmul.f32 %v3220_v19, %v5723_v50  ;;  %v3179_v30 = vsub.f32 1.0, %v3178_v28  ;;  %vm3197_vm3 = vweird.f32 %v2795_v1 }
 0x4d2   : > { %v3204_v11 = vor.u32 1.1754944e-38, %v3203_v6  ;;  %vm3202_vm5 = vcmp.eq.f32.partialorder %v3201_v59, 8.507059e+37 }
 0x4d3   : > { %3338 = vst.msk [vmem:[%s5640_s12 + $0xc8] sm:$0xff] %vm3312_vm7, %v3221_v52  ;;  %v3180_v13 = vmul.f32 %v4107_v4, %v3179_v30 }
 0x4d5   : > { %v3181_v9 = vadd.f32 %v4107_v4, %v3180_v13 }
 0x4d6   : > { %v4109_v47 = vpop.eup %4108 }
 0x4d7   : > { %v3185_v26 = vsel %vm3184_vm15, %v4107_v4, %v3181_v9  ;;  %v3193_v37 = vmul.f32 %v4109_v47, %v2795_v1  ;;  %vm3198_vm1 = vweird.f32 %v4109_v47 }
 0x4d8   : > { %v3190_v17 = vsel %vm3187_vm0, %v3189_v40, %v3185_v26  ;;  %vm3199_vm4 = vmor %vm3197_vm3, %vm3198_vm1 }
 0x4d9   : > { %v3191_v50 = vmul.f32 %v3190_v17, %v5667_v41  ;;  %v3194_v21 = vsub.f32 1.0, %v3193_v37 }
 0x4da   : > { %v2815_v25 = vpop.permute.xlu2 %2814 }
 0x4db   : > { %4110 = vrcp.f32 %v2815_v25  ;;  %3336 = vst.msk [vmem:[%s5640_s12 + $0xb8] sm:$0xff] %vm3312_vm7, %v3191_v50  ;;  %v3195_v44 = vmul.f32 %v4109_v47, %v3194_v21  ;;  %v3263_v42 = vand.u32 2147483648, %v2815_v25  ;;  %v3261_v12 = vand.u32 2147483647, %v2815_v25 }
 0x4dc   : > { %vm3257_vm8 = vweird.f32 %v2815_v25 }
 0x4dd   : > { %v3196_v56 = vadd.f32 %v4109_v47, %v3195_v44  ;;  %v3264_v53 = vor.u32 1.1754944e-38, %v3263_v42  ;;  %vm3262_vm10 = vcmp.eq.f32.partialorder %v3261_v12, 8.507059e+37 }
 0x4df   : > { %v3200_v31 = vsel %vm3199_vm4, %v4109_v47, %v3196_v56 }
 0x4e0   : > { %v3205_v20 = vsel %vm3202_vm5, %v3204_v11, %v3200_v31 }
 0x4e1   : > { %v4111_v58 = vpop.eup %4110  ;;  %v2805_v55 = vpop.permute.xlu1 %2804  ;;  %v3206_v41 = vmul.f32 %v3205_v20, %v5684_v45 }
 0x4e2   : > { %v3253_v8 = vmul.f32 %v4111_v58, %v2815_v25  ;;  %4112 = vrcp.f32 %v2805_v55  ;;  %vm3258_vm6 = vweird.f32 %v4111_v58  ;;  %v3233_v5 = vand.u32 2147483648, %v2805_v55 }
 0x4e3   : > { %3337 = vst.msk [vmem:[%s5640_s12 + $0xc0] sm:$0xff] %vm3312_vm7, %v3206_v41  ;;  %vm3259_vm9 = vmor %vm3257_vm8, %vm3258_vm6  ;;  %v3231_v10 = vand.u32 2147483647, %v2805_v55  ;;  %vm3227_vm11 = vweird.f32 %v2805_v55 }
 0x4e4   : > { %v3254_v15 = vsub.f32 1.0, %v3253_v8  ;;  %v3234_v46 = vor.u32 1.1754944e-38, %v3233_v5 }
 0x4e5   : > { %vm3232_vm13 = vcmp.eq.f32.partialorder %v3231_v10, 8.507059e+37 }
 0x4e6   : > { %v3255_v63 = vmul.f32 %v4111_v58, %v3254_v15 }
 0x4e8   : > { %v3256_v60 = vadd.f32 %v4111_v58, %v3255_v63  ;;  %v4113_v49 = vpop.eup %4112 }
 0x4e9   : > { %v3223_v18 = vmul.f32 %v4113_v49, %v2805_v55  ;;  %v2810_v36 = vpop.permute.xlu0 %2809  ;;  %vm3228_vm2 = vweird.f32 %v4113_v49 }
 0x4ea   : > { %v3260_v39 = vsel %vm3259_vm9, %v4111_v58, %v3256_v60  ;;  %4114 = vrcp.f32 %v2810_v36  ;;  %vm3229_vm12 = vmor %vm3227_vm11, %vm3228_vm2  ;;  %v3248_v23 = vand.u32 2147483648, %v2810_v36  ;;  %v3246_v14 = vand.u32 2147483647, %v2810_v36 }
 0x4eb   : > { %v3265_v2 = vsel %vm3262_vm10, %v3264_v53, %v3260_v39  ;;  %v3224_v62 = vsub.f32 1.0, %v3223_v18  ;;  %vm3242_vm15 = vweird.f32 %v2810_v36 }
 0x4ec   : > { %v3266_v45 = vmul.f32 %v3265_v2, %v5863_v54  ;;  %v3249_v29 = vor.u32 1.1754944e-38, %v3248_v23  ;;  %vm3247_vm1 = vcmp.eq.f32.partialorder %v3246_v14, 8.507059e+37 }
 0x4ed   : > { %v3225_v57 = vmul.f32 %v4113_v49, %v3224_v62 }
 0x4ee   : > { %3341 = vst.msk [vmem:[%s5640_s12 + $0xe0] sm:$0xff] %vm3312_vm7, %v3266_v45 }
 0x4ef   : > { %v3226_v27 = vadd.f32 %v4113_v49, %v3225_v57 }
 0x4f0   : > { %v4115_v43 = vpop.eup %4114 }
 0x4f1   : > { %v3230_v61 = vsel %vm3229_vm12, %v4113_v49, %v3226_v27  ;;  %v3238_v0 = vmul.f32 %v4115_v43, %v2810_v36  ;;  %vm3243_vm14 = vweird.f32 %v4115_v43 }
 0x4f2   : > { %v3235_v33 = vsel %vm3232_vm13, %v3234_v46, %v3230_v61  ;;  %vm3244_vm0 = vmor %vm3242_vm15, %vm3243_vm14 }
 0x4f3   : > { %v3236_v51 = vmul.f32 %v3235_v33, %v5778_v38  ;;  %v3239_v54 = vsub.f32 1.0, %v3238_v0  ;;  %v2830_v35 = vpop.permute.xlu2 %2829 }
 0x4f4   : > { %4116 = vrcp.f32 %v2830_v35  ;;  %v3308_v16 = vand.u32 2147483648, %v2830_v35  ;;  %v3306_v24 = vand.u32 2147483647, %v2830_v35  ;;  %vm3302_vm4 = vweird.f32 %v2830_v35 }
 0x4f5   : > { %3339 = vst.msk [vmem:[%s5640_s12 + $0xd0] sm:$0xff] %vm3312_vm7, %v3236_v51  ;;  %v3240_v3 = vmul.f32 %v4115_v43, %v3239_v54 }
 0x4f6   : > { %v3309_v26 = vor.u32 1.1754944e-38, %v3308_v16  ;;  %vm3307_vm6 = vcmp.eq.f32.partialorder %v3306_v24, 8.507059e+37 }
 0x4f7   : > { %v3241_v4 = vadd.f32 %v4115_v43, %v3240_v3 }
 0x4f9   : > { %v3245_v22 = vsel %vm3244_vm0, %v4115_v43, %v3241_v4 }
 0x4fa   : > { %v2820_v28 = vpop.permute.xlu1 %2819  ;;  %v4117_v1 = vpop.eup %4116  ;;  %v3250_v19 = vsel %vm3247_vm1, %v3249_v29, %v3245_v22 }
 0x4fb   : > { %4118 = vrcp.f32 %v2820_v28  ;;  %v3251_v38 = vmul.f32 %v3250_v19, %v5821_v32  ;;  %v3298_v52 = vmul.f32 %v4117_v1, %v2830_v35  ;;  %vm3303_vm3 = vweird.f32 %v4117_v1 }
 0x4fc   : > { %vm3304_vm5 = vmor %vm3302_vm4, %vm3303_vm3  ;;  %v3278_v32 = vand.u32 2147483648, %v2820_v28  ;;  %v3276_v6 = vand.u32 2147483647, %v2820_v28  ;;  %vm3272_vm9 = vweird.f32 %v2820_v28 }
 0x4fd   : > { %3340 = vst.msk [vmem:[%s5640_s12 + $0xd8] sm:$0xff] %vm3312_vm7, %v3251_v38  ;;  %v3299_v30 = vsub.f32 1.0, %v3298_v52 }
 0x4fe   : > { %v3279_v56 = vor.u32 1.1754944e-38, %v3278_v32  ;;  %vm3277_vm2 = vcmp.eq.f32.partialorder %v3276_v6, 8.507059e+37 }
 0x4ff   : > { %v3300_v13 = vmul.f32 %v4117_v1, %v3299_v30 }
 0x501   : > { %v4119_v9 = vpop.eup %4118  ;;  %v3301_v47 = vadd.f32 %v4117_v1, %v3300_v13 }
 0x502   : > { %v3268_v40 = vmul.f32 %v4119_v9, %v2820_v28  ;;  %vm3273_vm8 = vweird.f32 %v4119_v9 }
 0x503   : > { %v3305_v37 = vsel %vm3304_vm5, %v4117_v1, %v3301_v47  ;;  %vm3274_vm10 = vmor %vm3272_vm9, %vm3273_vm8 }
 0x504   : > { %v3269_v17 = vsub.f32 1.0, %v3268_v40  ;;  %v3310_v25 = vsel %vm3307_vm6, %v3309_v26, %v3305_v37 }
 0x505   : > { %v3311_v50 = vmul.f32 %v3310_v25, %v5969_v7  ;;  %v2825_v44 = vpop.permute.xlu0 %2824 }
 0x506   : > { %v3270_v21 = vmul.f32 %v4119_v9, %v3269_v17  ;;  %4120 = vrcp.f32 %v2825_v44  ;;  %v3293_v55 = vand.u32 2147483648, %v2825_v44  ;;  %v3291_v15 = vand.u32 2147483647, %v2825_v44 }
 0x507   : > { %3344 = vst.msk [vmem:[%s5640_s12 + $0xf8] sm:$0xff] %vm3312_vm7, %v3311_v50  ;;  %vm3287_vm12 = vweird.f32 %v2825_v44 }
 0x508   : > { %v3271_v59 = vadd.f32 %v4119_v9, %v3270_v21  ;;  %v3294_v63 = vor.u32 1.1754944e-38, %v3293_v55  ;;  %vm3292_vm14 = vcmp.eq.f32.partialorder %v3291_v15, 8.507059e+37 }
 0x50a   : > { %v3275_v11 = vsel %vm3274_vm10, %v4119_v9, %v3271_v59 }
 0x50b   : > { %v3280_v58 = vsel %vm3277_vm2, %v3279_v56, %v3275_v11 }
 0x50c   : > { %v3281_v31 = vmul.f32 %v3280_v58, %v5909_v48  ;;  %v4121_v20 = vpop.eup %4120 }
 0x50d   : > { %v3283_v7 = vmul.f32 %v4121_v20, %v2825_v44  ;;  %vm3288_vm11 = vweird.f32 %v4121_v20 }
 0x50e   : > { %3342 = vst.msk [vmem:[%s5640_s12 + $0xe8] sm:$0xff] %vm3312_vm7, %v3281_v31  ;;  %vm3289_vm13 = vmor %vm3287_vm12, %vm3288_vm11 }
 0x50f   : > { %v3284_v8 = vsub.f32 1.0, %v3283_v7 }
 0x511   : > { %v3285_v41 = vmul.f32 %v4121_v20, %v3284_v8 }
 0x513   : > { %v3286_v42 = vadd.f32 %v4121_v20, %v3285_v41 }
 0x515   : > { %v3290_v12 = vsel %vm3289_vm13, %v4121_v20, %v3286_v42 }
 0x516   : > { %v3295_v60 = vsel %vm3292_vm14, %v3294_v63, %v3290_v12 }
 0x517   : > { %v3296_v49 = vmul.f32 %v3295_v60, %v5957_v34 }
 0x519   : > { %3343 = vst.msk [vmem:[%s5640_s12 + $0xf0] sm:$0xff] %vm3312_vm7, %v3296_v49 }
 0x51a PF: > { %s14_s17 = sadd.s32 1, %s4144_s17   ;;  %s6395_s15 = smov %s4140_s16 }
 0x51b   : > { %p11_p5 = scmp.ge.s32.totalorder %s14_s17, 4   ;;  %s6396_s16 = smov %s6398_s18 }
 0x51d   :  { %13 = sbr.rel (!%p11_p5) target bundleno = 2 (0x2), region = 75 }

</bundles_post_ra>
